<compile_context>
chip_gen: v7x
topology: tpu7x:2x2x1
jax: 0.10.0
libtpu: 0.0.40
codegen_flags: <defaults>
</compile_context>

<pallas_src>
import functools

import jax
import jax.numpy as jnp
from jax.experimental import pallas as pl
from jax.experimental.pallas import tpu as pltpu

_BN_EPS = 1e-5


# ----------------------------------------------------------------------------
# Hardware-aware knobs
# ----------------------------------------------------------------------------

def _vmem_limit_bytes():
    """Generation-aware scoped VMEM limit (v7x has only 64 MiB physical)."""
    cap = 64 * 1024 * 1024
    try:
        info = pltpu.get_tpu_info()
        cap = int(getattr(info, "vmem_capacity_bytes", cap))
    except Exception:
        pass
    return min(int(cap * 3 // 5), 96 * 1024 * 1024)


def _compiler_params(sems):
    return pltpu.CompilerParams(dimension_semantics=sems,
                                vmem_limit_bytes=_vmem_limit_bytes())


def _lane_tile(total, target=2048):
    """Largest multiple of 128 <= target that divides total (else full)."""
    if total <= target or total % 128:
        return total
    tl = target - (target % 128)
    while tl >= 128:
        if total % tl == 0:
            return tl
        tl -= 128
    return total


def _pad_origin(W):
    # Lane-aligned start of the image interior inside the flat padded scratch
    # (must be >= W + 1 so the top-left tap never goes below index 0).
    return ((W + 1 + 127) // 128) * 128


def _pad_len(H, W):
    return _pad_origin(W) + H * W + W + 1


# ----------------------------------------------------------------------------
# Kernel bodies
# ----------------------------------------------------------------------------

def _conv_body(xp_ref, w_ref, o_ref, stats_ref, *, H, W, origin):
    """padding=1 3x3 conv from a zero-bordered flat scratch (lane-dense).

    xp_ref:    (Cin, L) bf16 scratch, rows flattened; the image lives at
               columns [origin, origin + H*W), borders are zero.
    w_ref:     (3, 3, Cout, Cin) bf16 weights, indexed (kh, kw).
    o_ref:     (1, Cout, H*W) bf16 raw conv output.
    stats_ref: (1, Cout, 2) f32 per-sample partial [sum, sumsq] of the stored
               (bf16-rounded) output, for the deferred BatchNorm.
    """
    HW = H * W
    Cout = o_ref.shape[1]
    col = jax.lax.broadcasted_iota(jnp.int32, (1, HW), 1) % W
    acc = jnp.zeros((Cout, HW), jnp.float32)
    for dj in (-1, 0, 1):
        part = jnp.zeros((Cout, HW), jnp.float32)
        for di in (-1, 0, 1):
            start = origin + di * W + dj
            xs = xp_ref[:, start:start + HW]          # static shifted tap
            part = part + jnp.dot(w_ref[di + 1, dj + 1], xs,
                                  preferred_element_type=jnp.float32)
        # dw != 0 taps read the neighbouring row's edge pixel at the image's
        # W boundary; zero exactly that output column for the whole dj group.
        if dj == -1:
            part = jnp.where(col >= 1, part, 0.0)
        elif dj == 1:
            part = jnp.where(col <= W - 2, part, 0.0)
        acc = acc + part
    y16 = acc.astype(o_ref.dtype)
    o_ref[0] = y16
    yf = y16.astype(jnp.float32)
    stats_ref[0] = jnp.concatenate(
        [jnp.sum(yf, axis=1, keepdims=True),
         jnp.sum(yf * yf, axis=1, keepdims=True)], axis=1)


def _conv3x3_cat_kernel(y_ref, f_ref, w_ref, o_ref, stats_ref, xp_ref,
                        *, H, W, origin):
    """First ConvBlock conv: channel concat fused as two disjoint-row stores."""
    HW = H * W
    Cy = y_ref.shape[1]
    Ct = xp_ref.shape[0]
    L = xp_ref.shape[1]
    xp_ref[:, 0:origin] = jnp.zeros((Ct, origin), xp_ref.dtype)
    xp_ref[:, origin + HW:L] = jnp.zeros((Ct, L - origin - HW), xp_ref.dtype)
    xp_ref[0:Cy, origin:origin + HW] = y_ref[0]
    xp_ref[Cy:Ct, origin:origin + HW] = f_ref[0]
    _conv_body(xp_ref, w_ref, o_ref, stats_ref, H=H, W=W, origin=origin)


def _conv3x3_norm_kernel(x_ref, ss_ref, w_ref, o_ref, stats_ref, xp_ref,
                         *, H, W, origin):
    """Second ConvBlock conv: previous conv's BN+ReLU fused into the load."""
    HW = H * W
    C = xp_ref.shape[0]
    L = xp_ref.shape[1]
    xp_ref[:, 0:origin] = jnp.zeros((C, origin), xp_ref.dtype)
    xp_ref[:, origin + HW:L] = jnp.zeros((C, L - origin - HW), xp_ref.dtype)
    xn = jnp.maximum(x_ref[0].astype(jnp.float32) * ss_ref[0] + ss_ref[1], 0.0)
    xp_ref[:, origin:origin + HW] = xn.astype(xp_ref.dtype)   # single bf16 cast
    _conv_body(xp_ref, w_ref, o_ref, stats_ref, H=H, W=W, origin=origin)


def _upconv_compute(xb, w_ref, b_ref, o_ref):
    """ConvTranspose2d(k=2, s=2): 4 lane-dense matmuls, 4 direct plane stores.

    xb:    (Cin, tl) bf16.   w_ref: (2, 2, Cout, Cin) bf16.  b_ref: (Cout, 1) f32.
    o_ref: (1, 2, 2, Cout, tl) bf16 (the (kh, kw) planes, lane-dense).
    """
    b = b_ref[...]
    for kh in range(2):
        for kw in range(2):
            y = jnp.dot(w_ref[kh, kw], xb,
                        preferred_element_type=jnp.float32) + b
            o_ref[0, kh, kw] = y.astype(o_ref.dtype)


def _upconv_kernel(x_ref, w_ref, b_ref, o_ref):
    _upconv_compute(x_ref[0], w_ref, b_ref, o_ref)


def _upconv_norm_kernel(x_ref, ss_ref, w_ref, b_ref, o_ref):
    """Upconv with the previous stage's BN2+ReLU fused into the input load."""
    xn = jnp.maximum(x_ref[0].astype(jnp.float32) * ss_ref[0] + ss_ref[1], 0.0)
    _upconv_compute(xn.astype(jnp.bfloat16), w_ref, b_ref, o_ref)


def _norm_relu_kernel(x_ref, ss_ref, o_ref):
    """Standalone BN+ReLU (only for the very last stage output)."""
    o_ref[0] = jnp.maximum(
        x_ref[0].astype(jnp.float32) * ss_ref[0] + ss_ref[1], 0.0)


# ----------------------------------------------------------------------------
# pallas_call wrappers
# ----------------------------------------------------------------------------

def upconv2x2(x, w_p, b_p, H, W, ss=None):
    """x: (N, Cin, H*W) bf16 -> (N, Cout, (2H)*(2W)) bf16 (bias added, raw).

    If ss (2, Cin, 1) f32 is given, the previous stage's deferred BN+ReLU is
    applied to x on load.
    """
    N, Cin, HW = x.shape
    Cout = w_p.shape[2]
    tl = _lane_tile(HW)
    grid = (N, HW // tl)

    x_spec = pl.BlockSpec((1, Cin, tl), lambda n, l: (n, 0, l))
    w_spec = pl.BlockSpec((2, 2, Cout, Cin), lambda n, l: (0, 0, 0, 0))
    b_spec = pl.BlockSpec((Cout, 1), lambda n, l: (0, 0))
    o_spec = pl.BlockSpec((1, 2, 2, Cout, tl), lambda n, l: (n, 0, 0, 0, l))

    if ss is None:
        kernel = _upconv_kernel
        in_specs = [x_spec, w_spec, b_spec]
        args = (x, w_p, b_p)
    else:
        kernel = _upconv_norm_kernel
        ss_spec = pl.BlockSpec((2, Cin, 1), lambda n, l: (0, 0, 0))
        in_specs = [x_spec, ss_spec, w_spec, b_spec]
        args = (x, ss, w_p, b_p)

    y = pl.pallas_call(
        kernel,
        out_shape=jax.ShapeDtypeStruct((N, 2, 2, Cout, HW), jnp.bfloat16),
        grid=grid,
        in_specs=in_specs,
        out_specs=o_spec,
        compiler_params=_compiler_params(("parallel", "parallel")),
    )(*args)
    # (kh, kw) plane layout -> interleaved NCHW rows/cols: one small XLA
    # transpose over the (bf16) upconv activation.  All kernel stores stay
    # lane-dense.  TODO(synk): fold the interleave into the kernel if
    # lane-strided ref stores become worthwhile at production sizes.
    y = y.reshape(N, 2, 2, Cout, H, W).transpose(0, 3, 4, 1, 5, 2)
    return y.reshape(N, Cout, 4 * HW)


def conv3x3_cat(y, f, w_p, H, W):
    """Fused concat([upconv_out, cropped_skip]) -> 3x3 conv (bias-free).

    Returns (raw bf16 conv output (N, Cout, H*W), partial stats (N, Cout, 2)).
    """
    N, Cy, HW = y.shape
    Cf = f.shape[1]
    Cout = w_p.shape[2]
    origin = _pad_origin(W)
    L = _pad_len(H, W)
    kernel = functools.partial(_conv3x3_cat_kernel, H=H, W=W, origin=origin)
    return pl.pallas_call(
        kernel,
        out_shape=(jax.ShapeDtypeStruct((N, Cout, HW), jnp.bfloat16),
                   jax.ShapeDtypeStruct((N, Cout, 2), jnp.float32)),
        grid=(N,),
        in_specs=[pl.BlockSpec((1, Cy, HW), lambda n: (n, 0, 0)),
                  pl.BlockSpec((1, Cf, HW), lambda n: (n, 0, 0)),
                  pl.BlockSpec((3, 3, Cout, Cy + Cf), lambda n: (0, 0, 0, 0))],
        out_specs=(pl.BlockSpec((1, Cout, HW), lambda n: (n, 0, 0)),
                   pl.BlockSpec((1, Cout, 2), lambda n: (n, 0, 0))),
        scratch_shapes=[pltpu.VMEM((Cy + Cf, L), jnp.bfloat16)],
        compiler_params=_compiler_params(("parallel",)),
    )(y, f, w_p)


def conv3x3_norm(x, ss, w_p, H, W):
    """Previous conv's BN+ReLU (scale/shift `ss`) fused into a 3x3 conv load."""
    N, C, HW = x.shape
    Cout = w_p.shape[2]
    origin = _pad_origin(W)
    L = _pad_len(H, W)
    kernel = functools.partial(_conv3x3_norm_kernel, H=H, W=W, origin=origin)
    return pl.pallas_call(
        kernel,
        out_shape=(jax.ShapeDtypeStruct((N, Cout, HW), jnp.bfloat16),
                   jax.ShapeDtypeStruct((N, Cout, 2), jnp.float32)),
        grid=(N,),
        in_specs=[pl.BlockSpec((1, C, HW), lambda n: (n, 0, 0)),
                  pl.BlockSpec((2, C, 1), lambda n: (0, 0, 0)),
                  pl.BlockSpec((3, 3, Cout, C), lambda n: (0, 0, 0, 0))],
        out_specs=(pl.BlockSpec((1, Cout, HW), lambda n: (n, 0, 0)),
                   pl.BlockSpec((1, Cout, 2), lambda n: (n, 0, 0))),
        scratch_shapes=[pltpu.VMEM((C, L), jnp.bfloat16)],
        compiler_params=_compiler_params(("parallel",)),
    )(x, ss, w_p)


def norm_relu(x, ss):
    """Standalone fused BN+ReLU (final stage only).  Lane-dense f32 out."""
    N, C, HW = x.shape
    return pl.pallas_call(
        _norm_relu_kernel,
        out_shape=jax.ShapeDtypeStruct((N, C, HW), jnp.float32),
        grid=(N,),
        in_specs=[pl.BlockSpec((1, C, HW), lambda n: (n, 0, 0)),
                  pl.BlockSpec((2, C, 1), lambda n: (0, 0, 0))],
        out_specs=pl.BlockSpec((1, C, HW), lambda n: (n, 0, 0)),
        compiler_params=_compiler_params(("parallel",)),
    )(x, ss)


# ----------------------------------------------------------------------------
# Deferred BatchNorm: scale/shift from partial stats (tiny (C,)-sized XLA math)
# ----------------------------------------------------------------------------

def _bn_scale_shift(stats, count, gamma, beta):
    """stats: (N, C, 2) partial [sum, sumsq] -> (2, C, 1) f32 [scale, shift]."""
    total = jnp.sum(stats.astype(jnp.float32), axis=0)       # (C, 2)
    mean = total[:, 0] / count
    var = total[:, 1] / count - mean * mean
    scale = gamma * jax.lax.rsqrt(var + _BN_EPS)
    shift = beta - mean * scale
    return jnp.stack([scale, shift], axis=0)[:, :, None].astype(jnp.float32)


# ----------------------------------------------------------------------------
# Parameters
# ----------------------------------------------------------------------------

def init_params(key, channels):
    """Deterministic init in natural layouts (kh, kw, Cin, Cout)."""
    params = []
    for n in reversed(list(channels)):
        key, k0, k1, k2, k3 = jax.random.split(key, 5)
        params.append(dict(
            up_w=0.1 * jax.random.normal(k0, (2, 2, 2 * n, n), jnp.float32),
            up_b=0.1 * jax.random.normal(k1, (n,), jnp.float32),
            c1_w=0.1 * jax.random.normal(k2, (3, 3, 2 * n, n), jnp.float32),
            c2_w=0.1 * jax.random.normal(k3, (3, 3, n, n), jnp.float32),
            bn1_g=jnp.ones((n,), jnp.float32), bn1_b=jnp.zeros((n,), jnp.float32),
            bn2_g=jnp.ones((n,), jnp.float32), bn2_b=jnp.zeros((n,), jnp.float32),
        ))
    return params


def pack_params(params):
    """Pre-pack weights ONCE (hoisted out of the forward, per review):
    (kh, kw, Cin, Cout) -> (kh, kw, Cout, Cin) bf16 so each tap is a ready
    (Cout, Cin) MXU lhs; bias as a (Cout, 1) column."""
    packed = []
    for p in params:
        packed.append(dict(
            up_w=jnp.transpose(p["up_w"], (0, 1, 3, 2)).astype(jnp.bfloat16),
            up_b=p["up_b"].reshape(-1, 1).astype(jnp.float32),
            c1_w=jnp.transpose(p["c1_w"], (0, 1, 3, 2)).astype(jnp.bfloat16),
            c2_w=jnp.transpose(p["c2_w"], (0, 1, 3, 2)).astype(jnp.bfloat16),
            bn1_g=p["bn1_g"].astype(jnp.float32),
            bn1_b=p["bn1_b"].astype(jnp.float32),
            bn2_g=p["bn2_g"].astype(jnp.float32),
            bn2_b=p["bn2_b"].astype(jnp.float32),
        ))
    return packed


def _center_crop_offsets(hf, wf, h, w):
    """torchvision CenterCrop([h, w]) offsets (no-padding case)."""
    return int(round((hf - h) / 2.0)), int(round((wf - w) / 2.0))


# ----------------------------------------------------------------------------
# ExpandingPath forward
# ----------------------------------------------------------------------------

def expanding_path_forward(x_nchw, features_nchw, packed):
    """Mirrors ExpandingPath.forward.  NCHW in/out; kernels run on lane-dense
    (N, C, H*W) bf16 blocks, so the NCHW boundary is a metadata reshape."""
    N, C, H, W = x_nchw.shape
    x = x_nchw.reshape(N, C, H * W).astype(jnp.bfloat16)
    pending_ss = None   # previous stage's BN2 scale/shift, applied lazily on load
    for i, pk in enumerate(packed):
        x = upconv2x2(x, pk["up_w"], pk["up_b"], H, W, ss=pending_ss)
        H, W = 2 * H, 2 * W
        C = pk["up_w"].shape[2]
        f = features_nchw[i]
        top, left = _center_crop_offsets(f.shape[2], f.shape[3], H, W)
        # Center crop fused with the single layout pass over the skip feature
        # (slice + flatten + bf16 cast = one XLA copy of the cropped window).
        f_c = f[:, :, top:top + H, left:left + W].reshape(
            f.shape[0], f.shape[1], H * W).astype(jnp.bfloat16)
        # ConvBlock: conv1 (concat fused) -> BN1+ReLU fused into conv2's load
        #            -> conv2 -> BN2+ReLU deferred to next stage / epilogue.
        h1, st1 = conv3x3_cat(x, f_c, pk["c1_w"], H, W)
        ss1 = _bn_scale_shift(st1, float(N * H * W), pk["bn1_g"], pk["bn1_b"])
        h2, st2 = conv3x3_norm(h1, ss1, pk["c2_w"], H, W)
        pending_ss = _bn_scale_shift(st2, float(N * H * W),
                                     pk["bn2_g"], pk["bn2_b"])
        x = h2
    out = norm_relu(x, pending_ss)          # (N, C, H*W) f32, last BN2 + ReLU
    return out.reshape(N, C, H, W)          # NCHW: pure metadata reshape


# ----------------------------------------------------------------------------
# Pure-JAX f32 reference (same math, no Pallas) for a correctness check
# ----------------------------------------------------------------------------

def _ref_conv3x3(x, w):
    H, W = x.shape[1], x.shape[2]
    xp = jnp.pad(x, ((0, 0), (1, 1), (1, 1), (0, 0)))
    out = 0.0
    for dh in range(3):
        for dw in range(3):
            out = out + jnp.einsum("nhwc,cd->nhwd",
                                   xp[:, dh:dh + H, dw:dw + W, :], w[dh, dw])
    return out


def _ref_upconv(x, w, b):
    N, H, W, _ = x.shape
    Cout = w.shape[-1]
    y = jnp.einsum("nhwc,ijcd->nhiwjd", x, w) + b
    return y.reshape(N, 2 * H, 2 * W, Cout)


def _ref_bn_relu(x, g, b):
    mean = jnp.mean(x, axis=(0, 1, 2), keepdims=True)
    var = jnp.mean((x - mean) ** 2, axis=(0, 1, 2), keepdims=True)
    y = (x - mean) * jax.lax.rsqrt(var + _BN_EPS) * g + b
    return jnp.maximum(y, 0.0)


def _ref_forward(x_nchw, features_nchw, params):
    x = jnp.transpose(x_nchw, (0, 2, 3, 1))
    for i, p in enumerate(params):
        x = _ref_upconv(x, p["up_w"], p["up_b"])
        f = jnp.transpose(features_nchw[i], (0, 2, 3, 1))
        top, left = _center_crop_offsets(f.shape[1], f.shape[2],
                                         x.shape[1], x.shape[2])
        f = f[:, top:top + x.shape[1], left:left + x.shape[2], :]
        x = jnp.concatenate([x, f], axis=-1)
        x = _ref_bn_relu(_ref_conv3x3(x, p["c1_w"]), p["bn1_g"], p["bn1_b"])
        x = _ref_bn_relu(_ref_conv3x3(x, p["c2_w"]), p["bn2_g"], p["bn2_b"])
    return jnp.transpose(x, (0, 3, 1, 2))


# ----------------------------------------------------------------------------

if __name__ == "__main__":
    key = jax.random.PRNGKey(0)
    channels = (8, 16)   # encoder channels; decoder iterates reversed -> [16, 8]
    B = 2

    key, kx, kf0, kf1, kp = jax.random.split(key, 5)
    # x enters the decoder with 2 * channels[-1] channels (bottleneck), NCHW.
    x = jax.random.normal(kx, (B, 2 * channels[-1], 8, 8), jnp.float32)
    # Skip features, slightly larger spatially to exercise the CenterCrop. NCHW.
    features = [
        jax.random.normal(kf0, (B, 16, 18, 18), jnp.float32),
        jax.random.normal(kf1, (B, 8, 34, 34), jnp.float32),
    ]
    params = init_params(kp, channels)
    packed = pack_params(params)            # weight packing hoisted out of fwd

    fwd = jax.jit(expanding_path_forward)
    out = jax.block_until_ready(fwd(x, features, packed))

    ref = _ref_forward(x, features, params)
    assert out.shape == (B, channels[0], 32, 32), out.shape
    assert bool(jnp.all(jnp.isfinite(out)))
    max_err = float(jnp.max(jnp.abs(out - ref)))
    # bf16 matmul path vs f32 reference: loosened tolerance.
    assert bool(jnp.allclose(out, ref, atol=5e-2, rtol=5e-2)), max_err

    print("KERNEL_OK")
</pallas_src>

<mosaic_0001>
module attributes {stable_mosaic.version = 11 : i64} {
  func.func @_upconv_kernel(%arg0: i32, %arg1: i32, %arg2: memref<1x32x64xbf16, #tpu.memory_space<vmem>>, %arg3: memref<2x2x16x32xbf16, #tpu.memory_space<vmem>>, %arg4: memref<16x1xf32, #tpu.memory_space<vmem>>, %arg5: memref<1x2x2x16x64xbf16, #tpu.memory_space<vmem>>) attributes {dimension_semantics = [#tpu.dimension_semantics<parallel>, #tpu.dimension_semantics<parallel>], iteration_bounds = array<i64: 2, 1>, scalar_prefetch = 0 : i64, scratch_operands = 0 : i64, tpu.core_type = #tpu.core_type<tc>, window_params = [{transform_indices = @transform_0, window_bounds = array<i64: 1, 32, 64>}, {pipeline_mode = #tpu.pipeline_mode<synchronous>, transform_indices = @transform_1, window_bounds = array<i64: 2, 2, 16, 32>}, {pipeline_mode = #tpu.pipeline_mode<synchronous>, transform_indices = @transform_2, window_bounds = array<i64: 16, 1>}, {transform_indices = @transform_3, window_bounds = array<i64: 1, 2, 2, 16, 64>}]} {
    %c0 = arith.constant 0 : index
    %c0_0 = arith.constant 0 : index
    %c0_1 = arith.constant 0 : index
    %0 = vector.load %arg2[%c0, %c0_0, %c0_1] : memref<1x32x64xbf16, #tpu.memory_space<vmem>>, vector<1x32x64xbf16>
    %1 = vector.shape_cast %0 : vector<1x32x64xbf16> to vector<32x64xbf16>
    %c0_2 = arith.constant 0 : index
    %c0_3 = arith.constant 0 : index
    %2 = vector.load %arg4[%c0_2, %c0_3] : memref<16x1xf32, #tpu.memory_space<vmem>>, vector<16x1xf32>
    %c0_4 = arith.constant 0 : index
    %c0_5 = arith.constant 0 : index
    %c0_6 = arith.constant 0 : index
    %c0_7 = arith.constant 0 : index
    %3 = vector.load %arg3[%c0_4, %c0_5, %c0_6, %c0_7] : memref<2x2x16x32xbf16, #tpu.memory_space<vmem>>, vector<1x1x16x32xbf16>
    %4 = vector.shape_cast %3 : vector<1x1x16x32xbf16> to vector<16x32xbf16>
    %cst = arith.constant dense<0.000000e+00> : vector<16x64xf32>
    %5 = tpu.matmul %4, %1, %cst {dimension_numbers = #tpu.dot_dimension_numbers<[1], [0], [0], [1], [0, 0, 1, 1], [], []>} : vector<16x32xbf16>, vector<32x64xbf16>, vector<16x64xf32> -> vector<16x64xf32>
    %6 = vector.broadcast %2 : vector<16x1xf32> to vector<16x64xf32>
    %7 = arith.addf %5, %6 : vector<16x64xf32>
    %8 = arith.truncf %7 : vector<16x64xf32> to vector<16x64xbf16>
    %c0_8 = arith.constant 0 : index
    %c0_9 = arith.constant 0 : index
    %c0_10 = arith.constant 0 : index
    %c0_11 = arith.constant 0 : index
    %c0_12 = arith.constant 0 : index
    %9 = vector.load %arg5[%c0_8, %c0_9, %c0_10, %c0_11, %c0_12] : memref<1x2x2x16x64xbf16, #tpu.memory_space<vmem>>, vector<1x1x1x16x64xbf16>
    %10 = vector.shape_cast %9 : vector<1x1x1x16x64xbf16> to vector<16x64xbf16>
    %11 = vector.shape_cast %8 : vector<16x64xbf16> to vector<1x1x1x16x64xbf16>
    tpu.vector_store %arg5[%c0_8, %c0_9, %c0_10, %c0_11, %c0_12], %11 {strides = array<i32>} : memref<1x2x2x16x64xbf16, #tpu.memory_space<vmem>>, vector<1x1x1x16x64xbf16>,
    %c0_13 = arith.constant 0 : index
    %c1 = arith.constant 1 : index
    %c0_14 = arith.constant 0 : index
    %c0_15 = arith.constant 0 : index
    %12 = vector.load %arg3[%c0_13, %c1, %c0_14, %c0_15] : memref<2x2x16x32xbf16, #tpu.memory_space<vmem>>, vector<1x1x16x32xbf16>
    %13 = vector.shape_cast %12 : vector<1x1x16x32xbf16> to vector<16x32xbf16>
    %cst_16 = arith.constant dense<0.000000e+00> : vector<16x64xf32>
    %14 = tpu.matmul %13, %1, %cst_16 {dimension_numbers = #tpu.dot_dimension_numbers<[1], [0], [0], [1], [0, 0, 1, 1], [], []>} : vector<16x32xbf16>, vector<32x64xbf16>, vector<16x64xf32> -> vector<16x64xf32>
    %15 = vector.broadcast %2 : vector<16x1xf32> to vector<16x64xf32>
    %16 = arith.addf %14, %15 : vector<16x64xf32>
    %17 = arith.truncf %16 : vector<16x64xf32> to vector<16x64xbf16>
    %c0_17 = arith.constant 0 : index
    %c0_18 = arith.constant 0 : index
    %c1_19 = arith.constant 1 : index
    %c0_20 = arith.constant 0 : index
    %c0_21 = arith.constant 0 : index
    %18 = vector.load %arg5[%c0_17, %c0_18, %c1_19, %c0_20, %c0_21] : memref<1x2x2x16x64xbf16, #tpu.memory_space<vmem>>, vector<1x1x1x16x64xbf16>
    %19 = vector.shape_cast %18 : vector<1x1x1x16x64xbf16> to vector<16x64xbf16>
    %20 = vector.shape_cast %17 : vector<16x64xbf16> to vector<1x1x1x16x64xbf16>
    tpu.vector_store %arg5[%c0_17, %c0_18, %c1_19, %c0_20, %c0_21], %20 {strides = array<i32>} : memref<1x2x2x16x64xbf16, #tpu.memory_space<vmem>>, vector<1x1x1x16x64xbf16>,
    %c1_22 = arith.constant 1 : index
    %c0_23 = arith.constant 0 : index
    %c0_24 = arith.constant 0 : index
    %c0_25 = arith.constant 0 : index
    %21 = vector.load %arg3[%c1_22, %c0_23, %c0_24, %c0_25] : memref<2x2x16x32xbf16, #tpu.memory_space<vmem>>, vector<1x1x16x32xbf16>
    %22 = vector.shape_cast %21 : vector<1x1x16x32xbf16> to vector<16x32xbf16>
    %cst_26 = arith.constant dense<0.000000e+00> : vector<16x64xf32>
    %23 = tpu.matmul %22, %1, %cst_26 {dimension_numbers = #tpu.dot_dimension_numbers<[1], [0], [0], [1], [0, 0, 1, 1], [], []>} : vector<16x32xbf16>, vector<32x64xbf16>, vector<16x64xf32> -> vector<16x64xf32>
    %24 = vector.broadcast %2 : vector<16x1xf32> to vector<16x64xf32>
    %25 = arith.addf %23, %24 : vector<16x64xf32>
    %26 = arith.truncf %25 : vector<16x64xf32> to vector<16x64xbf16>
    %c0_27 = arith.constant 0 : index
    %c1_28 = arith.constant 1 : index
    %c0_29 = arith.constant 0 : index
    %c0_30 = arith.constant 0 : index
    %c0_31 = arith.constant 0 : index
    %27 = vector.load %arg5[%c0_27, %c1_28, %c0_29, %c0_30, %c0_31] : memref<1x2x2x16x64xbf16, #tpu.memory_space<vmem>>, vector<1x1x1x16x64xbf16>
    %28 = vector.shape_cast %27 : vector<1x1x1x16x64xbf16> to vector<16x64xbf16>
    %29 = vector.shape_cast %26 : vector<16x64xbf16> to vector<1x1x1x16x64xbf16>
    tpu.vector_store %arg5[%c0_27, %c1_28, %c0_29, %c0_30, %c0_31], %29 {strides = array<i32>} : memref<1x2x2x16x64xbf16, #tpu.memory_space<vmem>>, vector<1x1x1x16x64xbf16>,
    %c1_32 = arith.constant 1 : index
    %c1_33 = arith.constant 1 : index
    %c0_34 = arith.constant 0 : index
    %c0_35 = arith.constant 0 : index
    %30 = vector.load %arg3[%c1_32, %c1_33, %c0_34, %c0_35] : memref<2x2x16x32xbf16, #tpu.memory_space<vmem>>, vector<1x1x16x32xbf16>
    %31 = vector.shape_cast %30 : vector<1x1x16x32xbf16> to vector<16x32xbf16>
    %cst_36 = arith.constant dense<0.000000e+00> : vector<16x64xf32>
    %32 = tpu.matmul %31, %1, %cst_36 {dimension_numbers = #tpu.dot_dimension_numbers<[1], [0], [0], [1], [0, 0, 1, 1], [], []>} : vector<16x32xbf16>, vector<32x64xbf16>, vector<16x64xf32> -> vector<16x64xf32>
    %33 = vector.broadcast %2 : vector<16x1xf32> to vector<16x64xf32>
    %34 = arith.addf %32, %33 : vector<16x64xf32>
    %35 = arith.truncf %34 : vector<16x64xf32> to vector<16x64xbf16>
    %c0_37 = arith.constant 0 : index
    %c1_38 = arith.constant 1 : index
    %c1_39 = arith.constant 1 : index
    %c0_40 = arith.constant 0 : index
    %c0_41 = arith.constant 0 : index
    %36 = vector.load %arg5[%c0_37, %c1_38, %c1_39, %c0_40, %c0_41] : memref<1x2x2x16x64xbf16, #tpu.memory_space<vmem>>, vector<1x1x1x16x64xbf16>
    %37 = vector.shape_cast %36 : vector<1x1x1x16x64xbf16> to vector<16x64xbf16>
    %38 = vector.shape_cast %35 : vector<16x64xbf16> to vector<1x1x1x16x64xbf16>
    tpu.vector_store %arg5[%c0_37, %c1_38, %c1_39, %c0_40, %c0_41], %38 {strides = array<i32>} : memref<1x2x2x16x64xbf16, #tpu.memory_space<vmem>>, vector<1x1x1x16x64xbf16>,
    return
  }
  func.func @transform_0(%arg0: i32, %arg1: i32) -> (i32, i32, i32) {
    %c0_i32 = arith.constant 0 : i32
    %c0_i32_0 = arith.constant 0 : i32
    return %arg0, %c0_i32, %arg1 : i32, i32, i32
  }
  func.func @transform_1(%arg0: i32, %arg1: i32) -> (i32, i32, i32, i32) {
    %c0_i32 = arith.constant 0 : i32
    %c0_i32_0 = arith.constant 0 : i32
    %c0_i32_1 = arith.constant 0 : i32
    %c0_i32_2 = arith.constant 0 : i32
    %c0_i32_3 = arith.constant 0 : i32
    return %c0_i32, %c0_i32_0, %c0_i32_1, %c0_i32_2 : i32, i32, i32, i32
  }
  func.func @transform_2(%arg0: i32, %arg1: i32) -> (i32, i32) {
    %c0_i32 = arith.constant 0 : i32
    %c0_i32_0 = arith.constant 0 : i32
    %c0_i32_1 = arith.constant 0 : i32
    return %c0_i32, %c0_i32_0 : i32, i32
  }
  func.func @transform_3(%arg0: i32, %arg1: i32) -> (i32, i32, i32, i32, i32) {
    %c0_i32 = arith.constant 0 : i32
    %c0_i32_0 = arith.constant 0 : i32
    %c0_i32_1 = arith.constant 0 : i32
    %c0_i32_2 = arith.constant 0 : i32
    return %arg0, %c0_i32, %c0_i32_0, %c0_i32_1, %arg1 : i32, i32, i32, i32, i32
  }
}

module attributes {stable_mosaic.version = 11 : i64} {
  func.func @_conv3x3_cat_kernel(%arg0: i32, %arg1: memref<1x16x256xbf16, #tpu.memory_space<vmem>>, %arg2: memref<1x16x256xbf16, #tpu.memory_space<vmem>>, %arg3: memref<3x3x16x32xbf16, #tpu.memory_space<vmem>>, %arg4: memref<1x16x256xbf16, #tpu.memory_space<vmem>>, %arg5: memref<1x16x2xf32, #tpu.memory_space<vmem>>, %arg6: memref<32x401xbf16, #tpu.memory_space<vmem>>) attributes {dimension_semantics = [#tpu.dimension_semantics<parallel>], iteration_bounds = array<i64: 2>, scalar_prefetch = 0 : i64, scratch_operands = 1 : i64, tpu.core_type = #tpu.core_type<tc>, window_params = [{transform_indices = @transform_0, window_bounds = array<i64: 1, 16, 256>}, {transform_indices = @transform_1, window_bounds = array<i64: 1, 16, 256>}, {pipeline_mode = #tpu.pipeline_mode<synchronous>, transform_indices = @transform_2, window_bounds = array<i64: 3, 3, 16, 32>}, {transform_indices = @transform_3, window_bounds = array<i64: 1, 16, 256>}, {transform_indices = @transform_4, window_bounds = array<i64: 1, 16, 2>}]} {
    %cst = arith.constant 0.000000e+00 : bf16
    %0 = vector.broadcast %cst : bf16 to vector<32x128xbf16>
    %c0 = arith.constant 0 : index
    %c0_0 = arith.constant 0 : index
    %1 = vector.load %arg6[%c0, %c0_0] : memref<32x401xbf16, #tpu.memory_space<vmem>>, vector<32x128xbf16>
    tpu.vector_store %arg6[%c0, %c0_0], %0 {strides = array<i32>} : memref<32x401xbf16, #tpu.memory_space<vmem>>, vector<32x128xbf16>,
    %cst_1 = arith.constant 0.000000e+00 : bf16
    %2 = vector.broadcast %cst_1 : bf16 to vector<32x17xbf16>
    %c0_2 = arith.constant 0 : index
    %c384 = arith.constant 384 : index
    %3 = vector.load %arg6[%c0_2, %c384] : memref<32x401xbf16, #tpu.memory_space<vmem>>, vector<32x17xbf16>
    tpu.vector_store %arg6[%c0_2, %c384], %2 {strides = array<i32>} : memref<32x401xbf16, #tpu.memory_space<vmem>>, vector<32x17xbf16>,
    %c0_3 = arith.constant 0 : index
    %c0_4 = arith.constant 0 : index
    %c0_5 = arith.constant 0 : index
    %4 = vector.load %arg1[%c0_3, %c0_4, %c0_5] : memref<1x16x256xbf16, #tpu.memory_space<vmem>>, vector<1x16x256xbf16>
    %5 = vector.shape_cast %4 : vector<1x16x256xbf16> to vector<16x256xbf16>
    %c0_6 = arith.constant 0 : index
    %c128 = arith.constant 128 : index
    %6 = vector.load %arg6[%c0_6, %c128] : memref<32x401xbf16, #tpu.memory_space<vmem>>, vector<16x256xbf16>
    tpu.vector_store %arg6[%c0_6, %c128], %5 {strides = array<i32>} : memref<32x401xbf16, #tpu.memory_space<vmem>>, vector<16x256xbf16>,
    %c0_7 = arith.constant 0 : index
    %c0_8 = arith.constant 0 : index
    %c0_9 = arith.constant 0 : index
    %7 = vector.load %arg2[%c0_7, %c0_8, %c0_9] : memref<1x16x256xbf16, #tpu.memory_space<vmem>>, vector<1x16x256xbf16>
    %8 = vector.shape_cast %7 : vector<1x16x256xbf16> to vector<16x256xbf16>
    %c16 = arith.constant 16 : index
    %c128_10 = arith.constant 128 : index
    %9 = vector.load %arg6[%c16, %c128_10] : memref<32x401xbf16, #tpu.memory_space<vmem>>, vector<16x256xbf16>
    tpu.vector_store %arg6[%c16, %c128_10], %8 {strides = array<i32>} : memref<32x401xbf16, #tpu.memory_space<vmem>>, vector<16x256xbf16>,
    %10 = tpu.iota {dimensions = array<i32: 1>} : vector<1x256xi32>
    %c16_i32 = arith.constant 16 : i32
    %c0_i32 = arith.constant 0 : i32
    %11 = arith.cmpi eq, %c16_i32, %c0_i32 : i32
    %c1_i32 = arith.constant 1 : i32
    %12 = arith.select %11, %c1_i32, %c16_i32 : i32
    %13 = vector.broadcast %12 : i32 to vector<1x256xi32>
    %14 = arith.remsi %10, %13 : vector<1x256xi32>
    %c0_i32_11 = arith.constant 0 : i32
    %15 = vector.broadcast %c0_i32_11 : i32 to vector<1x256xi32>
    %16 = arith.cmpi ne, %14, %15 : vector<1x256xi32>
    %c0_i32_12 = arith.constant 0 : i32
    %17 = vector.broadcast %c0_i32_12 : i32 to vector<1x256xi32>
    %18 = arith.cmpi slt, %14, %17 : vector<1x256xi32>
    %c0_i32_13 = arith.constant 0 : i32
    %19 = arith.cmpi slt, %12, %c0_i32_13 : i32
    %20 = vector.broadcast %19 : i1 to vector<1x256xi1>
    %21 = vector.broadcast %20 : vector<1x256xi1> to vector<1x256xi1>
    %22 = arith.xori %18, %21 : vector<1x256xi1>
    %23 = arith.andi %22, %16 : vector<1x256xi1>
    %24 = vector.broadcast %12 : i32 to vector<1x256xi32>
    %25 = arith.addi %14, %24 : vector<1x256xi32>
    %26 = arith.select %23, %25, %14 : vector<1x256xi1>, vector<1x256xi32>
    %cst_14 = arith.constant 0.000000e+00 : f32
    %27 = vector.broadcast %cst_14 : f32 to vector<16x256xf32>
    %cst_15 = arith.constant 0.000000e+00 : f32
    %28 = vector.broadcast %cst_15 : f32 to vector<16x256xf32>
    %c0_16 = arith.constant 0 : index
    %c111 = arith.constant 111 : index
    %29 = vector.load %arg6[%c0_16, %c111] : memref<32x401xbf16, #tpu.memory_space<vmem>>, vector<32x256xbf16>
    %c0_17 = arith.constant 0 : index
    %c0_18 = arith.constant 0 : index
    %c0_19 = arith.constant 0 : index
    %c0_20 = arith.constant 0 : index
    %30 = vector.load %arg3[%c0_17, %c0_18, %c0_19, %c0_20] : memref<3x3x16x32xbf16, #tpu.memory_space<vmem>>, vector<1x1x16x32xbf16>
    %31 = vector.shape_cast %30 : vector<1x1x16x32xbf16> to vector<16x32xbf16>
    %cst_21 = arith.constant dense<0.000000e+00> : vector<16x256xf32>
    %32 = tpu.matmul %31, %29, %cst_21 {dimension_numbers = #tpu.dot_dimension_numbers<[1], [0], [0], [1], [0, 0, 1, 1], [], []>} : vector<16x32xbf16>, vector<32x256xbf16>, vector<16x256xf32> -> vector<16x256xf32>
    %33 = arith.addf %28, %32 : vector<16x256xf32>
    %c0_22 = arith.constant 0 : index
    %c127 = arith.constant 127 : index
    %34 = vector.load %arg6[%c0_22, %c127] : memref<32x401xbf16, #tpu.memory_space<vmem>>, vector<32x256xbf16>
    %c1 = arith.constant 1 : index
    %c0_23 = arith.constant 0 : index
    %c0_24 = arith.constant 0 : index
    %c0_25 = arith.constant 0 : index
    %35 = vector.load %arg3[%c1, %c0_23, %c0_24, %c0_25] : memref<3x3x16x32xbf16, #tpu.memory_space<vmem>>, vector<1x1x16x32xbf16>
    %36 = vector.shape_cast %35 : vector<1x1x16x32xbf16> to vector<16x32xbf16>
    %cst_26 = arith.constant dense<0.000000e+00> : vector<16x256xf32>
    %37 = tpu.matmul %36, %34, %cst_26 {dimension_numbers = #tpu.dot_dimension_numbers<[1], [0], [0], [1], [0, 0, 1, 1], [], []>} : vector<16x32xbf16>, vector<32x256xbf16>, vector<16x256xf32> -> vector<16x256xf32>
    %38 = arith.addf %33, %37 : vector<16x256xf32>
    %c0_27 = arith.constant 0 : index
    %c143 = arith.constant 143 : index
    %39 = vector.load %arg6[%c0_27, %c143] : memref<32x401xbf16, #tpu.memory_space<vmem>>, vector<32x256xbf16>
    %c2 = arith.constant 2 : index
    %c0_28 = arith.constant 0 : index
    %c0_29 = arith.constant 0 : index
    %c0_30 = arith.constant 0 : index
    %40 = vector.load %arg3[%c2, %c0_28, %c0_29, %c0_30] : memref<3x3x16x32xbf16, #tpu.memory_space<vmem>>, vector<1x1x16x32xbf16>
    %41 = vector.shape_cast %40 : vector<1x1x16x32xbf16> to vector<16x32xbf16>
    %cst_31 = arith.constant dense<0.000000e+00> : vector<16x256xf32>
    %42 = tpu.matmul %41, %39, %cst_31 {dimension_numbers = #tpu.dot_dimension_numbers<[1], [0], [0], [1], [0, 0, 1, 1], [], []>} : vector<16x32xbf16>, vector<32x256xbf16>, vector<16x256xf32> -> vector<16x256xf32>
    %43 = arith.addf %38, %42 : vector<16x256xf32>
    %c1_i32_32 = arith.constant 1 : i32
    %44 = vector.broadcast %c1_i32_32 : i32 to vector<1x256xi32>
    %45 = arith.cmpi sge, %26, %44 : vector<1x256xi32>
    %cst_33 = arith.constant 0.000000e+00 : f32
    %46 = vector.shape_cast %45 : vector<1x256xi1> to vector<1x256xi1>
    %47 = vector.broadcast %46 : vector<1x256xi1> to vector<16x256xi1>
    %48 = vector.broadcast %cst_33 : f32 to vector<16x256xf32>
    %49 = arith.select %47, %43, %48 : vector<16x256xi1>, vector<16x256xf32>
    %50 = arith.addf %27, %49 : vector<16x256xf32>
    %cst_34 = arith.constant 0.000000e+00 : f32
    %51 = vector.broadcast %cst_34 : f32 to vector<16x256xf32>
    %c0_35 = arith.constant 0 : index
    %c112 = arith.constant 112 : index
    %52 = vector.load %arg6[%c0_35, %c112] : memref<32x401xbf16, #tpu.memory_space<vmem>>, vector<32x256xbf16>
    %c0_36 = arith.constant 0 : index
    %c1_37 = arith.constant 1 : index
    %c0_38 = arith.constant 0 : index
    %c0_39 = arith.constant 0 : index
    %53 = vector.load %arg3[%c0_36, %c1_37, %c0_38, %c0_39] : memref<3x3x16x32xbf16, #tpu.memory_space<vmem>>, vector<1x1x16x32xbf16>
    %54 = vector.shape_cast %53 : vector<1x1x16x32xbf16> to vector<16x32xbf16>
    %cst_40 = arith.constant dense<0.000000e+00> : vector<16x256xf32>
    %55 = tpu.matmul %54, %52, %cst_40 {dimension_numbers = #tpu.dot_dimension_numbers<[1], [0], [0], [1], [0, 0, 1, 1], [], []>} : vector<16x32xbf16>, vector<32x256xbf16>, vector<16x256xf32> -> vector<16x256xf32>
    %56 = arith.addf %51, %55 : vector<16x256xf32>
    %c0_41 = arith.constant 0 : index
    %c128_42 = arith.constant 128 : index
    %57 = vector.load %arg6[%c0_41, %c128_42] : memref<32x401xbf16, #tpu.memory_space<vmem>>, vector<32x256xbf16>
    %c1_43 = arith.constant 1 : index
    %c1_44 = arith.constant 1 : index
    %c0_45 = arith.constant 0 : index
    %c0_46 = arith.constant 0 : index
    %58 = vector.load %arg3[%c1_43, %c1_44, %c0_45, %c0_46] : memref<3x3x16x32xbf16, #tpu.memory_space<vmem>>, vector<1x1x16x32xbf16>
    %59 = vector.shape_cast %58 : vector<1x1x16x32xbf16> to vector<16x32xbf16>
    %cst_47 = arith.constant dense<0.000000e+00> : vector<16x256xf32>
    %60 = tpu.matmul %59, %57, %cst_47 {dimension_numbers = #tpu.dot_dimension_numbers<[1], [0], [0], [1], [0, 0, 1, 1], [], []>} : vector<16x32xbf16>, vector<32x256xbf16>, vector<16x256xf32> -> vector<16x256xf32>
    %61 = arith.addf %56, %60 : vector<16x256xf32>
    %c0_48 = arith.constant 0 : index
    %c144 = arith.constant 144 : index
    %62 = vector.load %arg6[%c0_48, %c144] : memref<32x401xbf16, #tpu.memory_space<vmem>>, vector<32x256xbf16>
    %c2_49 = arith.constant 2 : index
    %c1_50 = arith.constant 1 : index
    %c0_51 = arith.constant 0 : index
    %c0_52 = arith.constant 0 : index
    %63 = vector.load %arg3[%c2_49, %c1_50, %c0_51, %c0_52] : memref<3x3x16x32xbf16, #tpu.memory_space<vmem>>, vector<1x1x16x32xbf16>
    %64 = vector.shape_cast %63 : vector<1x1x16x32xbf16> to vector<16x32xbf16>
    %cst_53 = arith.constant dense<0.000000e+00> : vector<16x256xf32>
    %65 = tpu.matmul %64, %62, %cst_53 {dimension_numbers = #tpu.dot_dimension_numbers<[1], [0], [0], [1], [0, 0, 1, 1], [], []>} : vector<16x32xbf16>, vector<32x256xbf16>, vector<16x256xf32> -> vector<16x256xf32>
    %66 = arith.addf %61, %65 : vector<16x256xf32>
    %67 = arith.addf %50, %66 : vector<16x256xf32>
    %cst_54 = arith.constant 0.000000e+00 : f32
    %68 = vector.broadcast %cst_54 : f32 to vector<16x256xf32>
    %c0_55 = arith.constant 0 : index
    %c113 = arith.constant 113 : index
    %69 = vector.load %arg6[%c0_55, %c113] : memref<32x401xbf16, #tpu.memory_space<vmem>>, vector<32x256xbf16>
    %c0_56 = arith.constant 0 : index
    %c2_57 = arith.constant 2 : index
    %c0_58 = arith.constant 0 : index
    %c0_59 = arith.constant 0 : index
    %70 = vector.load %arg3[%c0_56, %c2_57, %c0_58, %c0_59] : memref<3x3x16x32xbf16, #tpu.memory_space<vmem>>, vector<1x1x16x32xbf16>
    %71 = vector.shape_cast %70 : vector<1x1x16x32xbf16> to vector<16x32xbf16>
    %cst_60 = arith.constant dense<0.000000e+00> : vector<16x256xf32>
    %72 = tpu.matmul %71, %69, %cst_60 {dimension_numbers = #tpu.dot_dimension_numbers<[1], [0], [0], [1], [0, 0, 1, 1], [], []>} : vector<16x32xbf16>, vector<32x256xbf16>, vector<16x256xf32> -> vector<16x256xf32>
    %73 = arith.addf %68, %72 : vector<16x256xf32>
    %c0_61 = arith.constant 0 : index
    %c129 = arith.constant 129 : index
    %74 = vector.load %arg6[%c0_61, %c129] : memref<32x401xbf16, #tpu.memory_space<vmem>>, vector<32x256xbf16>
    %c1_62 = arith.constant 1 : index
    %c2_63 = arith.constant 2 : index
    %c0_64 = arith.constant 0 : index
    %c0_65 = arith.constant 0 : index
    %75 = vector.load %arg3[%c1_62, %c2_63, %c0_64, %c0_65] : memref<3x3x16x32xbf16, #tpu.memory_space<vmem>>, vector<1x1x16x32xbf16>
    %76 = vector.shape_cast %75 : vector<1x1x16x32xbf16> to vector<16x32xbf16>
    %cst_66 = arith.constant dense<0.000000e+00> : vector<16x256xf32>
    %77 = tpu.matmul %76, %74, %cst_66 {dimension_numbers = #tpu.dot_dimension_numbers<[1], [0], [0], [1], [0, 0, 1, 1], [], []>} : vector<16x32xbf16>, vector<32x256xbf16>, vector<16x256xf32> -> vector<16x256xf32>
    %78 = arith.addf %73, %77 : vector<16x256xf32>
    %c0_67 = arith.constant 0 : index
    %c145 = arith.constant 145 : index
    %79 = vector.load %arg6[%c0_67, %c145] : memref<32x401xbf16, #tpu.memory_space<vmem>>, vector<32x256xbf16>
    %c2_68 = arith.constant 2 : index
    %c2_69 = arith.constant 2 : index
    %c0_70 = arith.constant 0 : index
    %c0_71 = arith.constant 0 : index
    %80 = vector.load %arg3[%c2_68, %c2_69, %c0_70, %c0_71] : memref<3x3x16x32xbf16, #tpu.memory_space<vmem>>, vector<1x1x16x32xbf16>
    %81 = vector.shape_cast %80 : vector<1x1x16x32xbf16> to vector<16x32xbf16>
    %cst_72 = arith.constant dense<0.000000e+00> : vector<16x256xf32>
    %82 = tpu.matmul %81, %79, %cst_72 {dimension_numbers = #tpu.dot_dimension_numbers<[1], [0], [0], [1], [0, 0, 1, 1], [], []>} : vector<16x32xbf16>, vector<32x256xbf16>, vector<16x256xf32> -> vector<16x256xf32>
    %83 = arith.addf %78, %82 : vector<16x256xf32>
    %c14_i32 = arith.constant 14 : i32
    %84 = vector.broadcast %c14_i32 : i32 to vector<1x256xi32>
    %85 = arith.cmpi sle, %26, %84 : vector<1x256xi32>
    %cst_73 = arith.constant 0.000000e+00 : f32
    %86 = vector.shape_cast %85 : vector<1x256xi1> to vector<1x256xi1>
    %87 = vector.broadcast %86 : vector<1x256xi1> to vector<16x256xi1>
    %88 = vector.broadcast %cst_73 : f32 to vector<16x256xf32>
    %89 = arith.select %87, %83, %88 : vector<16x256xi1>, vector<16x256xf32>
    %90 = arith.addf %67, %89 : vector<16x256xf32>
    %91 = arith.truncf %90 : vector<16x256xf32> to vector<16x256xbf16>
    %c0_74 = arith.constant 0 : index
    %c0_75 = arith.constant 0 : index
    %c0_76 = arith.constant 0 : index
    %92 = vector.load %arg4[%c0_74, %c0_75, %c0_76] : memref<1x16x256xbf16, #tpu.memory_space<vmem>>, vector<1x16x256xbf16>
    %93 = vector.shape_cast %92 : vector<1x16x256xbf16> to vector<16x256xbf16>
    %94 = vector.shape_cast %91 : vector<16x256xbf16> to vector<1x16x256xbf16>
    tpu.vector_store %arg4[%c0_74, %c0_75, %c0_76], %94 {strides = array<i32>} : memref<1x16x256xbf16, #tpu.memory_space<vmem>>, vector<1x16x256xbf16>,
    %95 = arith.extf %91 : vector<16x256xbf16> to vector<16x256xf32>
    %cst_77 = arith.constant dense<0.000000e+00> : vector<16xf32>
    %96 = vector.multi_reduction <add>, %95, %cst_77 [1] : vector<16x256xf32> to vector<16xf32>
    %97 = vector.shape_cast %96 : vector<16xf32> to vector<16x1xf32>
    %98 = arith.mulf %95, %95 : vector<16x256xf32>
    %cst_78 = arith.constant dense<0.000000e+00> : vector<16xf32>
    %99 = vector.multi_reduction <add>, %98, %cst_78 [1] : vector<16x256xf32> to vector<16xf32>
    %100 = vector.shape_cast %99 : vector<16xf32> to vector<16x1xf32>
    %101 = tpu.concatenate %97, %100 in 1 : vector<16x1xf32>, vector<16x1xf32> -> vector<16x2xf32>
    %c0_79 = arith.constant 0 : index
    %c0_80 = arith.constant 0 : index
    %c0_81 = arith.constant 0 : index
    %102 = vector.load %arg5[%c0_79, %c0_80, %c0_81] : memref<1x16x2xf32, #tpu.memory_space<vmem>>, vector<1x16x2xf32>
    %103 = vector.shape_cast %102 : vector<1x16x2xf32> to vector<16x2xf32>
    %104 = vector.shape_cast %101 : vector<16x2xf32> to vector<1x16x2xf32>
    tpu.vector_store %arg5[%c0_79, %c0_80, %c0_81], %104 {strides = array<i32>} : memref<1x16x2xf32, #tpu.memory_space<vmem>>, vector<1x16x2xf32>,
    return
  }
  func.func @transform_0(%arg0: i32) -> (i32, i32, i32) {
    %c0_i32 = arith.constant 0 : i32
    %c0_i32_0 = arith.constant 0 : i32
    %c0_i32_1 = arith.constant 0 : i32
    return %arg0, %c0_i32, %c0_i32_0 : i32, i32, i32
  }
  func.func @transform_1(%arg0: i32) -> (i32, i32, i32) {
    %c0_i32 = arith.constant 0 : i32
    %c0_i32_0 = arith.constant 0 : i32
    %c0_i32_1 = arith.constant 0 : i32
    return %arg0, %c0_i32, %c0_i32_0 : i32, i32, i32
  }
  func.func @transform_2(%arg0: i32) -> (i32, i32, i32, i32) {
    %c0_i32 = arith.constant 0 : i32
    %c0_i32_0 = arith.constant 0 : i32
    %c0_i32_1 = arith.constant 0 : i32
    %c0_i32_2 = arith.constant 0 : i32
    %c0_i32_3 = arith.constant 0 : i32
    return %c0_i32, %c0_i32_0, %c0_i32_1, %c0_i32_2 : i32, i32, i32, i32
  }
  func.func @transform_3(%arg0: i32) -> (i32, i32, i32) {
    %c0_i32 = arith.constant 0 : i32
    %c0_i32_0 = arith.constant 0 : i32
    %c0_i32_1 = arith.constant 0 : i32
    return %arg0, %c0_i32, %c0_i32_0 : i32, i32, i32
  }
  func.func @transform_4(%arg0: i32) -> (i32, i32, i32) {
    %c0_i32 = arith.constant 0 : i32
    %c0_i32_0 = arith.constant 0 : i32
    %c0_i32_1 = arith.constant 0 : i32
    return %arg0, %c0_i32, %c0_i32_0 : i32, i32, i32
  }
}

module attributes {stable_mosaic.version = 11 : i64} {
  func.func @_upconv_norm_kernel(%arg0: i32, %arg1: i32, %arg2: memref<1x16x256xbf16, #tpu.memory_space<vmem>>, %arg3: memref<2x16x1xf32, #tpu.memory_space<vmem>>, %arg4: memref<2x2x8x16xbf16, #tpu.memory_space<vmem>>, %arg5: memref<8x1xf32, #tpu.memory_space<vmem>>, %arg6: memref<1x2x2x8x256xbf16, #tpu.memory_space<vmem>>) attributes {dimension_semantics = [#tpu.dimension_semantics<parallel>, #tpu.dimension_semantics<parallel>], iteration_bounds = array<i64: 2, 1>, scalar_prefetch = 0 : i64, scratch_operands = 0 : i64, tpu.core_type = #tpu.core_type<tc>, window_params = [{transform_indices = @transform_0, window_bounds = array<i64: 1, 16, 256>}, {pipeline_mode = #tpu.pipeline_mode<synchronous>, transform_indices = @transform_1, window_bounds = array<i64: 2, 16, 1>}, {pipeline_mode = #tpu.pipeline_mode<synchronous>, transform_indices = @transform_2, window_bounds = array<i64: 2, 2, 8, 16>}, {pipeline_mode = #tpu.pipeline_mode<synchronous>, transform_indices = @transform_3, window_bounds = array<i64: 8, 1>}, {transform_indices = @transform_4, window_bounds = array<i64: 1, 2, 2, 8, 256>}]} {
    %c0 = arith.constant 0 : index
    %c0_0 = arith.constant 0 : index
    %c0_1 = arith.constant 0 : index
    %0 = vector.load %arg2[%c0, %c0_0, %c0_1] : memref<1x16x256xbf16, #tpu.memory_space<vmem>>, vector<1x16x256xbf16>
    %1 = vector.shape_cast %0 : vector<1x16x256xbf16> to vector<16x256xbf16>
    %2 = arith.extf %1 : vector<16x256xbf16> to vector<16x256xf32>
    %c0_2 = arith.constant 0 : index
    %c0_3 = arith.constant 0 : index
    %c0_4 = arith.constant 0 : index
    %3 = vector.load %arg3[%c0_2, %c0_3, %c0_4] : memref<2x16x1xf32, #tpu.memory_space<vmem>>, vector<1x16x1xf32>
    %4 = vector.shape_cast %3 : vector<1x16x1xf32> to vector<16x1xf32>
    %5 = vector.broadcast %4 : vector<16x1xf32> to vector<16x256xf32>
    %6 = arith.mulf %2, %5 : vector<16x256xf32>
    %c1 = arith.constant 1 : index
    %c0_5 = arith.constant 0 : index
    %c0_6 = arith.constant 0 : index
    %7 = vector.load %arg3[%c1, %c0_5, %c0_6] : memref<2x16x1xf32, #tpu.memory_space<vmem>>, vector<1x16x1xf32>
    %8 = vector.shape_cast %7 : vector<1x16x1xf32> to vector<16x1xf32>
    %9 = vector.broadcast %8 : vector<16x1xf32> to vector<16x256xf32>
    %10 = arith.addf %6, %9 : vector<16x256xf32>
    %cst = arith.constant 0.000000e+00 : f32
    %11 = vector.broadcast %cst : f32 to vector<16x256xf32>
    %12 = arith.maximumf %10, %11 : vector<16x256xf32>
    %13 = arith.truncf %12 : vector<16x256xf32> to vector<16x256xbf16>
    %c0_7 = arith.constant 0 : index
    %c0_8 = arith.constant 0 : index
    %14 = vector.load %arg5[%c0_7, %c0_8] : memref<8x1xf32, #tpu.memory_space<vmem>>, vector<8x1xf32>
    %c0_9 = arith.constant 0 : index
    %c0_10 = arith.constant 0 : index
    %c0_11 = arith.constant 0 : index
    %c0_12 = arith.constant 0 : index
    %15 = vector.load %arg4[%c0_9, %c0_10, %c0_11, %c0_12] : memref<2x2x8x16xbf16, #tpu.memory_space<vmem>>, vector<1x1x8x16xbf16>
    %16 = vector.shape_cast %15 : vector<1x1x8x16xbf16> to vector<8x16xbf16>
    %cst_13 = arith.constant dense<0.000000e+00> : vector<8x256xf32>
    %17 = tpu.matmul %16, %13, %cst_13 {dimension_numbers = #tpu.dot_dimension_numbers<[1], [0], [0], [1], [0, 0, 1, 1], [], []>} : vector<8x16xbf16>, vector<16x256xbf16>, vector<8x256xf32> -> vector<8x256xf32>
    %18 = vector.broadcast %14 : vector<8x1xf32> to vector<8x256xf32>
    %19 = arith.addf %17, %18 : vector<8x256xf32>
    %20 = arith.truncf %19 : vector<8x256xf32> to vector<8x256xbf16>
    %c0_14 = arith.constant 0 : index
    %c0_15 = arith.constant 0 : index
    %c0_16 = arith.constant 0 : index
    %c0_17 = arith.constant 0 : index
    %c0_18 = arith.constant 0 : index
    %21 = vector.load %arg6[%c0_14, %c0_15, %c0_16, %c0_17, %c0_18] : memref<1x2x2x8x256xbf16, #tpu.memory_space<vmem>>, vector<1x1x1x8x256xbf16>
    %22 = vector.shape_cast %21 : vector<1x1x1x8x256xbf16> to vector<8x256xbf16>
    %23 = vector.shape_cast %20 : vector<8x256xbf16> to vector<1x1x1x8x256xbf16>
    tpu.vector_store %arg6[%c0_14, %c0_15, %c0_16, %c0_17, %c0_18], %23 {strides = array<i32>} : memref<1x2x2x8x256xbf16, #tpu.memory_space<vmem>>, vector<1x1x1x8x256xbf16>,
    %c0_19 = arith.constant 0 : index
    %c1_20 = arith.constant 1 : index
    %c0_21 = arith.constant 0 : index
    %c0_22 = arith.constant 0 : index
    %24 = vector.load %arg4[%c0_19, %c1_20, %c0_21, %c0_22] : memref<2x2x8x16xbf16, #tpu.memory_space<vmem>>, vector<1x1x8x16xbf16>
    %25 = vector.shape_cast %24 : vector<1x1x8x16xbf16> to vector<8x16xbf16>
    %cst_23 = arith.constant dense<0.000000e+00> : vector<8x256xf32>
    %26 = tpu.matmul %25, %13, %cst_23 {dimension_numbers = #tpu.dot_dimension_numbers<[1], [0], [0], [1], [0, 0, 1, 1], [], []>} : vector<8x16xbf16>, vector<16x256xbf16>, vector<8x256xf32> -> vector<8x256xf32>
    %27 = vector.broadcast %14 : vector<8x1xf32> to vector<8x256xf32>
    %28 = arith.addf %26, %27 : vector<8x256xf32>
    %29 = arith.truncf %28 : vector<8x256xf32> to vector<8x256xbf16>
    %c0_24 = arith.constant 0 : index
    %c0_25 = arith.constant 0 : index
    %c1_26 = arith.constant 1 : index
    %c0_27 = arith.constant 0 : index
    %c0_28 = arith.constant 0 : index
    %30 = vector.load %arg6[%c0_24, %c0_25, %c1_26, %c0_27, %c0_28] : memref<1x2x2x8x256xbf16, #tpu.memory_space<vmem>>, vector<1x1x1x8x256xbf16>
    %31 = vector.shape_cast %30 : vector<1x1x1x8x256xbf16> to vector<8x256xbf16>
    %32 = vector.shape_cast %29 : vector<8x256xbf16> to vector<1x1x1x8x256xbf16>
    tpu.vector_store %arg6[%c0_24, %c0_25, %c1_26, %c0_27, %c0_28], %32 {strides = array<i32>} : memref<1x2x2x8x256xbf16, #tpu.memory_space<vmem>>, vector<1x1x1x8x256xbf16>,
    %c1_29 = arith.constant 1 : index
    %c0_30 = arith.constant 0 : index
    %c0_31 = arith.constant 0 : index
    %c0_32 = arith.constant 0 : index
    %33 = vector.load %arg4[%c1_29, %c0_30, %c0_31, %c0_32] : memref<2x2x8x16xbf16, #tpu.memory_space<vmem>>, vector<1x1x8x16xbf16>
    %34 = vector.shape_cast %33 : vector<1x1x8x16xbf16> to vector<8x16xbf16>
    %cst_33 = arith.constant dense<0.000000e+00> : vector<8x256xf32>
    %35 = tpu.matmul %34, %13, %cst_33 {dimension_numbers = #tpu.dot_dimension_numbers<[1], [0], [0], [1], [0, 0, 1, 1], [], []>} : vector<8x16xbf16>, vector<16x256xbf16>, vector<8x256xf32> -> vector<8x256xf32>
    %36 = vector.broadcast %14 : vector<8x1xf32> to vector<8x256xf32>
    %37 = arith.addf %35, %36 : vector<8x256xf32>
    %38 = arith.truncf %37 : vector<8x256xf32> to vector<8x256xbf16>
    %c0_34 = arith.constant 0 : index
    %c1_35 = arith.constant 1 : index
    %c0_36 = arith.constant 0 : index
    %c0_37 = arith.constant 0 : index
    %c0_38 = arith.constant 0 : index
    %39 = vector.load %arg6[%c0_34, %c1_35, %c0_36, %c0_37, %c0_38] : memref<1x2x2x8x256xbf16, #tpu.memory_space<vmem>>, vector<1x1x1x8x256xbf16>
    %40 = vector.shape_cast %39 : vector<1x1x1x8x256xbf16> to vector<8x256xbf16>
    %41 = vector.shape_cast %38 : vector<8x256xbf16> to vector<1x1x1x8x256xbf16>
    tpu.vector_store %arg6[%c0_34, %c1_35, %c0_36, %c0_37, %c0_38], %41 {strides = array<i32>} : memref<1x2x2x8x256xbf16, #tpu.memory_space<vmem>>, vector<1x1x1x8x256xbf16>,
    %c1_39 = arith.constant 1 : index
    %c1_40 = arith.constant 1 : index
    %c0_41 = arith.constant 0 : index
    %c0_42 = arith.constant 0 : index
    %42 = vector.load %arg4[%c1_39, %c1_40, %c0_41, %c0_42] : memref<2x2x8x16xbf16, #tpu.memory_space<vmem>>, vector<1x1x8x16xbf16>
    %43 = vector.shape_cast %42 : vector<1x1x8x16xbf16> to vector<8x16xbf16>
    %cst_43 = arith.constant dense<0.000000e+00> : vector<8x256xf32>
    %44 = tpu.matmul %43, %13, %cst_43 {dimension_numbers = #tpu.dot_dimension_numbers<[1], [0], [0], [1], [0, 0, 1, 1], [], []>} : vector<8x16xbf16>, vector<16x256xbf16>, vector<8x256xf32> -> vector<8x256xf32>
    %45 = vector.broadcast %14 : vector<8x1xf32> to vector<8x256xf32>
    %46 = arith.addf %44, %45 : vector<8x256xf32>
    %47 = arith.truncf %46 : vector<8x256xf32> to vector<8x256xbf16>
    %c0_44 = arith.constant 0 : index
    %c1_45 = arith.constant 1 : index
    %c1_46 = arith.constant 1 : index
    %c0_47 = arith.constant 0 : index
    %c0_48 = arith.constant 0 : index
    %48 = vector.load %arg6[%c0_44, %c1_45, %c1_46, %c0_47, %c0_48] : memref<1x2x2x8x256xbf16, #tpu.memory_space<vmem>>, vector<1x1x1x8x256xbf16>
    %49 = vector.shape_cast %48 : vector<1x1x1x8x256xbf16> to vector<8x256xbf16>
    %50 = vector.shape_cast %47 : vector<8x256xbf16> to vector<1x1x1x8x256xbf16>
    tpu.vector_store %arg6[%c0_44, %c1_45, %c1_46, %c0_47, %c0_48], %50 {strides = array<i32>} : memref<1x2x2x8x256xbf16, #tpu.memory_space<vmem>>, vector<1x1x1x8x256xbf16>,
    return
  }
  func.func @transform_0(%arg0: i32, %arg1: i32) -> (i32, i32, i32) {
    %c0_i32 = arith.constant 0 : i32
    %c0_i32_0 = arith.constant 0 : i32
    return %arg0, %c0_i32, %arg1 : i32, i32, i32
  }
  func.func @transform_1(%arg0: i32, %arg1: i32) -> (i32, i32, i32) {
    %c0_i32 = arith.constant 0 : i32
    %c0_i32_0 = arith.constant 0 : i32
    %c0_i32_1 = arith.constant 0 : i32
    %c0_i32_2 = arith.constant 0 : i32
    return %c0_i32, %c0_i32_0, %c0_i32_1 : i32, i32, i32
  }
  func.func @transform_2(%arg0: i32, %arg1: i32) -> (i32, i32, i32, i32) {
    %c0_i32 = arith.constant 0 : i32
    %c0_i32_0 = arith.constant 0 : i32
    %c0_i32_1 = arith.constant 0 : i32
    %c0_i32_2 = arith.constant 0 : i32
    %c0_i32_3 = arith.constant 0 : i32
    return %c0_i32, %c0_i32_0, %c0_i32_1, %c0_i32_2 : i32, i32, i32, i32
  }
  func.func @transform_3(%arg0: i32, %arg1: i32) -> (i32, i32) {
    %c0_i32 = arith.constant 0 : i32
    %c0_i32_0 = arith.constant 0 : i32
    %c0_i32_1 = arith.constant 0 : i32
    return %c0_i32, %c0_i32_0 : i32, i32
  }
  func.func @transform_4(%arg0: i32, %arg1: i32) -> (i32, i32, i32, i32, i32) {
    %c0_i32 = arith.constant 0 : i32
    %c0_i32_0 = arith.constant 0 : i32
    %c0_i32_1 = arith.constant 0 : i32
    %c0_i32_2 = arith.constant 0 : i32
    return %arg0, %c0_i32, %c0_i32_0, %c0_i32_1, %arg1 : i32, i32, i32, i32, i32
  }
}

module attributes {stable_mosaic.version = 11 : i64} {
  func.func @_conv3x3_norm_kernel(%arg0: i32, %arg1: memref<1x16x256xbf16, #tpu.memory_space<vmem>>, %arg2: memref<2x16x1xf32, #tpu.memory_space<vmem>>, %arg3: memref<3x3x16x16xbf16, #tpu.memory_space<vmem>>, %arg4: memref<1x16x256xbf16, #tpu.memory_space<vmem>>, %arg5: memref<1x16x2xf32, #tpu.memory_space<vmem>>, %arg6: memref<16x401xbf16, #tpu.memory_space<vmem>>) attributes {dimension_semantics = [#tpu.dimension_semantics<parallel>], iteration_bounds = array<i64: 2>, scalar_prefetch = 0 : i64, scratch_operands = 1 : i64, tpu.core_type = #tpu.core_type<tc>, window_params = [{transform_indices = @transform_0, window_bounds = array<i64: 1, 16, 256>}, {pipeline_mode = #tpu.pipeline_mode<synchronous>, transform_indices = @transform_1, window_bounds = array<i64: 2, 16, 1>}, {pipeline_mode = #tpu.pipeline_mode<synchronous>, transform_indices = @transform_2, window_bounds = array<i64: 3, 3, 16, 16>}, {transform_indices = @transform_3, window_bounds = array<i64: 1, 16, 256>}, {transform_indices = @transform_4, window_bounds = array<i64: 1, 16, 2>}]} {
    %cst = arith.constant 0.000000e+00 : bf16
    %0 = vector.broadcast %cst : bf16 to vector<16x128xbf16>
    %c0 = arith.constant 0 : index
    %c0_0 = arith.constant 0 : index
    %1 = vector.load %arg6[%c0, %c0_0] : memref<16x401xbf16, #tpu.memory_space<vmem>>, vector<16x128xbf16>
    tpu.vector_store %arg6[%c0, %c0_0], %0 {strides = array<i32>} : memref<16x401xbf16, #tpu.memory_space<vmem>>, vector<16x128xbf16>,
    %cst_1 = arith.constant 0.000000e+00 : bf16
    %2 = vector.broadcast %cst_1 : bf16 to vector<16x17xbf16>
    %c0_2 = arith.constant 0 : index
    %c384 = arith.constant 384 : index
    %3 = vector.load %arg6[%c0_2, %c384] : memref<16x401xbf16, #tpu.memory_space<vmem>>, vector<16x17xbf16>
    tpu.vector_store %arg6[%c0_2, %c384], %2 {strides = array<i32>} : memref<16x401xbf16, #tpu.memory_space<vmem>>, vector<16x17xbf16>,
    %c0_3 = arith.constant 0 : index
    %c0_4 = arith.constant 0 : index
    %c0_5 = arith.constant 0 : index
    %4 = vector.load %arg1[%c0_3, %c0_4, %c0_5] : memref<1x16x256xbf16, #tpu.memory_space<vmem>>, vector<1x16x256xbf16>
    %5 = vector.shape_cast %4 : vector<1x16x256xbf16> to vector<16x256xbf16>
    %6 = arith.extf %5 : vector<16x256xbf16> to vector<16x256xf32>
    %c0_6 = arith.constant 0 : index
    %c0_7 = arith.constant 0 : index
    %c0_8 = arith.constant 0 : index
    %7 = vector.load %arg2[%c0_6, %c0_7, %c0_8] : memref<2x16x1xf32, #tpu.memory_space<vmem>>, vector<1x16x1xf32>
    %8 = vector.shape_cast %7 : vector<1x16x1xf32> to vector<16x1xf32>
    %9 = vector.broadcast %8 : vector<16x1xf32> to vector<16x256xf32>
    %10 = arith.mulf %6, %9 : vector<16x256xf32>
    %c1 = arith.constant 1 : index
    %c0_9 = arith.constant 0 : index
    %c0_10 = arith.constant 0 : index
    %11 = vector.load %arg2[%c1, %c0_9, %c0_10] : memref<2x16x1xf32, #tpu.memory_space<vmem>>, vector<1x16x1xf32>
    %12 = vector.shape_cast %11 : vector<1x16x1xf32> to vector<16x1xf32>
    %13 = vector.broadcast %12 : vector<16x1xf32> to vector<16x256xf32>
    %14 = arith.addf %10, %13 : vector<16x256xf32>
    %cst_11 = arith.constant 0.000000e+00 : f32
    %15 = vector.broadcast %cst_11 : f32 to vector<16x256xf32>
    %16 = arith.maximumf %14, %15 : vector<16x256xf32>
    %17 = arith.truncf %16 : vector<16x256xf32> to vector<16x256xbf16>
    %c0_12 = arith.constant 0 : index
    %c128 = arith.constant 128 : index
    %18 = vector.load %arg6[%c0_12, %c128] : memref<16x401xbf16, #tpu.memory_space<vmem>>, vector<16x256xbf16>
    tpu.vector_store %arg6[%c0_12, %c128], %17 {strides = array<i32>} : memref<16x401xbf16, #tpu.memory_space<vmem>>, vector<16x256xbf16>,
    %19 = tpu.iota {dimensions = array<i32: 1>} : vector<1x256xi32>
    %c16_i32 = arith.constant 16 : i32
    %c0_i32 = arith.constant 0 : i32
    %20 = arith.cmpi eq, %c16_i32, %c0_i32 : i32
    %c1_i32 = arith.constant 1 : i32
    %21 = arith.select %20, %c1_i32, %c16_i32 : i32
    %22 = vector.broadcast %21 : i32 to vector<1x256xi32>
    %23 = arith.remsi %19, %22 : vector<1x256xi32>
    %c0_i32_13 = arith.constant 0 : i32
    %24 = vector.broadcast %c0_i32_13 : i32 to vector<1x256xi32>
    %25 = arith.cmpi ne, %23, %24 : vector<1x256xi32>
    %c0_i32_14 = arith.constant 0 : i32
    %26 = vector.broadcast %c0_i32_14 : i32 to vector<1x256xi32>
    %27 = arith.cmpi slt, %23, %26 : vector<1x256xi32>
    %c0_i32_15 = arith.constant 0 : i32
    %28 = arith.cmpi slt, %21, %c0_i32_15 : i32
    %29 = vector.broadcast %28 : i1 to vector<1x256xi1>
    %30 = vector.broadcast %29 : vector<1x256xi1> to vector<1x256xi1>
    %31 = arith.xori %27, %30 : vector<1x256xi1>
    %32 = arith.andi %31, %25 : vector<1x256xi1>
    %33 = vector.broadcast %21 : i32 to vector<1x256xi32>
    %34 = arith.addi %23, %33 : vector<1x256xi32>
    %35 = arith.select %32, %34, %23 : vector<1x256xi1>, vector<1x256xi32>
    %cst_16 = arith.constant 0.000000e+00 : f32
    %36 = vector.broadcast %cst_16 : f32 to vector<16x256xf32>
    %cst_17 = arith.constant 0.000000e+00 : f32
    %37 = vector.broadcast %cst_17 : f32 to vector<16x256xf32>
    %c0_18 = arith.constant 0 : index
    %c111 = arith.constant 111 : index
    %38 = vector.load %arg6[%c0_18, %c111] : memref<16x401xbf16, #tpu.memory_space<vmem>>, vector<16x256xbf16>
    %c0_19 = arith.constant 0 : index
    %c0_20 = arith.constant 0 : index
    %c0_21 = arith.constant 0 : index
    %c0_22 = arith.constant 0 : index
    %39 = vector.load %arg3[%c0_19, %c0_20, %c0_21, %c0_22] : memref<3x3x16x16xbf16, #tpu.memory_space<vmem>>, vector<1x1x16x16xbf16>
    %40 = vector.shape_cast %39 : vector<1x1x16x16xbf16> to vector<16x16xbf16>
    %cst_23 = arith.constant dense<0.000000e+00> : vector<16x256xf32>
    %41 = tpu.matmul %40, %38, %cst_23 {dimension_numbers = #tpu.dot_dimension_numbers<[1], [0], [0], [1], [0, 0, 1, 1], [], []>} : vector<16x16xbf16>, vector<16x256xbf16>, vector<16x256xf32> -> vector<16x256xf32>
    %42 = arith.addf %37, %41 : vector<16x256xf32>
    %c0_24 = arith.constant 0 : index
    %c127 = arith.constant 127 : index
    %43 = vector.load %arg6[%c0_24, %c127] : memref<16x401xbf16, #tpu.memory_space<vmem>>, vector<16x256xbf16>
    %c1_25 = arith.constant 1 : index
    %c0_26 = arith.constant 0 : index
    %c0_27 = arith.constant 0 : index
    %c0_28 = arith.constant 0 : index
    %44 = vector.load %arg3[%c1_25, %c0_26, %c0_27, %c0_28] : memref<3x3x16x16xbf16, #tpu.memory_space<vmem>>, vector<1x1x16x16xbf16>
    %45 = vector.shape_cast %44 : vector<1x1x16x16xbf16> to vector<16x16xbf16>
    %cst_29 = arith.constant dense<0.000000e+00> : vector<16x256xf32>
    %46 = tpu.matmul %45, %43, %cst_29 {dimension_numbers = #tpu.dot_dimension_numbers<[1], [0], [0], [1], [0, 0, 1, 1], [], []>} : vector<16x16xbf16>, vector<16x256xbf16>, vector<16x256xf32> -> vector<16x256xf32>
    %47 = arith.addf %42, %46 : vector<16x256xf32>
    %c0_30 = arith.constant 0 : index
    %c143 = arith.constant 143 : index
    %48 = vector.load %arg6[%c0_30, %c143] : memref<16x401xbf16, #tpu.memory_space<vmem>>, vector<16x256xbf16>
    %c2 = arith.constant 2 : index
    %c0_31 = arith.constant 0 : index
    %c0_32 = arith.constant 0 : index
    %c0_33 = arith.constant 0 : index
    %49 = vector.load %arg3[%c2, %c0_31, %c0_32, %c0_33] : memref<3x3x16x16xbf16, #tpu.memory_space<vmem>>, vector<1x1x16x16xbf16>
    %50 = vector.shape_cast %49 : vector<1x1x16x16xbf16> to vector<16x16xbf16>
    %cst_34 = arith.constant dense<0.000000e+00> : vector<16x256xf32>
    %51 = tpu.matmul %50, %48, %cst_34 {dimension_numbers = #tpu.dot_dimension_numbers<[1], [0], [0], [1], [0, 0, 1, 1], [], []>} : vector<16x16xbf16>, vector<16x256xbf16>, vector<16x256xf32> -> vector<16x256xf32>
    %52 = arith.addf %47, %51 : vector<16x256xf32>
    %c1_i32_35 = arith.constant 1 : i32
    %53 = vector.broadcast %c1_i32_35 : i32 to vector<1x256xi32>
    %54 = arith.cmpi sge, %35, %53 : vector<1x256xi32>
    %cst_36 = arith.constant 0.000000e+00 : f32
    %55 = vector.shape_cast %54 : vector<1x256xi1> to vector<1x256xi1>
    %56 = vector.broadcast %55 : vector<1x256xi1> to vector<16x256xi1>
    %57 = vector.broadcast %cst_36 : f32 to vector<16x256xf32>
    %58 = arith.select %56, %52, %57 : vector<16x256xi1>, vector<16x256xf32>
    %59 = arith.addf %36, %58 : vector<16x256xf32>
    %cst_37 = arith.constant 0.000000e+00 : f32
    %60 = vector.broadcast %cst_37 : f32 to vector<16x256xf32>
    %c0_38 = arith.constant 0 : index
    %c112 = arith.constant 112 : index
    %61 = vector.load %arg6[%c0_38, %c112] : memref<16x401xbf16, #tpu.memory_space<vmem>>, vector<16x256xbf16>
    %c0_39 = arith.constant 0 : index
    %c1_40 = arith.constant 1 : index
    %c0_41 = arith.constant 0 : index
    %c0_42 = arith.constant 0 : index
    %62 = vector.load %arg3[%c0_39, %c1_40, %c0_41, %c0_42] : memref<3x3x16x16xbf16, #tpu.memory_space<vmem>>, vector<1x1x16x16xbf16>
    %63 = vector.shape_cast %62 : vector<1x1x16x16xbf16> to vector<16x16xbf16>
    %cst_43 = arith.constant dense<0.000000e+00> : vector<16x256xf32>
    %64 = tpu.matmul %63, %61, %cst_43 {dimension_numbers = #tpu.dot_dimension_numbers<[1], [0], [0], [1], [0, 0, 1, 1], [], []>} : vector<16x16xbf16>, vector<16x256xbf16>, vector<16x256xf32> -> vector<16x256xf32>
    %65 = arith.addf %60, %64 : vector<16x256xf32>
    %c0_44 = arith.constant 0 : index
    %c128_45 = arith.constant 128 : index
    %66 = vector.load %arg6[%c0_44, %c128_45] : memref<16x401xbf16, #tpu.memory_space<vmem>>, vector<16x256xbf16>
    %c1_46 = arith.constant 1 : index
    %c1_47 = arith.constant 1 : index
    %c0_48 = arith.constant 0 : index
    %c0_49 = arith.constant 0 : index
    %67 = vector.load %arg3[%c1_46, %c1_47, %c0_48, %c0_49] : memref<3x3x16x16xbf16, #tpu.memory_space<vmem>>, vector<1x1x16x16xbf16>
    %68 = vector.shape_cast %67 : vector<1x1x16x16xbf16> to vector<16x16xbf16>
    %cst_50 = arith.constant dense<0.000000e+00> : vector<16x256xf32>
    %69 = tpu.matmul %68, %66, %cst_50 {dimension_numbers = #tpu.dot_dimension_numbers<[1], [0], [0], [1], [0, 0, 1, 1], [], []>} : vector<16x16xbf16>, vector<16x256xbf16>, vector<16x256xf32> -> vector<16x256xf32>
    %70 = arith.addf %65, %69 : vector<16x256xf32>
    %c0_51 = arith.constant 0 : index
    %c144 = arith.constant 144 : index
    %71 = vector.load %arg6[%c0_51, %c144] : memref<16x401xbf16, #tpu.memory_space<vmem>>, vector<16x256xbf16>
    %c2_52 = arith.constant 2 : index
    %c1_53 = arith.constant 1 : index
    %c0_54 = arith.constant 0 : index
    %c0_55 = arith.constant 0 : index
    %72 = vector.load %arg3[%c2_52, %c1_53, %c0_54, %c0_55] : memref<3x3x16x16xbf16, #tpu.memory_space<vmem>>, vector<1x1x16x16xbf16>
    %73 = vector.shape_cast %72 : vector<1x1x16x16xbf16> to vector<16x16xbf16>
    %cst_56 = arith.constant dense<0.000000e+00> : vector<16x256xf32>
    %74 = tpu.matmul %73, %71, %cst_56 {dimension_numbers = #tpu.dot_dimension_numbers<[1], [0], [0], [1], [0, 0, 1, 1], [], []>} : vector<16x16xbf16>, vector<16x256xbf16>, vector<16x256xf32> -> vector<16x256xf32>
    %75 = arith.addf %70, %74 : vector<16x256xf32>
    %76 = arith.addf %59, %75 : vector<16x256xf32>
    %cst_57 = arith.constant 0.000000e+00 : f32
    %77 = vector.broadcast %cst_57 : f32 to vector<16x256xf32>
    %c0_58 = arith.constant 0 : index
    %c113 = arith.constant 113 : index
    %78 = vector.load %arg6[%c0_58, %c113] : memref<16x401xbf16, #tpu.memory_space<vmem>>, vector<16x256xbf16>
    %c0_59 = arith.constant 0 : index
    %c2_60 = arith.constant 2 : index
    %c0_61 = arith.constant 0 : index
    %c0_62 = arith.constant 0 : index
    %79 = vector.load %arg3[%c0_59, %c2_60, %c0_61, %c0_62] : memref<3x3x16x16xbf16, #tpu.memory_space<vmem>>, vector<1x1x16x16xbf16>
    %80 = vector.shape_cast %79 : vector<1x1x16x16xbf16> to vector<16x16xbf16>
    %cst_63 = arith.constant dense<0.000000e+00> : vector<16x256xf32>
    %81 = tpu.matmul %80, %78, %cst_63 {dimension_numbers = #tpu.dot_dimension_numbers<[1], [0], [0], [1], [0, 0, 1, 1], [], []>} : vector<16x16xbf16>, vector<16x256xbf16>, vector<16x256xf32> -> vector<16x256xf32>
    %82 = arith.addf %77, %81 : vector<16x256xf32>
    %c0_64 = arith.constant 0 : index
    %c129 = arith.constant 129 : index
    %83 = vector.load %arg6[%c0_64, %c129] : memref<16x401xbf16, #tpu.memory_space<vmem>>, vector<16x256xbf16>
    %c1_65 = arith.constant 1 : index
    %c2_66 = arith.constant 2 : index
    %c0_67 = arith.constant 0 : index
    %c0_68 = arith.constant 0 : index
    %84 = vector.load %arg3[%c1_65, %c2_66, %c0_67, %c0_68] : memref<3x3x16x16xbf16, #tpu.memory_space<vmem>>, vector<1x1x16x16xbf16>
    %85 = vector.shape_cast %84 : vector<1x1x16x16xbf16> to vector<16x16xbf16>
    %cst_69 = arith.constant dense<0.000000e+00> : vector<16x256xf32>
    %86 = tpu.matmul %85, %83, %cst_69 {dimension_numbers = #tpu.dot_dimension_numbers<[1], [0], [0], [1], [0, 0, 1, 1], [], []>} : vector<16x16xbf16>, vector<16x256xbf16>, vector<16x256xf32> -> vector<16x256xf32>
    %87 = arith.addf %82, %86 : vector<16x256xf32>
    %c0_70 = arith.constant 0 : index
    %c145 = arith.constant 145 : index
    %88 = vector.load %arg6[%c0_70, %c145] : memref<16x401xbf16, #tpu.memory_space<vmem>>, vector<16x256xbf16>
    %c2_71 = arith.constant 2 : index
    %c2_72 = arith.constant 2 : index
    %c0_73 = arith.constant 0 : index
    %c0_74 = arith.constant 0 : index
    %89 = vector.load %arg3[%c2_71, %c2_72, %c0_73, %c0_74] : memref<3x3x16x16xbf16, #tpu.memory_space<vmem>>, vector<1x1x16x16xbf16>
    %90 = vector.shape_cast %89 : vector<1x1x16x16xbf16> to vector<16x16xbf16>
    %cst_75 = arith.constant dense<0.000000e+00> : vector<16x256xf32>
    %91 = tpu.matmul %90, %88, %cst_75 {dimension_numbers = #tpu.dot_dimension_numbers<[1], [0], [0], [1], [0, 0, 1, 1], [], []>} : vector<16x16xbf16>, vector<16x256xbf16>, vector<16x256xf32> -> vector<16x256xf32>
    %92 = arith.addf %87, %91 : vector<16x256xf32>
    %c14_i32 = arith.constant 14 : i32
    %93 = vector.broadcast %c14_i32 : i32 to vector<1x256xi32>
    %94 = arith.cmpi sle, %35, %93 : vector<1x256xi32>
    %cst_76 = arith.constant 0.000000e+00 : f32
    %95 = vector.shape_cast %94 : vector<1x256xi1> to vector<1x256xi1>
    %96 = vector.broadcast %95 : vector<1x256xi1> to vector<16x256xi1>
    %97 = vector.broadcast %cst_76 : f32 to vector<16x256xf32>
    %98 = arith.select %96, %92, %97 : vector<16x256xi1>, vector<16x256xf32>
    %99 = arith.addf %76, %98 : vector<16x256xf32>
    %100 = arith.truncf %99 : vector<16x256xf32> to vector<16x256xbf16>
    %c0_77 = arith.constant 0 : index
    %c0_78 = arith.constant 0 : index
    %c0_79 = arith.constant 0 : index
    %101 = vector.load %arg4[%c0_77, %c0_78, %c0_79] : memref<1x16x256xbf16, #tpu.memory_space<vmem>>, vector<1x16x256xbf16>
    %102 = vector.shape_cast %101 : vector<1x16x256xbf16> to vector<16x256xbf16>
    %103 = vector.shape_cast %100 : vector<16x256xbf16> to vector<1x16x256xbf16>
    tpu.vector_store %arg4[%c0_77, %c0_78, %c0_79], %103 {strides = array<i32>} : memref<1x16x256xbf16, #tpu.memory_space<vmem>>, vector<1x16x256xbf16>,
    %104 = arith.extf %100 : vector<16x256xbf16> to vector<16x256xf32>
    %cst_80 = arith.constant dense<0.000000e+00> : vector<16xf32>
    %105 = vector.multi_reduction <add>, %104, %cst_80 [1] : vector<16x256xf32> to vector<16xf32>
    %106 = vector.shape_cast %105 : vector<16xf32> to vector<16x1xf32>
    %107 = arith.mulf %104, %104 : vector<16x256xf32>
    %cst_81 = arith.constant dense<0.000000e+00> : vector<16xf32>
    %108 = vector.multi_reduction <add>, %107, %cst_81 [1] : vector<16x256xf32> to vector<16xf32>
    %109 = vector.shape_cast %108 : vector<16xf32> to vector<16x1xf32>
    %110 = tpu.concatenate %106, %109 in 1 : vector<16x1xf32>, vector<16x1xf32> -> vector<16x2xf32>
    %c0_82 = arith.constant 0 : index
    %c0_83 = arith.constant 0 : index
    %c0_84 = arith.constant 0 : index
    %111 = vector.load %arg5[%c0_82, %c0_83, %c0_84] : memref<1x16x2xf32, #tpu.memory_space<vmem>>, vector<1x16x2xf32>
    %112 = vector.shape_cast %111 : vector<1x16x2xf32> to vector<16x2xf32>
    %113 = vector.shape_cast %110 : vector<16x2xf32> to vector<1x16x2xf32>
    tpu.vector_store %arg5[%c0_82, %c0_83, %c0_84], %113 {strides = array<i32>} : memref<1x16x2xf32, #tpu.memory_space<vmem>>, vector<1x16x2xf32>,
    return
  }
  func.func @transform_0(%arg0: i32) -> (i32, i32, i32) {
    %c0_i32 = arith.constant 0 : i32
    %c0_i32_0 = arith.constant 0 : i32
    %c0_i32_1 = arith.constant 0 : i32
    return %arg0, %c0_i32, %c0_i32_0 : i32, i32, i32
  }
  func.func @transform_1(%arg0: i32) -> (i32, i32, i32) {
    %c0_i32 = arith.constant 0 : i32
    %c0_i32_0 = arith.constant 0 : i32
    %c0_i32_1 = arith.constant 0 : i32
    %c0_i32_2 = arith.constant 0 : i32
    return %c0_i32, %c0_i32_0, %c0_i32_1 : i32, i32, i32
  }
  func.func @transform_2(%arg0: i32) -> (i32, i32, i32, i32) {
    %c0_i32 = arith.constant 0 : i32
    %c0_i32_0 = arith.constant 0 : i32
    %c0_i32_1 = arith.constant 0 : i32
    %c0_i32_2 = arith.constant 0 : i32
    %c0_i32_3 = arith.constant 0 : i32
    return %c0_i32, %c0_i32_0, %c0_i32_1, %c0_i32_2 : i32, i32, i32, i32
  }
  func.func @transform_3(%arg0: i32) -> (i32, i32, i32) {
    %c0_i32 = arith.constant 0 : i32
    %c0_i32_0 = arith.constant 0 : i32
    %c0_i32_1 = arith.constant 0 : i32
    return %arg0, %c0_i32, %c0_i32_0 : i32, i32, i32
  }
  func.func @transform_4(%arg0: i32) -> (i32, i32, i32) {
    %c0_i32 = arith.constant 0 : i32
    %c0_i32_0 = arith.constant 0 : i32
    %c0_i32_1 = arith.constant 0 : i32
    return %arg0, %c0_i32, %c0_i32_0 : i32, i32, i32
  }
}

module attributes {stable_mosaic.version = 11 : i64} {
  func.func @_conv3x3_cat_kernel(%arg0: i32, %arg1: memref<1x8x1024xbf16, #tpu.memory_space<vmem>>, %arg2: memref<1x8x1024xbf16, #tpu.memory_space<vmem>>, %arg3: memref<3x3x8x16xbf16, #tpu.memory_space<vmem>>, %arg4: memref<1x8x1024xbf16, #tpu.memory_space<vmem>>, %arg5: memref<1x8x2xf32, #tpu.memory_space<vmem>>, %arg6: memref<16x1185xbf16, #tpu.memory_space<vmem>>) attributes {dimension_semantics = [#tpu.dimension_semantics<parallel>], iteration_bounds = array<i64: 2>, scalar_prefetch = 0 : i64, scratch_operands = 1 : i64, tpu.core_type = #tpu.core_type<tc>, window_params = [{transform_indices = @transform_0, window_bounds = array<i64: 1, 8, 1024>}, {transform_indices = @transform_1, window_bounds = array<i64: 1, 8, 1024>}, {pipeline_mode = #tpu.pipeline_mode<synchronous>, transform_indices = @transform_2, window_bounds = array<i64: 3, 3, 8, 16>}, {transform_indices = @transform_3, window_bounds = array<i64: 1, 8, 1024>}, {transform_indices = @transform_4, window_bounds = array<i64: 1, 8, 2>}]} {
    %cst = arith.constant 0.000000e+00 : bf16
    %0 = vector.broadcast %cst : bf16 to vector<16x128xbf16>
    %c0 = arith.constant 0 : index
    %c0_0 = arith.constant 0 : index
    %1 = vector.load %arg6[%c0, %c0_0] : memref<16x1185xbf16, #tpu.memory_space<vmem>>, vector<16x128xbf16>
    tpu.vector_store %arg6[%c0, %c0_0], %0 {strides = array<i32>} : memref<16x1185xbf16, #tpu.memory_space<vmem>>, vector<16x128xbf16>,
    %cst_1 = arith.constant 0.000000e+00 : bf16
    %2 = vector.broadcast %cst_1 : bf16 to vector<16x33xbf16>
    %c0_2 = arith.constant 0 : index
    %c1152 = arith.constant 1152 : index
    %3 = vector.load %arg6[%c0_2, %c1152] : memref<16x1185xbf16, #tpu.memory_space<vmem>>, vector<16x33xbf16>
    tpu.vector_store %arg6[%c0_2, %c1152], %2 {strides = array<i32>} : memref<16x1185xbf16, #tpu.memory_space<vmem>>, vector<16x33xbf16>,
    %c0_3 = arith.constant 0 : index
    %c0_4 = arith.constant 0 : index
    %c0_5 = arith.constant 0 : index
    %4 = vector.load %arg1[%c0_3, %c0_4, %c0_5] : memref<1x8x1024xbf16, #tpu.memory_space<vmem>>, vector<1x8x1024xbf16>
    %5 = vector.shape_cast %4 : vector<1x8x1024xbf16> to vector<8x1024xbf16>
    %c0_6 = arith.constant 0 : index
    %c128 = arith.constant 128 : index
    %6 = vector.load %arg6[%c0_6, %c128] : memref<16x1185xbf16, #tpu.memory_space<vmem>>, vector<8x1024xbf16>
    tpu.vector_store %arg6[%c0_6, %c128], %5 {strides = array<i32>} : memref<16x1185xbf16, #tpu.memory_space<vmem>>, vector<8x1024xbf16>,
    %c0_7 = arith.constant 0 : index
    %c0_8 = arith.constant 0 : index
    %c0_9 = arith.constant 0 : index
    %7 = vector.load %arg2[%c0_7, %c0_8, %c0_9] : memref<1x8x1024xbf16, #tpu.memory_space<vmem>>, vector<1x8x1024xbf16>
    %8 = vector.shape_cast %7 : vector<1x8x1024xbf16> to vector<8x1024xbf16>
    %c8 = arith.constant 8 : index
    %c128_10 = arith.constant 128 : index
    %9 = vector.load %arg6[%c8, %c128_10] : memref<16x1185xbf16, #tpu.memory_space<vmem>>, vector<8x1024xbf16>
    tpu.vector_store %arg6[%c8, %c128_10], %8 {strides = array<i32>} : memref<16x1185xbf16, #tpu.memory_space<vmem>>, vector<8x1024xbf16>,
    %10 = tpu.iota {dimensions = array<i32: 1>} : vector<1x1024xi32>
    %c32_i32 = arith.constant 32 : i32
    %c0_i32 = arith.constant 0 : i32
    %11 = arith.cmpi eq, %c32_i32, %c0_i32 : i32
    %c1_i32 = arith.constant 1 : i32
    %12 = arith.select %11, %c1_i32, %c32_i32 : i32
    %13 = vector.broadcast %12 : i32 to vector<1x1024xi32>
    %14 = arith.remsi %10, %13 : vector<1x1024xi32>
    %c0_i32_11 = arith.constant 0 : i32
    %15 = vector.broadcast %c0_i32_11 : i32 to vector<1x1024xi32>
    %16 = arith.cmpi ne, %14, %15 : vector<1x1024xi32>
    %c0_i32_12 = arith.constant 0 : i32
    %17 = vector.broadcast %c0_i32_12 : i32 to vector<1x1024xi32>
    %18 = arith.cmpi slt, %14, %17 : vector<1x1024xi32>
    %c0_i32_13 = arith.constant 0 : i32
    %19 = arith.cmpi slt, %12, %c0_i32_13 : i32
    %20 = vector.broadcast %19 : i1 to vector<1x1024xi1>
    %21 = vector.broadcast %20 : vector<1x1024xi1> to vector<1x1024xi1>
    %22 = arith.xori %18, %21 : vector<1x1024xi1>
    %23 = arith.andi %22, %16 : vector<1x1024xi1>
    %24 = vector.broadcast %12 : i32 to vector<1x1024xi32>
    %25 = arith.addi %14, %24 : vector<1x1024xi32>
    %26 = arith.select %23, %25, %14 : vector<1x1024xi1>, vector<1x1024xi32>
    %cst_14 = arith.constant 0.000000e+00 : f32
    %27 = vector.broadcast %cst_14 : f32 to vector<8x1024xf32>
    %cst_15 = arith.constant 0.000000e+00 : f32
    %28 = vector.broadcast %cst_15 : f32 to vector<8x1024xf32>
    %c0_16 = arith.constant 0 : index
    %c95 = arith.constant 95 : index
    %29 = vector.load %arg6[%c0_16, %c95] : memref<16x1185xbf16, #tpu.memory_space<vmem>>, vector<16x1024xbf16>
    %c0_17 = arith.constant 0 : index
    %c0_18 = arith.constant 0 : index
    %c0_19 = arith.constant 0 : index
    %c0_20 = arith.constant 0 : index
    %30 = vector.load %arg3[%c0_17, %c0_18, %c0_19, %c0_20] : memref<3x3x8x16xbf16, #tpu.memory_space<vmem>>, vector<1x1x8x16xbf16>
    %31 = vector.shape_cast %30 : vector<1x1x8x16xbf16> to vector<8x16xbf16>
    %cst_21 = arith.constant dense<0.000000e+00> : vector<8x1024xf32>
    %32 = tpu.matmul %31, %29, %cst_21 {dimension_numbers = #tpu.dot_dimension_numbers<[1], [0], [0], [1], [0, 0, 1, 1], [], []>} : vector<8x16xbf16>, vector<16x1024xbf16>, vector<8x1024xf32> -> vector<8x1024xf32>
    %33 = arith.addf %28, %32 : vector<8x1024xf32>
    %c0_22 = arith.constant 0 : index
    %c127 = arith.constant 127 : index
    %34 = vector.load %arg6[%c0_22, %c127] : memref<16x1185xbf16, #tpu.memory_space<vmem>>, vector<16x1024xbf16>
    %c1 = arith.constant 1 : index
    %c0_23 = arith.constant 0 : index
    %c0_24 = arith.constant 0 : index
    %c0_25 = arith.constant 0 : index
    %35 = vector.load %arg3[%c1, %c0_23, %c0_24, %c0_25] : memref<3x3x8x16xbf16, #tpu.memory_space<vmem>>, vector<1x1x8x16xbf16>
    %36 = vector.shape_cast %35 : vector<1x1x8x16xbf16> to vector<8x16xbf16>
    %cst_26 = arith.constant dense<0.000000e+00> : vector<8x1024xf32>
    %37 = tpu.matmul %36, %34, %cst_26 {dimension_numbers = #tpu.dot_dimension_numbers<[1], [0], [0], [1], [0, 0, 1, 1], [], []>} : vector<8x16xbf16>, vector<16x1024xbf16>, vector<8x1024xf32> -> vector<8x1024xf32>
    %38 = arith.addf %33, %37 : vector<8x1024xf32>
    %c0_27 = arith.constant 0 : index
    %c159 = arith.constant 159 : index
    %39 = vector.load %arg6[%c0_27, %c159] : memref<16x1185xbf16, #tpu.memory_space<vmem>>, vector<16x1024xbf16>
    %c2 = arith.constant 2 : index
    %c0_28 = arith.constant 0 : index
    %c0_29 = arith.constant 0 : index
    %c0_30 = arith.constant 0 : index
    %40 = vector.load %arg3[%c2, %c0_28, %c0_29, %c0_30] : memref<3x3x8x16xbf16, #tpu.memory_space<vmem>>, vector<1x1x8x16xbf16>
    %41 = vector.shape_cast %40 : vector<1x1x8x16xbf16> to vector<8x16xbf16>
    %cst_31 = arith.constant dense<0.000000e+00> : vector<8x1024xf32>
    %42 = tpu.matmul %41, %39, %cst_31 {dimension_numbers = #tpu.dot_dimension_numbers<[1], [0], [0], [1], [0, 0, 1, 1], [], []>} : vector<8x16xbf16>, vector<16x1024xbf16>, vector<8x1024xf32> -> vector<8x1024xf32>
    %43 = arith.addf %38, %42 : vector<8x1024xf32>
    %c1_i32_32 = arith.constant 1 : i32
    %44 = vector.broadcast %c1_i32_32 : i32 to vector<1x1024xi32>
    %45 = arith.cmpi sge, %26, %44 : vector<1x1024xi32>
    %cst_33 = arith.constant 0.000000e+00 : f32
    %46 = vector.shape_cast %45 : vector<1x1024xi1> to vector<1x1024xi1>
    %47 = vector.broadcast %46 : vector<1x1024xi1> to vector<8x1024xi1>
    %48 = vector.broadcast %cst_33 : f32 to vector<8x1024xf32>
    %49 = arith.select %47, %43, %48 : vector<8x1024xi1>, vector<8x1024xf32>
    %50 = arith.addf %27, %49 : vector<8x1024xf32>
    %cst_34 = arith.constant 0.000000e+00 : f32
    %51 = vector.broadcast %cst_34 : f32 to vector<8x1024xf32>
    %c0_35 = arith.constant 0 : index
    %c96 = arith.constant 96 : index
    %52 = vector.load %arg6[%c0_35, %c96] : memref<16x1185xbf16, #tpu.memory_space<vmem>>, vector<16x1024xbf16>
    %c0_36 = arith.constant 0 : index
    %c1_37 = arith.constant 1 : index
    %c0_38 = arith.constant 0 : index
    %c0_39 = arith.constant 0 : index
    %53 = vector.load %arg3[%c0_36, %c1_37, %c0_38, %c0_39] : memref<3x3x8x16xbf16, #tpu.memory_space<vmem>>, vector<1x1x8x16xbf16>
    %54 = vector.shape_cast %53 : vector<1x1x8x16xbf16> to vector<8x16xbf16>
    %cst_40 = arith.constant dense<0.000000e+00> : vector<8x1024xf32>
    %55 = tpu.matmul %54, %52, %cst_40 {dimension_numbers = #tpu.dot_dimension_numbers<[1], [0], [0], [1], [0, 0, 1, 1], [], []>} : vector<8x16xbf16>, vector<16x1024xbf16>, vector<8x1024xf32> -> vector<8x1024xf32>
    %56 = arith.addf %51, %55 : vector<8x1024xf32>
    %c0_41 = arith.constant 0 : index
    %c128_42 = arith.constant 128 : index
    %57 = vector.load %arg6[%c0_41, %c128_42] : memref<16x1185xbf16, #tpu.memory_space<vmem>>, vector<16x1024xbf16>
    %c1_43 = arith.constant 1 : index
    %c1_44 = arith.constant 1 : index
    %c0_45 = arith.constant 0 : index
    %c0_46 = arith.constant 0 : index
    %58 = vector.load %arg3[%c1_43, %c1_44, %c0_45, %c0_46] : memref<3x3x8x16xbf16, #tpu.memory_space<vmem>>, vector<1x1x8x16xbf16>
    %59 = vector.shape_cast %58 : vector<1x1x8x16xbf16> to vector<8x16xbf16>
    %cst_47 = arith.constant dense<0.000000e+00> : vector<8x1024xf32>
    %60 = tpu.matmul %59, %57, %cst_47 {dimension_numbers = #tpu.dot_dimension_numbers<[1], [0], [0], [1], [0, 0, 1, 1], [], []>} : vector<8x16xbf16>, vector<16x1024xbf16>, vector<8x1024xf32> -> vector<8x1024xf32>
    %61 = arith.addf %56, %60 : vector<8x1024xf32>
    %c0_48 = arith.constant 0 : index
    %c160 = arith.constant 160 : index
    %62 = vector.load %arg6[%c0_48, %c160] : memref<16x1185xbf16, #tpu.memory_space<vmem>>, vector<16x1024xbf16>
    %c2_49 = arith.constant 2 : index
    %c1_50 = arith.constant 1 : index
    %c0_51 = arith.constant 0 : index
    %c0_52 = arith.constant 0 : index
    %63 = vector.load %arg3[%c2_49, %c1_50, %c0_51, %c0_52] : memref<3x3x8x16xbf16, #tpu.memory_space<vmem>>, vector<1x1x8x16xbf16>
    %64 = vector.shape_cast %63 : vector<1x1x8x16xbf16> to vector<8x16xbf16>
    %cst_53 = arith.constant dense<0.000000e+00> : vector<8x1024xf32>
    %65 = tpu.matmul %64, %62, %cst_53 {dimension_numbers = #tpu.dot_dimension_numbers<[1], [0], [0], [1], [0, 0, 1, 1], [], []>} : vector<8x16xbf16>, vector<16x1024xbf16>, vector<8x1024xf32> -> vector<8x1024xf32>
    %66 = arith.addf %61, %65 : vector<8x1024xf32>
    %67 = arith.addf %50, %66 : vector<8x1024xf32>
    %cst_54 = arith.constant 0.000000e+00 : f32
    %68 = vector.broadcast %cst_54 : f32 to vector<8x1024xf32>
    %c0_55 = arith.constant 0 : index
    %c97 = arith.constant 97 : index
    %69 = vector.load %arg6[%c0_55, %c97] : memref<16x1185xbf16, #tpu.memory_space<vmem>>, vector<16x1024xbf16>
    %c0_56 = arith.constant 0 : index
    %c2_57 = arith.constant 2 : index
    %c0_58 = arith.constant 0 : index
    %c0_59 = arith.constant 0 : index
    %70 = vector.load %arg3[%c0_56, %c2_57, %c0_58, %c0_59] : memref<3x3x8x16xbf16, #tpu.memory_space<vmem>>, vector<1x1x8x16xbf16>
    %71 = vector.shape_cast %70 : vector<1x1x8x16xbf16> to vector<8x16xbf16>
    %cst_60 = arith.constant dense<0.000000e+00> : vector<8x1024xf32>
    %72 = tpu.matmul %71, %69, %cst_60 {dimension_numbers = #tpu.dot_dimension_numbers<[1], [0], [0], [1], [0, 0, 1, 1], [], []>} : vector<8x16xbf16>, vector<16x1024xbf16>, vector<8x1024xf32> -> vector<8x1024xf32>
    %73 = arith.addf %68, %72 : vector<8x1024xf32>
    %c0_61 = arith.constant 0 : index
    %c129 = arith.constant 129 : index
    %74 = vector.load %arg6[%c0_61, %c129] : memref<16x1185xbf16, #tpu.memory_space<vmem>>, vector<16x1024xbf16>
    %c1_62 = arith.constant 1 : index
    %c2_63 = arith.constant 2 : index
    %c0_64 = arith.constant 0 : index
    %c0_65 = arith.constant 0 : index
    %75 = vector.load %arg3[%c1_62, %c2_63, %c0_64, %c0_65] : memref<3x3x8x16xbf16, #tpu.memory_space<vmem>>, vector<1x1x8x16xbf16>
    %76 = vector.shape_cast %75 : vector<1x1x8x16xbf16> to vector<8x16xbf16>
    %cst_66 = arith.constant dense<0.000000e+00> : vector<8x1024xf32>
    %77 = tpu.matmul %76, %74, %cst_66 {dimension_numbers = #tpu.dot_dimension_numbers<[1], [0], [0], [1], [0, 0, 1, 1], [], []>} : vector<8x16xbf16>, vector<16x1024xbf16>, vector<8x1024xf32> -> vector<8x1024xf32>
    %78 = arith.addf %73, %77 : vector<8x1024xf32>
    %c0_67 = arith.constant 0 : index
    %c161 = arith.constant 161 : index
    %79 = vector.load %arg6[%c0_67, %c161] : memref<16x1185xbf16, #tpu.memory_space<vmem>>, vector<16x1024xbf16>
    %c2_68 = arith.constant 2 : index
    %c2_69 = arith.constant 2 : index
    %c0_70 = arith.constant 0 : index
    %c0_71 = arith.constant 0 : index
    %80 = vector.load %arg3[%c2_68, %c2_69, %c0_70, %c0_71] : memref<3x3x8x16xbf16, #tpu.memory_space<vmem>>, vector<1x1x8x16xbf16>
    %81 = vector.shape_cast %80 : vector<1x1x8x16xbf16> to vector<8x16xbf16>
    %cst_72 = arith.constant dense<0.000000e+00> : vector<8x1024xf32>
    %82 = tpu.matmul %81, %79, %cst_72 {dimension_numbers = #tpu.dot_dimension_numbers<[1], [0], [0], [1], [0, 0, 1, 1], [], []>} : vector<8x16xbf16>, vector<16x1024xbf16>, vector<8x1024xf32> -> vector<8x1024xf32>
    %83 = arith.addf %78, %82 : vector<8x1024xf32>
    %c30_i32 = arith.constant 30 : i32
    %84 = vector.broadcast %c30_i32 : i32 to vector<1x1024xi32>
    %85 = arith.cmpi sle, %26, %84 : vector<1x1024xi32>
    %cst_73 = arith.constant 0.000000e+00 : f32
    %86 = vector.shape_cast %85 : vector<1x1024xi1> to vector<1x1024xi1>
    %87 = vector.broadcast %86 : vector<1x1024xi1> to vector<8x1024xi1>
    %88 = vector.broadcast %cst_73 : f32 to vector<8x1024xf32>
    %89 = arith.select %87, %83, %88 : vector<8x1024xi1>, vector<8x1024xf32>
    %90 = arith.addf %67, %89 : vector<8x1024xf32>
    %91 = arith.truncf %90 : vector<8x1024xf32> to vector<8x1024xbf16>
    %c0_74 = arith.constant 0 : index
    %c0_75 = arith.constant 0 : index
    %c0_76 = arith.constant 0 : index
    %92 = vector.load %arg4[%c0_74, %c0_75, %c0_76] : memref<1x8x1024xbf16, #tpu.memory_space<vmem>>, vector<1x8x1024xbf16>
    %93 = vector.shape_cast %92 : vector<1x8x1024xbf16> to vector<8x1024xbf16>
    %94 = vector.shape_cast %91 : vector<8x1024xbf16> to vector<1x8x1024xbf16>
    tpu.vector_store %arg4[%c0_74, %c0_75, %c0_76], %94 {strides = array<i32>} : memref<1x8x1024xbf16, #tpu.memory_space<vmem>>, vector<1x8x1024xbf16>,
    %95 = arith.extf %91 : vector<8x1024xbf16> to vector<8x1024xf32>
    %cst_77 = arith.constant dense<0.000000e+00> : vector<8xf32>
    %96 = vector.multi_reduction <add>, %95, %cst_77 [1] : vector<8x1024xf32> to vector<8xf32>
    %97 = vector.shape_cast %96 : vector<8xf32> to vector<8x1xf32>
    %98 = arith.mulf %95, %95 : vector<8x1024xf32>
    %cst_78 = arith.constant dense<0.000000e+00> : vector<8xf32>
    %99 = vector.multi_reduction <add>, %98, %cst_78 [1] : vector<8x1024xf32> to vector<8xf32>
    %100 = vector.shape_cast %99 : vector<8xf32> to vector<8x1xf32>
    %101 = tpu.concatenate %97, %100 in 1 : vector<8x1xf32>, vector<8x1xf32> -> vector<8x2xf32>
    %c0_79 = arith.constant 0 : index
    %c0_80 = arith.constant 0 : index
    %c0_81 = arith.constant 0 : index
    %102 = vector.load %arg5[%c0_79, %c0_80, %c0_81] : memref<1x8x2xf32, #tpu.memory_space<vmem>>, vector<1x8x2xf32>
    %103 = vector.shape_cast %102 : vector<1x8x2xf32> to vector<8x2xf32>
    %104 = vector.shape_cast %101 : vector<8x2xf32> to vector<1x8x2xf32>
    tpu.vector_store %arg5[%c0_79, %c0_80, %c0_81], %104 {strides = array<i32>} : memref<1x8x2xf32, #tpu.memory_space<vmem>>, vector<1x8x2xf32>,
    return
  }
  func.func @transform_0(%arg0: i32) -> (i32, i32, i32) {
    %c0_i32 = arith.constant 0 : i32
    %c0_i32_0 = arith.constant 0 : i32
    %c0_i32_1 = arith.constant 0 : i32
    return %arg0, %c0_i32, %c0_i32_0 : i32, i32, i32
  }
  func.func @transform_1(%arg0: i32) -> (i32, i32, i32) {
    %c0_i32 = arith.constant 0 : i32
    %c0_i32_0 = arith.constant 0 : i32
    %c0_i32_1 = arith.constant 0 : i32
    return %arg0, %c0_i32, %c0_i32_0 : i32, i32, i32
  }
  func.func @transform_2(%arg0: i32) -> (i32, i32, i32, i32) {
    %c0_i32 = arith.constant 0 : i32
    %c0_i32_0 = arith.constant 0 : i32
    %c0_i32_1 = arith.constant 0 : i32
    %c0_i32_2 = arith.constant 0 : i32
    %c0_i32_3 = arith.constant 0 : i32
    return %c0_i32, %c0_i32_0, %c0_i32_1, %c0_i32_2 : i32, i32, i32, i32
  }
  func.func @transform_3(%arg0: i32) -> (i32, i32, i32) {
    %c0_i32 = arith.constant 0 : i32
    %c0_i32_0 = arith.constant 0 : i32
    %c0_i32_1 = arith.constant 0 : i32
    return %arg0, %c0_i32, %c0_i32_0 : i32, i32, i32
  }
  func.func @transform_4(%arg0: i32) -> (i32, i32, i32) {
    %c0_i32 = arith.constant 0 : i32
    %c0_i32_0 = arith.constant 0 : i32
    %c0_i32_1 = arith.constant 0 : i32
    return %arg0, %c0_i32, %c0_i32_0 : i32, i32, i32
  }
}

module attributes {stable_mosaic.version = 11 : i64} {
  func.func @_conv3x3_norm_kernel(%arg0: i32, %arg1: memref<1x8x1024xbf16, #tpu.memory_space<vmem>>, %arg2: memref<2x8x1xf32, #tpu.memory_space<vmem>>, %arg3: memref<3x3x8x8xbf16, #tpu.memory_space<vmem>>, %arg4: memref<1x8x1024xbf16, #tpu.memory_space<vmem>>, %arg5: memref<1x8x2xf32, #tpu.memory_space<vmem>>, %arg6: memref<8x1185xbf16, #tpu.memory_space<vmem>>) attributes {dimension_semantics = [#tpu.dimension_semantics<parallel>], iteration_bounds = array<i64: 2>, scalar_prefetch = 0 : i64, scratch_operands = 1 : i64, tpu.core_type = #tpu.core_type<tc>, window_params = [{transform_indices = @transform_0, window_bounds = array<i64: 1, 8, 1024>}, {pipeline_mode = #tpu.pipeline_mode<synchronous>, transform_indices = @transform_1, window_bounds = array<i64: 2, 8, 1>}, {pipeline_mode = #tpu.pipeline_mode<synchronous>, transform_indices = @transform_2, window_bounds = array<i64: 3, 3, 8, 8>}, {transform_indices = @transform_3, window_bounds = array<i64: 1, 8, 1024>}, {transform_indices = @transform_4, window_bounds = array<i64: 1, 8, 2>}]} {
    %cst = arith.constant 0.000000e+00 : bf16
    %0 = vector.broadcast %cst : bf16 to vector<8x128xbf16>
    %c0 = arith.constant 0 : index
    %c0_0 = arith.constant 0 : index
    %1 = vector.load %arg6[%c0, %c0_0] : memref<8x1185xbf16, #tpu.memory_space<vmem>>, vector<8x128xbf16>
    tpu.vector_store %arg6[%c0, %c0_0], %0 {strides = array<i32>} : memref<8x1185xbf16, #tpu.memory_space<vmem>>, vector<8x128xbf16>,
    %cst_1 = arith.constant 0.000000e+00 : bf16
    %2 = vector.broadcast %cst_1 : bf16 to vector<8x33xbf16>
    %c0_2 = arith.constant 0 : index
    %c1152 = arith.constant 1152 : index
    %3 = vector.load %arg6[%c0_2, %c1152] : memref<8x1185xbf16, #tpu.memory_space<vmem>>, vector<8x33xbf16>
    tpu.vector_store %arg6[%c0_2, %c1152], %2 {strides = array<i32>} : memref<8x1185xbf16, #tpu.memory_space<vmem>>, vector<8x33xbf16>,
    %c0_3 = arith.constant 0 : index
    %c0_4 = arith.constant 0 : index
    %c0_5 = arith.constant 0 : index
    %4 = vector.load %arg1[%c0_3, %c0_4, %c0_5] : memref<1x8x1024xbf16, #tpu.memory_space<vmem>>, vector<1x8x1024xbf16>
    %5 = vector.shape_cast %4 : vector<1x8x1024xbf16> to vector<8x1024xbf16>
    %6 = arith.extf %5 : vector<8x1024xbf16> to vector<8x1024xf32>
    %c0_6 = arith.constant 0 : index
    %c0_7 = arith.constant 0 : index
    %c0_8 = arith.constant 0 : index
    %7 = vector.load %arg2[%c0_6, %c0_7, %c0_8] : memref<2x8x1xf32, #tpu.memory_space<vmem>>, vector<1x8x1xf32>
    %8 = vector.shape_cast %7 : vector<1x8x1xf32> to vector<8x1xf32>
    %9 = vector.broadcast %8 : vector<8x1xf32> to vector<8x1024xf32>
    %10 = arith.mulf %6, %9 : vector<8x1024xf32>
    %c1 = arith.constant 1 : index
    %c0_9 = arith.constant 0 : index
    %c0_10 = arith.constant 0 : index
    %11 = vector.load %arg2[%c1, %c0_9, %c0_10] : memref<2x8x1xf32, #tpu.memory_space<vmem>>, vector<1x8x1xf32>
    %12 = vector.shape_cast %11 : vector<1x8x1xf32> to vector<8x1xf32>
    %13 = vector.broadcast %12 : vector<8x1xf32> to vector<8x1024xf32>
    %14 = arith.addf %10, %13 : vector<8x1024xf32>
    %cst_11 = arith.constant 0.000000e+00 : f32
    %15 = vector.broadcast %cst_11 : f32 to vector<8x1024xf32>
    %16 = arith.maximumf %14, %15 : vector<8x1024xf32>
    %17 = arith.truncf %16 : vector<8x1024xf32> to vector<8x1024xbf16>
    %c0_12 = arith.constant 0 : index
    %c128 = arith.constant 128 : index
    %18 = vector.load %arg6[%c0_12, %c128] : memref<8x1185xbf16, #tpu.memory_space<vmem>>, vector<8x1024xbf16>
    tpu.vector_store %arg6[%c0_12, %c128], %17 {strides = array<i32>} : memref<8x1185xbf16, #tpu.memory_space<vmem>>, vector<8x1024xbf16>,
    %19 = tpu.iota {dimensions = array<i32: 1>} : vector<1x1024xi32>
    %c32_i32 = arith.constant 32 : i32
    %c0_i32 = arith.constant 0 : i32
    %20 = arith.cmpi eq, %c32_i32, %c0_i32 : i32
    %c1_i32 = arith.constant 1 : i32
    %21 = arith.select %20, %c1_i32, %c32_i32 : i32
    %22 = vector.broadcast %21 : i32 to vector<1x1024xi32>
    %23 = arith.remsi %19, %22 : vector<1x1024xi32>
    %c0_i32_13 = arith.constant 0 : i32
    %24 = vector.broadcast %c0_i32_13 : i32 to vector<1x1024xi32>
    %25 = arith.cmpi ne, %23, %24 : vector<1x1024xi32>
    %c0_i32_14 = arith.constant 0 : i32
    %26 = vector.broadcast %c0_i32_14 : i32 to vector<1x1024xi32>
    %27 = arith.cmpi slt, %23, %26 : vector<1x1024xi32>
    %c0_i32_15 = arith.constant 0 : i32
    %28 = arith.cmpi slt, %21, %c0_i32_15 : i32
    %29 = vector.broadcast %28 : i1 to vector<1x1024xi1>
    %30 = vector.broadcast %29 : vector<1x1024xi1> to vector<1x1024xi1>
    %31 = arith.xori %27, %30 : vector<1x1024xi1>
    %32 = arith.andi %31, %25 : vector<1x1024xi1>
    %33 = vector.broadcast %21 : i32 to vector<1x1024xi32>
    %34 = arith.addi %23, %33 : vector<1x1024xi32>
    %35 = arith.select %32, %34, %23 : vector<1x1024xi1>, vector<1x1024xi32>
    %cst_16 = arith.constant 0.000000e+00 : f32
    %36 = vector.broadcast %cst_16 : f32 to vector<8x1024xf32>
    %cst_17 = arith.constant 0.000000e+00 : f32
    %37 = vector.broadcast %cst_17 : f32 to vector<8x1024xf32>
    %c0_18 = arith.constant 0 : index
    %c95 = arith.constant 95 : index
    %38 = vector.load %arg6[%c0_18, %c95] : memref<8x1185xbf16, #tpu.memory_space<vmem>>, vector<8x1024xbf16>
    %c0_19 = arith.constant 0 : index
    %c0_20 = arith.constant 0 : index
    %c0_21 = arith.constant 0 : index
    %c0_22 = arith.constant 0 : index
    %39 = vector.load %arg3[%c0_19, %c0_20, %c0_21, %c0_22] : memref<3x3x8x8xbf16, #tpu.memory_space<vmem>>, vector<1x1x8x8xbf16>
    %40 = vector.shape_cast %39 : vector<1x1x8x8xbf16> to vector<8x8xbf16>
    %cst_23 = arith.constant dense<0.000000e+00> : vector<8x1024xf32>
    %41 = tpu.matmul %40, %38, %cst_23 {dimension_numbers = #tpu.dot_dimension_numbers<[1], [0], [0], [1], [0, 0, 1, 1], [], []>} : vector<8x8xbf16>, vector<8x1024xbf16>, vector<8x1024xf32> -> vector<8x1024xf32>
    %42 = arith.addf %37, %41 : vector<8x1024xf32>
    %c0_24 = arith.constant 0 : index
    %c127 = arith.constant 127 : index
    %43 = vector.load %arg6[%c0_24, %c127] : memref<8x1185xbf16, #tpu.memory_space<vmem>>, vector<8x1024xbf16>
    %c1_25 = arith.constant 1 : index
    %c0_26 = arith.constant 0 : index
    %c0_27 = arith.constant 0 : index
    %c0_28 = arith.constant 0 : index
    %44 = vector.load %arg3[%c1_25, %c0_26, %c0_27, %c0_28] : memref<3x3x8x8xbf16, #tpu.memory_space<vmem>>, vector<1x1x8x8xbf16>
    %45 = vector.shape_cast %44 : vector<1x1x8x8xbf16> to vector<8x8xbf16>
    %cst_29 = arith.constant dense<0.000000e+00> : vector<8x1024xf32>
    %46 = tpu.matmul %45, %43, %cst_29 {dimension_numbers = #tpu.dot_dimension_numbers<[1], [0], [0], [1], [0, 0, 1, 1], [], []>} : vector<8x8xbf16>, vector<8x1024xbf16>, vector<8x1024xf32> -> vector<8x1024xf32>
    %47 = arith.addf %42, %46 : vector<8x1024xf32>
    %c0_30 = arith.constant 0 : index
    %c159 = arith.constant 159 : index
    %48 = vector.load %arg6[%c0_30, %c159] : memref<8x1185xbf16, #tpu.memory_space<vmem>>, vector<8x1024xbf16>
    %c2 = arith.constant 2 : index
    %c0_31 = arith.constant 0 : index
    %c0_32 = arith.constant 0 : index
    %c0_33 = arith.constant 0 : index
    %49 = vector.load %arg3[%c2, %c0_31, %c0_32, %c0_33] : memref<3x3x8x8xbf16, #tpu.memory_space<vmem>>, vector<1x1x8x8xbf16>
    %50 = vector.shape_cast %49 : vector<1x1x8x8xbf16> to vector<8x8xbf16>
    %cst_34 = arith.constant dense<0.000000e+00> : vector<8x1024xf32>
    %51 = tpu.matmul %50, %48, %cst_34 {dimension_numbers = #tpu.dot_dimension_numbers<[1], [0], [0], [1], [0, 0, 1, 1], [], []>} : vector<8x8xbf16>, vector<8x1024xbf16>, vector<8x1024xf32> -> vector<8x1024xf32>
    %52 = arith.addf %47, %51 : vector<8x1024xf32>
    %c1_i32_35 = arith.constant 1 : i32
    %53 = vector.broadcast %c1_i32_35 : i32 to vector<1x1024xi32>
    %54 = arith.cmpi sge, %35, %53 : vector<1x1024xi32>
    %cst_36 = arith.constant 0.000000e+00 : f32
    %55 = vector.shape_cast %54 : vector<1x1024xi1> to vector<1x1024xi1>
    %56 = vector.broadcast %55 : vector<1x1024xi1> to vector<8x1024xi1>
    %57 = vector.broadcast %cst_36 : f32 to vector<8x1024xf32>
    %58 = arith.select %56, %52, %57 : vector<8x1024xi1>, vector<8x1024xf32>
    %59 = arith.addf %36, %58 : vector<8x1024xf32>
    %cst_37 = arith.constant 0.000000e+00 : f32
    %60 = vector.broadcast %cst_37 : f32 to vector<8x1024xf32>
    %c0_38 = arith.constant 0 : index
    %c96 = arith.constant 96 : index
    %61 = vector.load %arg6[%c0_38, %c96] : memref<8x1185xbf16, #tpu.memory_space<vmem>>, vector<8x1024xbf16>
    %c0_39 = arith.constant 0 : index
    %c1_40 = arith.constant 1 : index
    %c0_41 = arith.constant 0 : index
    %c0_42 = arith.constant 0 : index
    %62 = vector.load %arg3[%c0_39, %c1_40, %c0_41, %c0_42] : memref<3x3x8x8xbf16, #tpu.memory_space<vmem>>, vector<1x1x8x8xbf16>
    %63 = vector.shape_cast %62 : vector<1x1x8x8xbf16> to vector<8x8xbf16>
    %cst_43 = arith.constant dense<0.000000e+00> : vector<8x1024xf32>
    %64 = tpu.matmul %63, %61, %cst_43 {dimension_numbers = #tpu.dot_dimension_numbers<[1], [0], [0], [1], [0, 0, 1, 1], [], []>} : vector<8x8xbf16>, vector<8x1024xbf16>, vector<8x1024xf32> -> vector<8x1024xf32>
    %65 = arith.addf %60, %64 : vector<8x1024xf32>
    %c0_44 = arith.constant 0 : index
    %c128_45 = arith.constant 128 : index
    %66 = vector.load %arg6[%c0_44, %c128_45] : memref<8x1185xbf16, #tpu.memory_space<vmem>>, vector<8x1024xbf16>
    %c1_46 = arith.constant 1 : index
    %c1_47 = arith.constant 1 : index
    %c0_48 = arith.constant 0 : index
    %c0_49 = arith.constant 0 : index
    %67 = vector.load %arg3[%c1_46, %c1_47, %c0_48, %c0_49] : memref<3x3x8x8xbf16, #tpu.memory_space<vmem>>, vector<1x1x8x8xbf16>
    %68 = vector.shape_cast %67 : vector<1x1x8x8xbf16> to vector<8x8xbf16>
    %cst_50 = arith.constant dense<0.000000e+00> : vector<8x1024xf32>
    %69 = tpu.matmul %68, %66, %cst_50 {dimension_numbers = #tpu.dot_dimension_numbers<[1], [0], [0], [1], [0, 0, 1, 1], [], []>} : vector<8x8xbf16>, vector<8x1024xbf16>, vector<8x1024xf32> -> vector<8x1024xf32>
    %70 = arith.addf %65, %69 : vector<8x1024xf32>
    %c0_51 = arith.constant 0 : index
    %c160 = arith.constant 160 : index
    %71 = vector.load %arg6[%c0_51, %c160] : memref<8x1185xbf16, #tpu.memory_space<vmem>>, vector<8x1024xbf16>
    %c2_52 = arith.constant 2 : index
    %c1_53 = arith.constant 1 : index
    %c0_54 = arith.constant 0 : index
    %c0_55 = arith.constant 0 : index
    %72 = vector.load %arg3[%c2_52, %c1_53, %c0_54, %c0_55] : memref<3x3x8x8xbf16, #tpu.memory_space<vmem>>, vector<1x1x8x8xbf16>
    %73 = vector.shape_cast %72 : vector<1x1x8x8xbf16> to vector<8x8xbf16>
    %cst_56 = arith.constant dense<0.000000e+00> : vector<8x1024xf32>
    %74 = tpu.matmul %73, %71, %cst_56 {dimension_numbers = #tpu.dot_dimension_numbers<[1], [0], [0], [1], [0, 0, 1, 1], [], []>} : vector<8x8xbf16>, vector<8x1024xbf16>, vector<8x1024xf32> -> vector<8x1024xf32>
    %75 = arith.addf %70, %74 : vector<8x1024xf32>
    %76 = arith.addf %59, %75 : vector<8x1024xf32>
    %cst_57 = arith.constant 0.000000e+00 : f32
    %77 = vector.broadcast %cst_57 : f32 to vector<8x1024xf32>
    %c0_58 = arith.constant 0 : index
    %c97 = arith.constant 97 : index
    %78 = vector.load %arg6[%c0_58, %c97] : memref<8x1185xbf16, #tpu.memory_space<vmem>>, vector<8x1024xbf16>
    %c0_59 = arith.constant 0 : index
    %c2_60 = arith.constant 2 : index
    %c0_61 = arith.constant 0 : index
    %c0_62 = arith.constant 0 : index
    %79 = vector.load %arg3[%c0_59, %c2_60, %c0_61, %c0_62] : memref<3x3x8x8xbf16, #tpu.memory_space<vmem>>, vector<1x1x8x8xbf16>
    %80 = vector.shape_cast %79 : vector<1x1x8x8xbf16> to vector<8x8xbf16>
    %cst_63 = arith.constant dense<0.000000e+00> : vector<8x1024xf32>
    %81 = tpu.matmul %80, %78, %cst_63 {dimension_numbers = #tpu.dot_dimension_numbers<[1], [0], [0], [1], [0, 0, 1, 1], [], []>} : vector<8x8xbf16>, vector<8x1024xbf16>, vector<8x1024xf32> -> vector<8x1024xf32>
    %82 = arith.addf %77, %81 : vector<8x1024xf32>
    %c0_64 = arith.constant 0 : index
    %c129 = arith.constant 129 : index
    %83 = vector.load %arg6[%c0_64, %c129] : memref<8x1185xbf16, #tpu.memory_space<vmem>>, vector<8x1024xbf16>
    %c1_65 = arith.constant 1 : index
    %c2_66 = arith.constant 2 : index
    %c0_67 = arith.constant 0 : index
    %c0_68 = arith.constant 0 : index
    %84 = vector.load %arg3[%c1_65, %c2_66, %c0_67, %c0_68] : memref<3x3x8x8xbf16, #tpu.memory_space<vmem>>, vector<1x1x8x8xbf16>
    %85 = vector.shape_cast %84 : vector<1x1x8x8xbf16> to vector<8x8xbf16>
    %cst_69 = arith.constant dense<0.000000e+00> : vector<8x1024xf32>
    %86 = tpu.matmul %85, %83, %cst_69 {dimension_numbers = #tpu.dot_dimension_numbers<[1], [0], [0], [1], [0, 0, 1, 1], [], []>} : vector<8x8xbf16>, vector<8x1024xbf16>, vector<8x1024xf32> -> vector<8x1024xf32>
    %87 = arith.addf %82, %86 : vector<8x1024xf32>
    %c0_70 = arith.constant 0 : index
    %c161 = arith.constant 161 : index
    %88 = vector.load %arg6[%c0_70, %c161] : memref<8x1185xbf16, #tpu.memory_space<vmem>>, vector<8x1024xbf16>
    %c2_71 = arith.constant 2 : index
    %c2_72 = arith.constant 2 : index
    %c0_73 = arith.constant 0 : index
    %c0_74 = arith.constant 0 : index
    %89 = vector.load %arg3[%c2_71, %c2_72, %c0_73, %c0_74] : memref<3x3x8x8xbf16, #tpu.memory_space<vmem>>, vector<1x1x8x8xbf16>
    %90 = vector.shape_cast %89 : vector<1x1x8x8xbf16> to vector<8x8xbf16>
    %cst_75 = arith.constant dense<0.000000e+00> : vector<8x1024xf32>
    %91 = tpu.matmul %90, %88, %cst_75 {dimension_numbers = #tpu.dot_dimension_numbers<[1], [0], [0], [1], [0, 0, 1, 1], [], []>} : vector<8x8xbf16>, vector<8x1024xbf16>, vector<8x1024xf32> -> vector<8x1024xf32>
    %92 = arith.addf %87, %91 : vector<8x1024xf32>
    %c30_i32 = arith.constant 30 : i32
    %93 = vector.broadcast %c30_i32 : i32 to vector<1x1024xi32>
    %94 = arith.cmpi sle, %35, %93 : vector<1x1024xi32>
    %cst_76 = arith.constant 0.000000e+00 : f32
    %95 = vector.shape_cast %94 : vector<1x1024xi1> to vector<1x1024xi1>
    %96 = vector.broadcast %95 : vector<1x1024xi1> to vector<8x1024xi1>
    %97 = vector.broadcast %cst_76 : f32 to vector<8x1024xf32>
    %98 = arith.select %96, %92, %97 : vector<8x1024xi1>, vector<8x1024xf32>
    %99 = arith.addf %76, %98 : vector<8x1024xf32>
    %100 = arith.truncf %99 : vector<8x1024xf32> to vector<8x1024xbf16>
    %c0_77 = arith.constant 0 : index
    %c0_78 = arith.constant 0 : index
    %c0_79 = arith.constant 0 : index
    %101 = vector.load %arg4[%c0_77, %c0_78, %c0_79] : memref<1x8x1024xbf16, #tpu.memory_space<vmem>>, vector<1x8x1024xbf16>
    %102 = vector.shape_cast %101 : vector<1x8x1024xbf16> to vector<8x1024xbf16>
    %103 = vector.shape_cast %100 : vector<8x1024xbf16> to vector<1x8x1024xbf16>
    tpu.vector_store %arg4[%c0_77, %c0_78, %c0_79], %103 {strides = array<i32>} : memref<1x8x1024xbf16, #tpu.memory_space<vmem>>, vector<1x8x1024xbf16>,
    %104 = arith.extf %100 : vector<8x1024xbf16> to vector<8x1024xf32>
    %cst_80 = arith.constant dense<0.000000e+00> : vector<8xf32>
    %105 = vector.multi_reduction <add>, %104, %cst_80 [1] : vector<8x1024xf32> to vector<8xf32>
    %106 = vector.shape_cast %105 : vector<8xf32> to vector<8x1xf32>
    %107 = arith.mulf %104, %104 : vector<8x1024xf32>
    %cst_81 = arith.constant dense<0.000000e+00> : vector<8xf32>
    %108 = vector.multi_reduction <add>, %107, %cst_81 [1] : vector<8x1024xf32> to vector<8xf32>
    %109 = vector.shape_cast %108 : vector<8xf32> to vector<8x1xf32>
    %110 = tpu.concatenate %106, %109 in 1 : vector<8x1xf32>, vector<8x1xf32> -> vector<8x2xf32>
    %c0_82 = arith.constant 0 : index
    %c0_83 = arith.constant 0 : index
    %c0_84 = arith.constant 0 : index
    %111 = vector.load %arg5[%c0_82, %c0_83, %c0_84] : memref<1x8x2xf32, #tpu.memory_space<vmem>>, vector<1x8x2xf32>
    %112 = vector.shape_cast %111 : vector<1x8x2xf32> to vector<8x2xf32>
    %113 = vector.shape_cast %110 : vector<8x2xf32> to vector<1x8x2xf32>
    tpu.vector_store %arg5[%c0_82, %c0_83, %c0_84], %113 {strides = array<i32>} : memref<1x8x2xf32, #tpu.memory_space<vmem>>, vector<1x8x2xf32>,
    return
  }
  func.func @transform_0(%arg0: i32) -> (i32, i32, i32) {
    %c0_i32 = arith.constant 0 : i32
    %c0_i32_0 = arith.constant 0 : i32
    %c0_i32_1 = arith.constant 0 : i32
    return %arg0, %c0_i32, %c0_i32_0 : i32, i32, i32
  }
  func.func @transform_1(%arg0: i32) -> (i32, i32, i32) {
    %c0_i32 = arith.constant 0 : i32
    %c0_i32_0 = arith.constant 0 : i32
    %c0_i32_1 = arith.constant 0 : i32
    %c0_i32_2 = arith.constant 0 : i32
    return %c0_i32, %c0_i32_0, %c0_i32_1 : i32, i32, i32
  }
  func.func @transform_2(%arg0: i32) -> (i32, i32, i32, i32) {
    %c0_i32 = arith.constant 0 : i32
    %c0_i32_0 = arith.constant 0 : i32
    %c0_i32_1 = arith.constant 0 : i32
    %c0_i32_2 = arith.constant 0 : i32
    %c0_i32_3 = arith.constant 0 : i32
    return %c0_i32, %c0_i32_0, %c0_i32_1, %c0_i32_2 : i32, i32, i32, i32
  }
  func.func @transform_3(%arg0: i32) -> (i32, i32, i32) {
    %c0_i32 = arith.constant 0 : i32
    %c0_i32_0 = arith.constant 0 : i32
    %c0_i32_1 = arith.constant 0 : i32
    return %arg0, %c0_i32, %c0_i32_0 : i32, i32, i32
  }
  func.func @transform_4(%arg0: i32) -> (i32, i32, i32) {
    %c0_i32 = arith.constant 0 : i32
    %c0_i32_0 = arith.constant 0 : i32
    %c0_i32_1 = arith.constant 0 : i32
    return %arg0, %c0_i32, %c0_i32_0 : i32, i32, i32
  }
}

module attributes {stable_mosaic.version = 11 : i64} {
  func.func @_norm_relu_kernel(%arg0: i32, %arg1: memref<1x8x1024xbf16, #tpu.memory_space<vmem>>, %arg2: memref<2x8x1xf32, #tpu.memory_space<vmem>>, %arg3: memref<1x8x1024xf32, #tpu.memory_space<vmem>>) attributes {dimension_semantics = [#tpu.dimension_semantics<parallel>], iteration_bounds = array<i64: 2>, scalar_prefetch = 0 : i64, scratch_operands = 0 : i64, tpu.core_type = #tpu.core_type<tc>, window_params = [{transform_indices = @transform_0, window_bounds = array<i64: 1, 8, 1024>}, {pipeline_mode = #tpu.pipeline_mode<synchronous>, transform_indices = @transform_1, window_bounds = array<i64: 2, 8, 1>}, {transform_indices = @transform_2, window_bounds = array<i64: 1, 8, 1024>}]} {
    %c0 = arith.constant 0 : index
    %c0_0 = arith.constant 0 : index
    %c0_1 = arith.constant 0 : index
    %0 = vector.load %arg1[%c0, %c0_0, %c0_1] : memref<1x8x1024xbf16, #tpu.memory_space<vmem>>, vector<1x8x1024xbf16>
    %1 = vector.shape_cast %0 : vector<1x8x1024xbf16> to vector<8x1024xbf16>
    %2 = arith.extf %1 : vector<8x1024xbf16> to vector<8x1024xf32>
    %c0_2 = arith.constant 0 : index
    %c0_3 = arith.constant 0 : index
    %c0_4 = arith.constant 0 : index
    %3 = vector.load %arg2[%c0_2, %c0_3, %c0_4] : memref<2x8x1xf32, #tpu.memory_space<vmem>>, vector<1x8x1xf32>
    %4 = vector.shape_cast %3 : vector<1x8x1xf32> to vector<8x1xf32>
    %5 = vector.broadcast %4 : vector<8x1xf32> to vector<8x1024xf32>
    %6 = arith.mulf %2, %5 : vector<8x1024xf32>
    %c1 = arith.constant 1 : index
    %c0_5 = arith.constant 0 : index
    %c0_6 = arith.constant 0 : index
    %7 = vector.load %arg2[%c1, %c0_5, %c0_6] : memref<2x8x1xf32, #tpu.memory_space<vmem>>, vector<1x8x1xf32>
    %8 = vector.shape_cast %7 : vector<1x8x1xf32> to vector<8x1xf32>
    %9 = vector.broadcast %8 : vector<8x1xf32> to vector<8x1024xf32>
    %10 = arith.addf %6, %9 : vector<8x1024xf32>
    %cst = arith.constant 0.000000e+00 : f32
    %11 = vector.broadcast %cst : f32 to vector<8x1024xf32>
    %12 = arith.maximumf %10, %11 : vector<8x1024xf32>
    %c0_7 = arith.constant 0 : index
    %c0_8 = arith.constant 0 : index
    %c0_9 = arith.constant 0 : index
    %13 = vector.load %arg3[%c0_7, %c0_8, %c0_9] : memref<1x8x1024xf32, #tpu.memory_space<vmem>>, vector<1x8x1024xf32>
    %14 = vector.shape_cast %13 : vector<1x8x1024xf32> to vector<8x1024xf32>
    %15 = vector.shape_cast %12 : vector<8x1024xf32> to vector<1x8x1024xf32>
    tpu.vector_store %arg3[%c0_7, %c0_8, %c0_9], %15 {strides = array<i32>} : memref<1x8x1024xf32, #tpu.memory_space<vmem>>, vector<1x8x1024xf32>,
    return
  }
  func.func @transform_0(%arg0: i32) -> (i32, i32, i32) {
    %c0_i32 = arith.constant 0 : i32
    %c0_i32_0 = arith.constant 0 : i32
    %c0_i32_1 = arith.constant 0 : i32
    return %arg0, %c0_i32, %c0_i32_0 : i32, i32, i32
  }
  func.func @transform_1(%arg0: i32) -> (i32, i32, i32) {
    %c0_i32 = arith.constant 0 : i32
    %c0_i32_0 = arith.constant 0 : i32
    %c0_i32_1 = arith.constant 0 : i32
    %c0_i32_2 = arith.constant 0 : i32
    return %c0_i32, %c0_i32_0, %c0_i32_1 : i32, i32, i32
  }
  func.func @transform_2(%arg0: i32) -> (i32, i32, i32) {
    %c0_i32 = arith.constant 0 : i32
    %c0_i32_0 = arith.constant 0 : i32
    %c0_i32_1 = arith.constant 0 : i32
    return %arg0, %c0_i32, %c0_i32_0 : i32, i32, i32
  }
}

</mosaic_0001>

<bundles_post_ra>
// kernel: expanding_path_forward.7
= control target key start
LH: loop header
LB: loop body
LE: loop exit
PB: predicated region body
PF: predicated region fallthrough
CT: control target
= control target key end

     0   :  { %s742_s12 = smov 0   ;;  %s744_s13 = smov 0   ;;  %s823_s0 = inlined_call_operand.vmem [shape: bf16[2,32,64], index: 0, kind: input, shape index: {}]   ;;  %s824_s1 = inlined_call_operand.vmem [shape: bf16[2,2,16,32], index: 1, kind: input, shape index: {}]   ;;  %s825_s2 = inlined_call_operand.vmem [shape: f32[16,1], index: 2, kind: input, shape index: {}]   ;;  %s826_s3 = inlined_call_operand.vmem [shape: bf16[2,2,2,16,64], index: 3, kind: output, shape index: {}]  }
   0x1   :  { %s746_s14 = smov 0  }
   0x2 LB: > { %s25_s15 = sadd.s32 1, %s713_s13  ;;  %p570_p0 = scmp.ge.s32.totalorder %s717_s14, 1  ;;  %s717_s14 = sphi %s746_s14, %s13_s14   ;;  %s713_s13 = sphi %s744_s13, %s828_s13   ;;  %s709_s12 = sphi %s742_s12, %s827_s12  }
   0x3   : > { %p27_p1 = scmp.ge.s32.totalorder %s25_s15, 2  ;;  %p156_p2 = scmp.lt.s32.totalorder %s717_s14, 3 }
   0x5   : > { %s830_s15 = smov (%p27_p1, %s25_s15), 0  ;;  %p157_p3 = pnand %p570_p0, %p156_p2 }
   0x6   : > { %p186_p4 = scmp.lt.s32.totalorder (!%p157_p3), %s709_s12, 1  ;;  %v719_v0 = vmov (!%p157_p3), 0.0   ;;  %vm720_vm0 = vmmov (!%p157_p3), 0   ;;  %v207_v1 = vld [vmem:[%s825_s2] sm:$0xff] (!%p157_p3)  ;;  %v721_v2 = vmov (!%p157_p3), 0   ;;  %v208_v4 = vld [vmem:[%s825_s2 + $0x8] sm:$0xff] (!%p157_p3) }
   0x7   : > { %160 = sbr.rel (%p157_p3) target bundleno = 252 (0xfc), region = 32  ;;  %629 = vmatprep.subr.bf16.mxu0 (!%p157_p3), %v719_v0  ;;  %637 = vmatprep.subr.bf16.mxu1 (!%p157_p3), %v719_v0  ;;  %v691_v6 = vld [vmem:[%s824_s1] sm:$0xff] (!%p157_p3)   ;;  %v692_v7 = vld [vmem:[%s824_s1 + $0x8] sm:$0xff] (!%p157_p3)   ;;  %vm238_vm1 = vcmask (!%p157_p3), 261120   ;;  %v693_v8 = vld [vmem:[%s824_s1 + $0x10] sm:$0xff] (!%p157_p3)   ;;  %vm291_vm2 = vcmask (!%p157_p3), 519168  }
   0x8   : > { %633 = vmatprep.mubr.msk.bf16.mxu0 (!%p157_p3), %vm720_vm0, %v719_v0  ;;  %641 = vmatprep.mubr.msk.bf16.mxu1 (!%p157_p3), %vm720_vm0, %v719_v0  ;;  %v694_v9 = vld [vmem:[%s824_s1 + $0x18] sm:$0xff] (!%p157_p3)  }
   0x9   : > { %688 = vset.pattern.permute.xlu0 (!%p157_p3), %v721_v2 }
   0xa   : > { %213 = vperm.xlu0 (!%p157_p3), %688, %v207_v1  }
   0xe   : > { %s832_s12 = smov (!%p186_p4, %s709_s12), 1  ;;  %218 = vperm.xlu0 %688, %v208_v4  }
   0xf   : > { %s607_s16 = sshll.u32 %s832_s12, 4  ;;  %s608_s5 = sshll.u32 %s832_s12, 5 }
  0x10   : > { %s193_s21 = scalar_lea.vmem %s823_s0, %s607_s16  ;;  %s796_s8 = scalar_lea.vmem %s826_s3, %s608_s5 }
  0x11   : > { %v689_v3 = vld [vmem:[%s193_s21] sm:$0xff]   ;;  %v690_v5 = vld [vmem:[%s193_s21 + $0x8] sm:$0xff]  }
  0x12   : > { %630 = vmatpush3.bf16.msra.mxu0 %v689_v3  ;;  %638 = vmatpush3.bf16.msra.mxu1 %v689_v3 }
  0x13   : > { %631 = vmatprep.subr.bf16.mxu0 %v719_v0  ;;  %639 = vmatprep.subr.bf16.mxu1 %v719_v0 }
  0x16   : > { %632 = vmatpush3.bf16.msra.mxu0 %v690_v5  ;;  %640 = vmatpush3.bf16.msra.mxu1 %v690_v5 }
  0x17   : > { %645 = vmatprep.subr.bf16.mxu0 %v719_v0  ;;  %653 = vmatprep.subr.bf16.mxu1 %v719_v0 }
  0x19   : > { %634 = vmatmul.mubr.msk.bf16.vlgmr.msra.gmra.mrb[0].mxu0 %vm238_vm1, %v691_v6  ;;  %642 = vmatmul.mubr.msk.bf16.vlgmr.msra.gmra.mrb[0].mxu1 %vm238_vm1, %v692_v7 }
  0x1a   : > { %646 = vmatpush3.bf16.msra.mxu0 %v689_v3  ;;  %654 = vmatpush3.bf16.msra.mxu1 %v689_v3 }
  0x1b   : > { %647 = vmatprep.subr.bf16.mxu0 %v719_v0  ;;  %655 = vmatprep.subr.bf16.mxu1 %v719_v0 }
  0x1c   : > { %649 = vmatprep.mubr.msk.bf16.mxu0 %vm720_vm0, %v719_v0  ;;  %657 = vmatprep.mubr.msk.bf16.mxu1 %vm720_vm0, %v719_v0 }
  0x1e   : > { %648 = vmatpush3.bf16.msra.mxu0 %v690_v5  ;;  %656 = vmatpush3.bf16.msra.mxu1 %v690_v5 }
  0x21   : > { %650 = vmatmul.mubr.msk.bf16.vlgmr.msra.gmra.mrb[4].mxu0 %vm238_vm1, %v693_v8  ;;  %658 = vmatmul.mubr.msk.bf16.vlgmr.msra.gmra.mrb[4].mxu1 %vm238_vm1, %v694_v9 }
  0x89   : > { %v214_v10 = vpop.permute.xlu0 %213 }
  0x8d   : > { %v219_v11 = vpop.permute.xlu0 %218 }
  0xec   : > { %v276_v12 = vpop.f32.mrb[0].mxu0  ;;  %v339_v13 = vpop.f32.mrb[0].mxu1 }
  0xed   : > { %v277_v14 = vadd.f32 %v276_v12, %v214_v10  ;;  %v340_v15 = vadd.f32 %v339_v13, %v214_v10  ;;  %v635_v16 = vpop.f32.mrb[1].mxu0  ;;  %v643_v17 = vpop.f32.mrb[1].mxu1 }
  0xee   : > { %v279_v18 = vpop.f32.mrb[2].mxu0  ;;  %v342_v19 = vpop.f32.mrb[2].mxu1 }
  0xef   : > { %v609_v20 = vpack.c.bf16 %v277_v14, %v277_v14  ;;  %v611_v21 = vpack.c.bf16 %v340_v15, %v340_v15  ;;  %v280_v22 = vadd.f32 %v279_v18, %v219_v11  ;;  %v343_v23 = vadd.f32 %v342_v19, %v219_v11  ;;  %v636_v24 = vpop.f32.mrb[3].mxu0  ;;  %v644_v25 = vpop.f32.mrb[3].mxu1 }
  0xf1   : > { %292 = vst.msk [vmem:[%s796_s8] sm:$0xf] %vm291_vm2, %v609_v20  ;;  %587 = vst.msk [vmem:[%s796_s8 + $0x8] sm:$0xf] %vm291_vm2, %v611_v21  ;;  %v610_v26 = vpack.c.bf16 %v280_v22, %v280_v22  ;;  %v612_v27 = vpack.c.bf16 %v343_v23, %v343_v23 }
  0xf3   : > { %293 = vst.msk [vmem:[%s796_s8 + $0x4] sm:$0xf] %vm291_vm2, %v610_v26  ;;  %588 = vst.msk [vmem:[%s796_s8 + $0xc] sm:$0xf] %vm291_vm2, %v612_v27 }
  0xf4   : > { %v402_v28 = vpop.f32.mrb[4].mxu0  ;;  %v465_v29 = vpop.f32.mrb[4].mxu1 }
  0xf5   : > { %v403_v30 = vadd.f32 %v402_v28, %v214_v10  ;;  %v466_v31 = vadd.f32 %v465_v29, %v214_v10  ;;  %v651_v32 = vpop.f32.mrb[5].mxu0  ;;  %v659_v33 = vpop.f32.mrb[5].mxu1 }
  0xf6   : > { %v405_v34 = vpop.f32.mrb[6].mxu0  ;;  %v468_v35 = vpop.f32.mrb[6].mxu1 }
  0xf7   : > { %v613_v36 = vpack.c.bf16 %v403_v30, %v403_v30  ;;  %v615_v37 = vpack.c.bf16 %v466_v31, %v466_v31  ;;  %v406_v38 = vadd.f32 %v405_v34, %v219_v11  ;;  %v469_v39 = vadd.f32 %v468_v35, %v219_v11  ;;  %v652_v40 = vpop.f32.mrb[7].mxu0  ;;  %v660_v41 = vpop.f32.mrb[7].mxu1 }
  0xf9   : > { %595 = vst.msk [vmem:[%s796_s8 + $0x10] sm:$0xf] %vm291_vm2, %v613_v36  ;;  %603 = vst.msk [vmem:[%s796_s8 + $0x18] sm:$0xf] %vm291_vm2, %v615_v37  ;;  %v614_v42 = vpack.c.bf16 %v406_v38, %v406_v38  ;;  %v616_v43 = vpack.c.bf16 %v469_v39, %v469_v39 }
  0xfb   : > { %596 = vst.msk [vmem:[%s796_s8 + $0x14] sm:$0xf] %vm291_vm2, %v614_v42  ;;  %604 = vst.msk [vmem:[%s796_s8 + $0x1c] sm:$0xf] %vm291_vm2, %v616_v43 }
  0xfc PF: > { %s13_s14 = sadd.s32 1, %s717_s14   ;;  %s827_s12 = smov %s713_s13 }
  0xfd   : > { %p10_p5 = scmp.ge.s32.totalorder %s13_s14, 4   ;;  %s828_s13 = smov %s830_s15 }
  0xff   :  { %12 = sbr.rel (!%p10_p5) target bundleno = 2 (0x2), region = 68 }

// kernel: expanding_path_forward.10
= control target key start
LH: loop header
LB: loop body
LE: loop exit
PB: predicated region body
PF: predicated region fallthrough
CT: control target
= control target key end

     0   :  { %s709_s15 = smov 0   ;;  %s711_s16 = smov 0   ;;  %s773_s0 = inlined_call_operand.vmem [shape: bf16[2,16,256], index: 0, kind: input, shape index: {}]   ;;  %s774_s1 = inlined_call_operand.vmem [shape: f32[2,16,1], index: 1, kind: input, shape index: {}]   ;;  %s775_s2 = inlined_call_operand.vmem [shape: bf16[2,2,8,16], index: 2, kind: input, shape index: {}]   ;;  %s776_s3 = inlined_call_operand.vmem [shape: f32[8,1], index: 3, kind: input, shape index: {}]   ;;  %s777_s4 = inlined_call_operand.vmem [shape: bf16[2,2,2,8,256], index: 4, kind: output, shape index: {}]  }
   0x1   :  { %s713_s17 = smov 0  }
   0x2 LB: > { %s26_s18 = sadd.s32 1, %s677_s16  ;;  %p603_p0 = scmp.ge.s32.totalorder %s681_s17, 1  ;;  %s681_s17 = sphi %s713_s17, %s14_s17   ;;  %s677_s16 = sphi %s711_s16, %s779_s16   ;;  %s673_s15 = sphi %s709_s15, %s778_s15  }
   0x3   : > { %p28_p1 = scmp.ge.s32.totalorder %s26_s18, 2  ;;  %p183_p2 = scmp.lt.s32.totalorder %s681_s17, 3 }
   0x5   : > { %s781_s18 = smov (%p28_p1, %s26_s18), 0  ;;  %p184_p3 = pnand %p603_p0, %p183_p2 }
   0x6   : > { %v608_v0 = vld [vmem:[%s774_s1 + $0x10] sm:$0xff] (!%p184_p3)  ;;  %v244_v1 = vld [vmem:[%s774_s1] sm:$0xff] (!%p184_p3)  ;;  %v683_v2 = vmov (!%p184_p3), 0   ;;  %v609_v3 = vld [vmem:[%s774_s1 + $0x18] sm:$0xff] (!%p184_p3)  ;;  %p218_p4 = scmp.lt.s32.totalorder (!%p184_p3), %s673_s15, 1  ;;  %vm290_vm0 = vcmask (!%p184_p3), 130048  }
   0x7   : > { %187 = sbr.rel (%p184_p3) target bundleno = 378 (0x17a), region = 36  ;;  %658 = vset.pattern.permute.xlu1 (!%p184_p3), %v683_v2  ;;  %657 = vset.pattern.permute.xlu0 (!%p184_p3), %v683_v2  ;;  %v245_v4 = vld [vmem:[%s774_s1 + $0x8] sm:$0xff] (!%p184_p3)  ;;  %v283_v5 = vld [vmem:[%s776_s3] sm:$0xff] (!%p184_p3) }
   0x8   : > { %265 = vperm.xlu1 (!%p184_p3), %658, %v608_v0   ;;  %248 = vperm.xlu0 (!%p184_p3), %657, %v244_v1   ;;  %v284_v30 = vld [vmem:[%s775_s2] sm:$0xf] (!%p184_p3)  ;;  %v612_v31 = vld [vmem:[%s775_s2 + $0x4] sm:$0xf] (!%p184_p3)  ;;  %v616_v32 = vld [vmem:[%s775_s2 + $0x8] sm:$0xf] (!%p184_p3) }
   0x9   : > { %326 = vmatprep.mubr.bf16.mxu0 (!%p184_p3), %v683_v2  ;;  %381 = vmatprep.mubr.bf16.mxu1 (!%p184_p3), %v683_v2  ;;  %v620_v33 = vld [vmem:[%s775_s2 + $0xc] sm:$0xf] (!%p184_p3) }
   0xc   : > { %270 = vperm.xlu1 (!%p184_p3), %658, %v609_v3   ;;  %253 = vperm.xlu0 (!%p184_p3), %657, %v245_v4  }
   0xe   : > { %s783_s15 = smov (!%p218_p4, %s673_s15), 1 }
   0xf   : > { %s626_s29 = sshll.u32 %s783_s15, 4  ;;  %s627_s19 = sshll.u32 %s783_s15, 5 }
  0x10   : > { %287 = vperm.xlu0 %657, %v283_v5   ;;  %s225_s6 = scalar_lea.vmem %s773_s0, %s626_s29  ;;  %s235_s22 = scalar_lea.vmem %s777_s4, %s627_s19 }
  0x11   : > { %v238_v6 = vld [vmem:[%s225_s6] sm:$0xff]  ;;  %v239_v9 = vld [vmem:[%s225_s6 + $0x8] sm:$0xff] }
  0x12   : > { %v240_v7 = vunpack.c.l.bf16 %v238_v6  ;;  %v241_v8 = vunpack.c.h.bf16 %v238_v6  ;;  %v242_v14 = vunpack.c.l.bf16 %v239_v9  ;;  %v243_v15 = vunpack.c.h.bf16 %v239_v9 }
  0x87   : > { %v266_v10 = vpop.permute.xlu1 %265  ;;  %v249_v11 = vpop.permute.xlu0 %248 }
  0x88   : > { %v256_v12 = vmul.f32 %v249_v11, %v240_v7  ;;  %v257_v13 = vmul.f32 %v249_v11, %v241_v8 }
  0x8a   : > { %v273_v17 = vadd.f32 %v266_v10, %v256_v12  ;;  %v274_v18 = vadd.f32 %v266_v10, %v257_v13 }
  0x8b   : > { %v254_v16 = vpop.permute.xlu0 %253  ;;  %v271_v21 = vpop.permute.xlu1 %270 }
  0x8c   : > { %v258_v19 = vmul.f32 %v254_v16, %v242_v14  ;;  %v259_v20 = vmul.f32 %v254_v16, %v243_v15  ;;  %v277_v24 = vmax.f32 %v273_v17, 0.0  ;;  %v278_v25 = vmax.f32 %v274_v18, 0.0 }
  0x8e   : > { %v275_v22 = vadd.f32 %v271_v21, %v258_v19  ;;  %v276_v23 = vadd.f32 %v271_v21, %v259_v20 }
  0x8f   : > { %v288_v34 = vpop.permute.xlu0 %287 }
  0x90   : > { %v279_v26 = vmax.f32 %v275_v22, 0.0  ;;  %v280_v27 = vmax.f32 %v276_v23, 0.0 }
  0x92   : > { %v281_v28 = vpack.c.bf16 %v279_v26, %v277_v24  ;;  %v282_v29 = vpack.c.bf16 %v280_v27, %v278_v25 }
  0x94   : > { %294 = vmatprep.subr.bf16.mxu0 %v282_v29  ;;  %349 = vmatprep.subr.bf16.mxu1 %v282_v29 }
  0x95   : > { %295 = vmatpush1.bf16.msra.mxu0 %v281_v28  ;;  %350 = vmatpush1.bf16.msra.mxu1 %v281_v28 }
  0x96   : > { %405 = vmatprep.subr.bf16.mxu0 %v282_v29  ;;  %461 = vmatprep.subr.bf16.mxu1 %v282_v29 }
  0x98   : > { %610 = vmatmul.mubr.msk.bf16.vlgmr.msra.gmra.mrb[0].mxu0 %vm290_vm0, %v284_v30  ;;  %613 = vmatmul.mubr.msk.bf16.vlgmr.msra.gmra.mrb[0].mxu1 %vm290_vm0, %v612_v31 }
  0x99   : > { %406 = vmatpush1.bf16.msra.mxu0 %v281_v28  ;;  %462 = vmatpush1.bf16.msra.mxu1 %v281_v28 }
  0x9a   : > { %437 = vmatprep.mubr.bf16.mxu0 %v683_v2  ;;  %493 = vmatprep.mubr.bf16.mxu1 %v683_v2 }
  0xa0   : > { %617 = vmatmul.mubr.msk.bf16.vlgmr.msra.gmra.mrb[4].mxu0 %vm290_vm0, %v616_v32  ;;  %621 = vmatmul.mubr.msk.bf16.vlgmr.msra.gmra.mrb[4].mxu1 %vm290_vm0, %v620_v33 }
 0x16b   : > { %v328_v35 = vpop.f32.mrb[0].mxu0  ;;  %v383_v36 = vpop.f32.mrb[0].mxu1 }
 0x16c   : > { %v329_v37 = vadd.f32 %v328_v35, %v288_v34  ;;  %v384_v38 = vadd.f32 %v383_v36, %v288_v34  ;;  %v330_v39 = vpop.f32.mrb[1].mxu0  ;;  %v385_v40 = vpop.f32.mrb[1].mxu1 }
 0x16d   : > { %v331_v41 = vadd.f32 %v330_v39, %v288_v34  ;;  %v386_v42 = vadd.f32 %v385_v40, %v288_v34  ;;  %v332_v43 = vpop.f32.mrb[2].mxu0  ;;  %v387_v44 = vpop.f32.mrb[2].mxu1 }
 0x16e   : > { %v333_v45 = vpop.f32.mrb[3].mxu0  ;;  %v388_v46 = vpop.f32.mrb[3].mxu1 }
 0x16f   : > { %v628_v47 = vpack.c.bf16 %v331_v41, %v329_v37  ;;  %v629_v48 = vpack.c.bf16 %v386_v42, %v384_v38 }
 0x171   : > { %343 = vst [vmem:[%s235_s22] sm:$0xff] %v628_v47  ;;  %615 = vst [vmem:[%s235_s22 + $0x8] sm:$0xff] %v629_v48 }
 0x173   : > { %v439_v49 = vpop.f32.mrb[4].mxu0  ;;  %v495_v50 = vpop.f32.mrb[4].mxu1 }
 0x174   : > { %v440_v51 = vadd.f32 %v439_v49, %v288_v34  ;;  %v496_v52 = vadd.f32 %v495_v50, %v288_v34  ;;  %v441_v53 = vpop.f32.mrb[5].mxu0  ;;  %v497_v54 = vpop.f32.mrb[5].mxu1 }
 0x175   : > { %v442_v55 = vadd.f32 %v441_v53, %v288_v34  ;;  %v498_v56 = vadd.f32 %v497_v54, %v288_v34  ;;  %v443_v57 = vpop.f32.mrb[6].mxu0  ;;  %v499_v58 = vpop.f32.mrb[6].mxu1 }
 0x176   : > { %v444_v59 = vpop.f32.mrb[7].mxu0  ;;  %v500_v60 = vpop.f32.mrb[7].mxu1 }
 0x177   : > { %v630_v61 = vpack.c.bf16 %v442_v55, %v440_v51  ;;  %v631_v62 = vpack.c.bf16 %v498_v56, %v496_v52 }
 0x179   : > { %619 = vst [vmem:[%s235_s22 + $0x10] sm:$0xff] %v630_v61  ;;  %623 = vst [vmem:[%s235_s22 + $0x18] sm:$0xff] %v631_v62 }
 0x17a PF: > { %s14_s17 = sadd.s32 1, %s681_s17   ;;  %s778_s15 = smov %s677_s16 }
 0x17b   : > { %p11_p5 = scmp.ge.s32.totalorder %s14_s17, 4   ;;  %s779_s16 = smov %s781_s18 }
 0x17d   :  { %13 = sbr.rel (!%p11_p5) target bundleno = 2 (0x2), region = 73 }

// kernel: expanding_path_forward.8
= control target key start
LH: loop header
LB: loop body
LE: loop exit
PB: predicated region body
PF: predicated region fallthrough
CT: control target
= control target key end

     0   :  { %s1332_s15 = smov 0   ;;  %s1492_s0 = inlined_call_operand.vmem [shape: bf16[2,16,256], index: 0, kind: input, shape index: {}]   ;;  %s1493_s1 = inlined_call_operand.vmem [shape: bf16[2,16,256], index: 1, kind: input, shape index: {}]   ;;  %s1494_s2 = inlined_call_operand.vmem [shape: bf16[3,3,16,32], index: 2, kind: input, shape index: {}]   ;;  %s1495_s3 = inlined_call_operand.vmem [shape: bf16[2,16,256], index: 3, kind: output, shape index: {0}]   ;;  %s1496_s4 = inlined_call_operand.vmem [shape: f32[2,16,2], index: 4, kind: output, shape index: {1}]  }
   0x1 LB: > { %s1154_s16 = sadd.s32 4294967295, %s1296_s15   ;;  %p1158_p0 = scmp.ge.s32.totalorder %s1296_s15, 1  ;;  %s1296_s15 = sphi %s1332_s15, %s15_s15  }
   0x2   : > { %p175_p1 = scmp.lt.s32.totalorder %s1296_s15, 3 }
   0x4   : > { %p176_p2 = pnand %p1158_p0, %p175_p1 }
   0x5   : > { %vm234_vm0 = vcmask (!%p176_p2), 138240   ;;  %p211_p3 = scmp.lt.s32.totalorder (!%p176_p2), %s1154_s16, 1  ;;  %v1298_v0 = vmov (!%p176_p2), 0   ;;  %s1299_s17 = smov (!%p176_p2), 17   ;;  %vm326_vm1 = vcmask (!%p176_p2), 7168   ;;  %v1281_v23 = vld [vmem:[%s1494_s2] sm:$0xff] (!%p176_p2)  }
   0x6   : > { %179 = sbr.rel (%p176_p2) target bundleno = 598 (0x256), region = 32  ;;  %235 = vst.msk [vmem:[#allocation2 + $0x18] sm:$0xff] (!%p176_p2), %vm234_vm0, %v1298_v0  ;;  %236 = vst.msk [vmem:[#allocation2 + $0x38] sm:$0xff] (!%p176_p2), %vm234_vm0, %v1298_v0  ;;  %443 = vmatprep.mubr.bf16.mxu0 (!%p176_p2), %v1298_v0  ;;  %371 = vmatprep.mubr.bf16.mxu1 (!%p176_p2), %v1298_v0  ;;  %s1300_s25 = smov (!%p176_p2), 1   ;;  %vm335_vm2 = vcmask (!%p176_p2), 261120   ;;  %vm486_vm3 = vcmask (!%p176_p2), 924672  }
   0x7   : > { %1257 = vrot.lane.b32.xlu1 (!%p176_p2), %v1298_v0, %s1299_s17  ;;  %s1301_s26 = smov (!%p176_p2), 113   ;;  %s1302_s27 = smov (!%p176_p2), 127   ;;  %v1283_v40 = vld [vmem:[%s1494_s2 + $0x18] sm:$0xff] (!%p176_p2)   ;;  %vm794_vm4 = vcmask (!%p176_p2), 1039360   ;;  %v1282_v45 = vld [vmem:[%s1494_s2 + $0x30] sm:$0xff] (!%p176_p2)   ;;  %v1284_v49 = vld [vmem:[%s1494_s2 + $0x20] sm:$0xff] (!%p176_p2)  }
   0x8   : > { %s1303_s28 = smov (!%p176_p2), 16   ;;  %s1304_s29 = smov (!%p176_p2), 15   ;;  %vm633_vm5 = vcmask (!%p176_p2), 130048   ;;  %v1285_v57 = vld [vmem:[%s1494_s2 + $0x28] sm:$0xff] (!%p176_p2)   ;;  %vm866_vm6 = vcmask (!%p176_p2), 121856   ;;  %vm708_vm7 = vcmask (!%p176_p2), 916480  }
   0x9   : > { %s1305_s30 = smov (!%p176_p2), 112   ;;  %s1306_s5 = smov (!%p176_p2), 111   ;;  %vm941_vm8 = vcmask (!%p176_p2), 908288   ;;  %vm1051_vm13 = vcmask (!%p176_p2), 15360  }
   0xb   : > { %1262 = vrot.lane.b32.xlu1 (!%p176_p2), %v1298_v0, %s1300_s25 }
   0xd   : > { %s1498_s16 = smov (!%p211_p3, %s1154_s16), 1  ;;  %v456_v4 = vld [vmem:[#allocation2 + $0x18] sm:$0xff] }
   0xe   : > { %s1347_s18 = sshll.u32 %s1498_s16, 4  ;;  %v459_v8 = vld [vmem:[#allocation2 + $0x38] sm:$0xff] }
   0xf   : > { %s215_s21 = scalar_lea.vmem %s1492_s0, %s1347_s18  ;;  %s220_s24 = scalar_lea.vmem %s1493_s1, %s1347_s18  ;;  %478 = vrot.lane.b32.xlu1 %v456_v4, %s1301_s26 }
  0x10   : > { %v237_v1 = vld [vmem:[%s215_s21] sm:$0xff]  ;;  %v238_v2 = vld [vmem:[%s215_s21 + $0x8] sm:$0xff] }
  0x11   : > { %v1358_v3 = vld [vmem:[%s215_s21] ss:$8 sps:$4 sm:$0xff]   ;;  %v1360_v5 = vcombine.high %v237_v1, %v238_v2  ;;  %v1365_v7 = vld [vmem:[%s220_s24 + $0x4] ss:$8 sps:$4 sm:$0xff]  }
  0x12   : > { %389 = vrot.lane.b32.xlu0 %v1358_v3, %s1299_s17  ;;  %v1363_v6 = vld [vmem:[%s220_s24] ss:$8 sps:$4 sm:$0xff]  }
  0x13   : > { %395 = vrot.lane.b32.xlu1 %v1363_v6, %s1299_s17 }
  0x16   : > { %391 = vrot.lane.b32.xlu0 %v1360_v5, %s1299_s17 }
  0x17   : > { %316 = vrot.lane.b32.xlu1 %v1358_v3, %s1300_s25 }
  0x1a   : > { %397 = vrot.lane.b32.xlu0 %v1365_v7, %s1299_s17 }
  0x1b   : > { %322 = vrot.lane.b32.xlu1 %v1363_v6, %s1300_s25 }
  0x1e   : > { %318 = vrot.lane.b32.xlu0 %v1360_v5, %s1300_s25 }
  0x1f   : > { %482 = vrot.lane.b32.xlu1 %v1365_v7, %s1301_s26 }
  0x22   : > { %476 = vrot.lane.b32.xlu0 %v1360_v5, %s1301_s26 }
  0x23   : > { %480 = vrot.lane.b32.xlu1 %v1363_v6, %s1301_s26 }
  0x26   : > { %474 = vrot.lane.b32.xlu0 %v1358_v3, %s1301_s26 }
  0x27   : > { %786 = vrot.lane.b32.xlu1 %v456_v4, %s1302_s27 }
  0x2a   : > { %324 = vrot.lane.b32.xlu0 %v1365_v7, %s1300_s25 }
  0x2b   : > { %790 = vrot.lane.b32.xlu1 %v1365_v7, %s1302_s27 }
  0x2e   : > { %484 = vrot.lane.b32.xlu0 %v459_v8, %s1301_s26 }
  0x2f   : > { %788 = vrot.lane.b32.xlu1 %v1363_v6, %s1302_s27 }
  0x32   : > { %784 = vrot.lane.b32.xlu0 %v1360_v5, %s1302_s27 }
  0x33   : > { %625 = vrot.lane.b32.xlu1 %v1360_v5, %s1303_s28 }
  0x36   : > { %782 = vrot.lane.b32.xlu0 %v1358_v3, %s1302_s27 }
  0x37   : > { %856 = vrot.lane.b32.xlu1 %v1358_v3, %s1304_s29 }
  0x3a   : > { %792 = vrot.lane.b32.xlu0 %v459_v8, %s1302_s27 }
  0x3b   : > { %1272 = vrot.lane.b32.xlu1 %v1298_v0, %s1304_s29 }
  0x3e   : > { %623 = vrot.lane.b32.xlu0 %v1358_v3, %s1303_s28 }
  0x3f   : > { %631 = vrot.lane.b32.xlu1 %v1365_v7, %s1303_s28 }
  0x42   : > { %1267 = vrot.lane.b32.xlu0 %v1298_v0, %s1303_s28 }
  0x43   : > { %864 = vrot.lane.b32.xlu1 %v1365_v7, %s1304_s29 }
  0x46   : > { %858 = vrot.lane.b32.xlu0 %v1360_v5, %s1304_s29 }
  0x47   : > { %700 = vrot.lane.b32.xlu1 %v456_v4, %s1305_s30 }
  0x4a   : > { %629 = vrot.lane.b32.xlu0 %v1363_v6, %s1303_s28  ;;  %s225_s28 = scalar_lea.vmem %s1495_s3, %s1347_s18 }
  0x4b   : > { %931 = vrot.lane.b32.xlu1 %v1360_v5, %s1306_s5 }
  0x4e   : > { %862 = vrot.lane.b32.xlu0 %v1363_v6, %s1304_s29 }
  0x4f   : > { %929 = vrot.lane.b32.xlu1 %v1358_v3, %s1306_s5 }
  0x52   : > { %698 = vrot.lane.b32.xlu0 %v1360_v5, %s1305_s30 }
  0x53   : > { %706 = vrot.lane.b32.xlu1 %v459_v8, %s1305_s30 }
  0x56   : > { %696 = vrot.lane.b32.xlu0 %v1358_v3, %s1305_s30 }
  0x57   : > { %937 = vrot.lane.b32.xlu1 %v1365_v7, %s1306_s5 }
  0x5a   : > { %933 = vrot.lane.b32.xlu0 %v456_v4, %s1306_s5 }
  0x5b   : > { %935 = vrot.lane.b32.xlu1 %v1363_v6, %s1306_s5 }
  0x5e   : > { %704 = vrot.lane.b32.xlu0 %v1365_v7, %s1305_s30 }
  0x62   : > { %702 = vrot.lane.b32.xlu0 %v1363_v6, %s1305_s30 }
  0x66   : > { %939 = vrot.lane.b32.xlu0 %v459_v8, %s1306_s5  ;;  %s230_s5 = scalar_lea.vmem %s1496_s4, %s1347_s18 }
  0x79   : > { %v1258_v9 = vpop.permute.xlu1 %1257 }
  0x7a   : > { %v1259_v12 = vunpack.i.l.bf16 %v1258_v9  ;;  %v1260_v18 = vunpack.i.h.bf16 %v1258_v9 }
  0x7d   : > { %v1263_v10 = vpop.permute.xlu1 %1262 }
  0x7e   : > { %v1264_v24 = vunpack.i.l.bf16 %v1263_v10  ;;  %v1265_v35 = vunpack.i.h.bf16 %v1263_v10 }
  0x81   : > { %v479_v13 = vpop.permute.xlu1 %478 }
  0x84   : > { %v390_v11 = vpop.permute.xlu0 %389 }
  0x85   : > { %v396_v16 = vpop.permute.xlu1 %395  ;;  %v400_v17 = vsel %vm234_vm0, %v1259_v12, %v390_v11  ;;  %v1286_v12 = vld [vmem:[%s1494_s2 + $0x8] sm:$0xff]  }
  0x86   : > { %v402_v22 = vsel %vm234_vm0, %v1260_v18, %v396_v16  ;;  %v1287_v18 = vld [vmem:[%s1494_s2 + $0x10] sm:$0xff]  }
  0x88   : > { %v392_v14 = vpop.permute.xlu0 %391 }
  0x89   : > { %v401_v15 = vsel %vm234_vm0, %v390_v11, %v392_v14  ;;  %v317_v21 = vpop.permute.xlu1 %316 }
  0x8a   : > { %411 = vmatprep.subr.bf16.mxu0 %v401_v15  ;;  %v327_v28 = vsel %vm326_vm1, %v1264_v24, %v317_v21 }
  0x8b   : > { %412 = vmatpush1.bf16.msra.mxu0 %v400_v17 }
  0x8c   : > { %v398_v19 = vpop.permute.xlu0 %397 }
  0x8d   : > { %v403_v20 = vsel %vm234_vm0, %v396_v16, %v398_v19  ;;  %v323_v27 = vpop.permute.xlu1 %322 }
  0x8e   : > { %413 = vmatprep.subr.bf16.mxu0 %v403_v20  ;;  %v329_v39 = vsel %vm326_vm1, %v1265_v35, %v323_v27 }
  0x8f   : > { %414 = vmatpush1.bf16.msra.mxu0 %v402_v22 }
  0x90   : > { %v319_v25 = vpop.permute.xlu0 %318 }
  0x91   : > { %v328_v26 = vsel %vm326_vm1, %v317_v21, %v319_v25  ;;  %v483_v31 = vpop.permute.xlu1 %482 }
  0x92   : > { %339 = vmatprep.subr.bf16.mxu1 %v328_v26  ;;  %1176 = vmatmul.mubr.msk.bf16.vlgmr.msra.gmra.mrb[0].mxu0 %vm335_vm2, %v1281_v23 }
  0x93   : > { %340 = vmatpush1.bf16.msra.mxu1 %v327_v28  ;;  %530 = vmatprep.mubr.bf16.mxu0 %v1298_v0 }
  0x94   : > { %v477_v29 = vpop.permute.xlu0 %476 }
  0x95   : > { %v488_v30 = vsel %vm486_vm3, %v477_v29, %v479_v13  ;;  %v481_v34 = vpop.permute.xlu1 %480 }
  0x96   : > { %498 = vmatprep.subr.bf16.mxu0 %v488_v30  ;;  %v489_v43 = vsel %vm486_vm3, %v481_v34, %v483_v31 }
  0x98   : > { %v475_v32 = vpop.permute.xlu0 %474 }
  0x99   : > { %v487_v33 = vsel %vm486_vm3, %v475_v32, %v477_v29  ;;  %v787_v38 = vpop.permute.xlu1 %786  ;;  %v1288_v32 = vld [vmem:[%s1494_s2 + $0x38] sm:$0xff]  }
  0x9a   : > { %499 = vmatpush1.bf16.msra.mxu0 %v487_v33 }
  0x9c   : > { %v325_v36 = vpop.permute.xlu0 %324 }
  0x9d   : > { %v330_v37 = vsel %vm326_vm1, %v323_v27, %v325_v36  ;;  %v791_v44 = vpop.permute.xlu1 %790 }
  0x9e   : > { %341 = vmatprep.subr.bf16.mxu1 %v330_v37  ;;  %v1289_v37 = vld [vmem:[%s1494_s2 + $0x40] sm:$0xff]  }
  0x9f   : > { %342 = vmatpush1.bf16.msra.mxu1 %v329_v39 }
  0xa0   : > { %v485_v41 = vpop.permute.xlu0 %484  ;;  %573 = vmatprep.subr.bf16.mxu1 %v1360_v5 }
  0xa1   : > { %v490_v42 = vsel %vm486_vm3, %v483_v31, %v485_v41  ;;  %v789_v48 = vpop.permute.xlu1 %788 }
  0xa2   : > { %500 = vmatprep.subr.bf16.mxu0 %v490_v42  ;;  %1174 = vmatmul.mubr.msk.bf16.vlgmr.msra.gmra.mrb[0].mxu1 %vm335_vm2, %v1283_v40  ;;  %v797_v55 = vsel %vm794_vm4, %v789_v48, %v791_v44 }
  0xa3   : > { %501 = vmatpush1.bf16.msra.mxu0 %v489_v43  ;;  %574 = vmatpush1.bf16.msra.mxu1 %v1358_v3 }
  0xa4   : > { %v785_v46 = vpop.permute.xlu0 %784  ;;  %575 = vmatprep.subr.bf16.mxu1 %v1365_v7  ;;  %605 = vmatprep.mubr.bf16.mxu1 %v1298_v0 }
  0xa5   : > { %v796_v47 = vsel %vm794_vm4, %v785_v46, %v787_v38  ;;  %v626_v52 = vpop.permute.xlu1 %625 }
  0xa6   : > { %806 = vmatprep.subr.bf16.mxu0 %v796_v47  ;;  %1180 = vmatmul.mubr.msk.bf16.vlgmr.msra.gmra.mrb[0].mxu0 %vm335_vm2, %v1282_v45 }
  0xa7   : > { %576 = vmatpush1.bf16.msra.mxu1 %v1363_v6  ;;  %838 = vmatprep.mubr.bf16.mxu0 %v1298_v0 }
  0xa8   : > { %v783_v50 = vpop.permute.xlu0 %782 }
  0xa9   : > { %v795_v51 = vsel %vm794_vm4, %v783_v50, %v785_v46  ;;  %v857_v56 = vpop.permute.xlu1 %856  ;;  %v265_v50 = vlaneseq }
  0xaa   : > { %807 = vmatpush1.bf16.msra.mxu0 %v795_v51  ;;  %1186 = vmatmul.mubr.msk.bf16.vlgmr.msra.gmra.mrb[4].mxu1 %vm335_vm2, %v1284_v49 }
  0xab   : > { %677 = vmatprep.mubr.bf16.mxu1 %v1298_v0  ;;  %v266_v51 = vand.u32 127, %v265_v50 }
  0xac   : > { %v793_v53 = vpop.permute.xlu0 %792 }
  0xad   : > { %v798_v54 = vsel %vm794_vm4, %v791_v44, %v793_v53  ;;  %v1273_v60 = vpop.permute.xlu1 %1272  ;;  %v272_v53 = vand.u32 15, %v266_v51 }
  0xae   : > { %808 = vmatprep.subr.bf16.mxu0 %v798_v54  ;;  %v1274_v63 = vunpack.i.l.bf16 %v1273_v60  ;;  %v1275_v13 = vunpack.i.h.bf16 %v1273_v60 }
  0xaf   : > { %809 = vmatpush1.bf16.msra.mxu0 %v797_v55  ;;  %vm545_vm9 = vcmp.ge.s32.totalorder %v272_v53, 1  ;;  %vm1000_vm11 = vcmp.le.s32.totalorder %v272_v53, 14 }
  0xb0   : > { %v624_v58 = vpop.permute.xlu0 %623  ;;  %v867_v5 = vsel %vm866_vm6, %v1274_v63, %v857_v56 }
  0xb1   : > { %v635_v59 = vsel %vm633_vm5, %v624_v58, %v626_v52  ;;  %v632_v1 = vpop.permute.xlu1 %631  ;;  %v267_v52 = vadd.s32 128, %v266_v51 }
  0xb2   : > { %645 = vmatprep.subr.bf16.mxu1 %v635_v59  ;;  %1198 = vmatmul.mubr.msk.bf16.vlgmr.msra.gmra.mrb[4].mxu0 %vm335_vm2, %v1285_v57 }
  0xb3   : > { %910 = vmatprep.mubr.bf16.mxu0 %v1298_v0  ;;  %v279_v54 = vand.u32 15, %v267_v52 }
  0xb4   : > { %v1268_v61 = vpop.permute.xlu0 %1267 }
  0xb5   : > { %v1269_v62 = vunpack.i.l.bf16 %v1268_v61  ;;  %v865_v6 = vpop.permute.xlu1 %864  ;;  %v1270_v7 = vunpack.i.h.bf16 %v1268_v61  ;;  %vm546_vm10 = vcmp.ge.s32.totalorder %v279_v54, 1  ;;  %vm1001_vm12 = vcmp.le.s32.totalorder %v279_v54, 14 }
  0xb7   : > { %v634_v2 = vsel %vm633_vm5, %v1269_v62, %v624_v58 }
  0xb8   : > { %v859_v3 = vpop.permute.xlu0 %858  ;;  %646 = vmatpush1.bf16.msra.mxu1 %v634_v2 }
  0xb9   : > { %v868_v4 = vsel %vm866_vm6, %v857_v56, %v859_v3  ;;  %v701_v11 = vpop.permute.xlu1 %700 }
  0xba   : > { %878 = vmatprep.subr.bf16.mxu0 %v868_v4 }
  0xbb   : > { %879 = vmatpush1.bf16.msra.mxu0 %v867_v5 }
  0xbc   : > { %v630_v8 = vpop.permute.xlu0 %629 }
  0xbd   : > { %v636_v9 = vsel %vm633_vm5, %v1270_v7, %v630_v8  ;;  %v637_v10 = vsel %vm633_vm5, %v630_v8, %v632_v1  ;;  %v932_v17 = vpop.permute.xlu1 %931 }
  0xbe   : > { %647 = vmatprep.subr.bf16.mxu1 %v637_v10 }
  0xbf   : > { %648 = vmatpush1.bf16.msra.mxu1 %v636_v9 }
  0xc0   : > { %v863_v14 = vpop.permute.xlu0 %862 }
  0xc1   : > { %v869_v15 = vsel %vm866_vm6, %v1275_v13, %v863_v14  ;;  %v870_v16 = vsel %vm866_vm6, %v863_v14, %v865_v6  ;;  %v930_v21 = vpop.permute.xlu1 %929 }
  0xc2   : > { %880 = vmatprep.subr.bf16.mxu0 %v870_v16  ;;  %1188 = vmatmul.mubr.msk.bf16.vlgmr.msra.gmra.mrb[4].mxu1 %vm335_vm2, %v1286_v12  ;;  %v942_v27 = vsel %vm941_vm8, %v930_v21, %v932_v17 }
  0xc3   : > { %881 = vmatpush1.bf16.msra.mxu0 %v869_v15  ;;  %752 = vmatprep.mubr.bf16.mxu1 %v1298_v0 }
  0xc4   : > { %v699_v19 = vpop.permute.xlu0 %698 }
  0xc5   : > { %v710_v20 = vsel %vm708_vm7, %v699_v19, %v701_v11  ;;  %v707_v24 = vpop.permute.xlu1 %706 }
  0xc6   : > { %720 = vmatprep.subr.bf16.mxu1 %v710_v20  ;;  %1200 = vmatmul.mubr.msk.bf16.vlgmr.msra.gmra.mrb[4].mxu0 %vm335_vm2, %v1287_v18 }
  0xc7   : > { %985 = vmatprep.mubr.bf16.mxu0 %v1298_v0 }
  0xc8   : > { %v697_v22 = vpop.permute.xlu0 %696 }
  0xc9   : > { %v709_v23 = vsel %vm708_vm7, %v697_v22, %v699_v19  ;;  %v938_v29 = vpop.permute.xlu1 %937 }
  0xca   : > { %721 = vmatpush1.bf16.msra.mxu1 %v709_v23 }
  0xcc   : > { %v934_v25 = vpop.permute.xlu0 %933 }
  0xcd   : > { %v943_v26 = vsel %vm941_vm8, %v932_v17, %v934_v25  ;;  %v936_v33 = vpop.permute.xlu1 %935 }
  0xce   : > { %953 = vmatprep.subr.bf16.mxu0 %v943_v26  ;;  %v944_v36 = vsel %vm941_vm8, %v936_v33, %v938_v29 }
  0xcf   : > { %954 = vmatpush1.bf16.msra.mxu0 %v942_v27 }
  0xd0   : > { %v705_v28 = vpop.permute.xlu0 %704 }
  0xd1   : > { %v712_v30 = vsel %vm708_vm7, %v705_v28, %v707_v24 }
  0xd2   : > { %722 = vmatprep.subr.bf16.mxu1 %v712_v30 }
  0xd4   : > { %v703_v31 = vpop.permute.xlu0 %702 }
  0xd5   : > { %v711_v0 = vsel %vm708_vm7, %v703_v31, %v705_v28 }
  0xd6   : > { %723 = vmatpush1.bf16.msra.mxu1 %v711_v0 }
  0xd8   : > { %v940_v34 = vpop.permute.xlu0 %939 }
  0xd9   : > { %1192 = vmatmul.mubr.msk.bf16.vlgmr.msra.gmra.mrb[4].mxu1 %vm335_vm2, %v1288_v32  ;;  %v945_v35 = vsel %vm941_vm8, %v938_v29, %v940_v34 }
  0xda   : > { %955 = vmatprep.subr.bf16.mxu0 %v945_v35 }
  0xdb   : > { %956 = vmatpush1.bf16.msra.mxu0 %v944_v36 }
  0xde   : > { %1204 = vmatmul.mubr.msk.bf16.vlgmr.msra.gmra.mrb[4].mxu0 %vm335_vm2, %v1289_v37 }
 0x175   : > { %v373_v38 = vpop.f32.mrb[0].mxu1 }
 0x176   : > { %v375_v39 = vpop.f32.mrb[1].mxu1 }
 0x177   : > { %v377_v40 = vpop.f32.mrb[2].mxu1 }
 0x178   : > { %v379_v41 = vpop.f32.mrb[3].mxu1 }
 0x179   : > { %v532_v42 = vpop.f32.mrb[0].mxu0 }
 0x17a   : > { %v1215_v43 = vadd.f32 %v532_v42, %v373_v38  ;;  %v534_v44 = vpop.f32.mrb[1].mxu0 }
 0x17b   : > { %v1216_v45 = vadd.f32 %v534_v44, %v375_v39  ;;  %v536_v46 = vpop.f32.mrb[2].mxu0 }
 0x17c   : > { %v1217_v47 = vadd.f32 %v536_v46, %v377_v40  ;;  %v538_v48 = vpop.f32.mrb[3].mxu0  ;;  %v551_v55 = vsel %vm545_vm9, %v1215_v43, 0.0 }
 0x17d   : > { %v1218_v49 = vadd.f32 %v538_v48, %v379_v41  ;;  %v552_v58 = vsel %vm546_vm10, %v1216_v45, 0.0 }
 0x17e   : > { %v553_v61 = vsel %vm545_vm9, %v1217_v47, 0.0 }
 0x17f   : > { %v554_v1 = vsel %vm546_vm10, %v1218_v49, 0.0 }
 0x1ac   : > { %v754_v56 = vpop.f32.mrb[4].mxu1 }
 0x1ad   : > { %v767_v57 = vadd.f32 %v754_v56, %v551_v55  ;;  %v756_v59 = vpop.f32.mrb[5].mxu1 }
 0x1ae   : > { %v768_v60 = vadd.f32 %v756_v59, %v552_v58  ;;  %v758_v62 = vpop.f32.mrb[6].mxu1 }
 0x1af   : > { %v769_v63 = vadd.f32 %v758_v62, %v553_v61  ;;  %v760_v2 = vpop.f32.mrb[7].mxu1 }
 0x1b0   : > { %v770_v3 = vadd.f32 %v760_v2, %v554_v1 }
 0x1b1   : > { %v987_v4 = vpop.f32.mrb[4].mxu0 }
 0x1b2   : > { %v1006_v5 = vsel %vm1000_vm11, %v987_v4, 0.0  ;;  %v989_v6 = vpop.f32.mrb[5].mxu0 }
 0x1b3   : > { %v1010_v7 = vadd.f32 %v1006_v5, %v767_v57  ;;  %v1007_v8 = vsel %vm1001_vm12, %v989_v6, 0.0  ;;  %v991_v9 = vpop.f32.mrb[6].mxu0 }
 0x1b4   : > { %v1011_v10 = vadd.f32 %v1007_v8, %v768_v60  ;;  %v1008_v11 = vsel %vm1000_vm11, %v991_v9, 0.0  ;;  %v993_v12 = vpop.f32.mrb[7].mxu0 }
 0x1b5   : > { %v1012_v13 = vadd.f32 %v1008_v11, %v769_v63  ;;  %v1009_v14 = vsel %vm1001_vm12, %v993_v12, 0.0 }
 0x1b6   : > { %v1213_v15 = vpack.c.bf16 %v1011_v10, %v1010_v7  ;;  %v1013_v16 = vadd.f32 %v1009_v14, %v770_v3 }
 0x1b7   : > { %v1014_v17 = vpack.c.bf16 %v1012_v13, %v1010_v7 }
 0x1b8   : > { %1026 = vst [vmem:[%s225_s28] sm:$0xff] %v1213_v15  ;;  %v1015_v18 = vpack.c.bf16 %v1013_v16, %v1011_v10  ;;  %v1214_v19 = vpack.c.bf16 %v1013_v16, %v1012_v13 }
 0x1b9   : > { %v1030_v20 = vunpack.c.h.bf16 %v1014_v17  ;;  %v1028_v21 = vunpack.c.l.bf16 %v1014_v17 }
 0x1ba   : > { %1027 = vst [vmem:[%s225_s28 + $0x8] sm:$0xff] %v1214_v19  ;;  %v1031_v22 = vunpack.c.h.bf16 %v1015_v18  ;;  %v1029_v23 = vunpack.c.l.bf16 %v1015_v18 }
 0x1bb   : > { %v1038_v24 = vmul.f32 %v1028_v21, %v1028_v21  ;;  %v1040_v25 = vmul.f32 %v1030_v20, %v1030_v20 }
 0x1bc   : > { %v1035_v26 = vadd.f32 %v1031_v22, %v1030_v20  ;;  %v1032_v27 = vadd.f32 %v1029_v23, %v1028_v21  ;;  %v1039_v28 = vmul.f32 %v1029_v23, %v1029_v23  ;;  %v1041_v29 = vmul.f32 %v1031_v22, %v1031_v22 }
 0x1be   : > { %1036 = vadd.xlane.f32.xlu1 %v1035_v26  ;;  %1033 = vadd.xlane.f32.xlu0 %v1032_v27  ;;  %v1042_v30 = vadd.f32 %v1039_v28, %v1038_v24  ;;  %v1045_v31 = vadd.f32 %v1041_v29, %v1040_v25 }
 0x1c2   : > { %1043 = vadd.xlane.f32.xlu0 %v1042_v30 }
 0x1c6   : > { %1046 = vadd.xlane.f32.xlu0 %v1045_v31 }
 0x24b   : > { %v1034_v0 = vpop.xlane.xlu0 %1033  ;;  %v1037_v34 = vpop.xlane.xlu1 %1036 }
 0x24f   : > { %v1044_v32 = vpop.xlane.xlu0 %1043 }
 0x250   : > { %v1049_v33 = vsel %vm326_vm1, %v1034_v0, %v1044_v32 }
 0x251   : > { %1052 = vst.msk [vmem:[%s230_s5] sm:$0xff] %vm1051_vm13, %v1049_v33 }
 0x253   : > { %v1047_v35 = vpop.xlane.xlu0 %1046 }
 0x254   : > { %v1050_v36 = vsel %vm326_vm1, %v1037_v34, %v1047_v35 }
 0x255   : > { %1053 = vst.msk [vmem:[%s230_s5 + $0x8] sm:$0xff] %vm1051_vm13, %v1050_v36 }
 0x256 PF: > { %s15_s15 = sadd.s32 1, %s1296_s15  }
 0x257   : > { %p12_p4 = scmp.ge.s32.totalorder %s15_s15, 4  }
 0x259   :  { %14 = sbr.rel (!%p12_p4) target bundleno = 1 (0x1), region = 85 }

// kernel: expanding_path_forward.9
= control target key start
LH: loop header
LB: loop body
LE: loop exit
PB: predicated region body
PF: predicated region fallthrough
CT: control target
= control target key end

     0   :  { %s1197_s15 = smov 0   ;;  %s1295_s0 = inlined_call_operand.vmem [shape: bf16[2,16,256], index: 0, kind: input, shape index: {}]   ;;  %s1296_s1 = inlined_call_operand.vmem [shape: f32[2,16,1], index: 1, kind: input, shape index: {}]   ;;  %s1297_s2 = inlined_call_operand.vmem [shape: bf16[3,3,16,16], index: 2, kind: input, shape index: {}]   ;;  %s1298_s3 = inlined_call_operand.vmem [shape: bf16[2,16,256], index: 3, kind: output, shape index: {0}]   ;;  %s1299_s4 = inlined_call_operand.vmem [shape: f32[2,16,2], index: 4, kind: output, shape index: {1}]  }
   0x1 LB: > { %s1047_s16 = sadd.s32 4294967295, %s1161_s15   ;;  %p1051_p0 = scmp.ge.s32.totalorder %s1161_s15, 1  ;;  %s1161_s15 = sphi %s1197_s15, %s15_s15  }
   0x2   : > { %p165_p1 = scmp.lt.s32.totalorder %s1161_s15, 3 }
   0x4   : > { %p166_p2 = pnand %p1051_p0, %p165_p1 }
   0x5   : > { %v1058_v0 = vld [vmem:[%s1296_s1 + $0x10] sm:$0xff] (!%p166_p2)  ;;  %v221_v1 = vld [vmem:[%s1296_s1] sm:$0xff] (!%p166_p2)  ;;  %v1163_v2 = vmov (!%p166_p2), 0   ;;  %v1059_v3 = vld [vmem:[%s1296_s1 + $0x18] sm:$0xff] (!%p166_p2)  ;;  %vm213_vm0 = vcmask (!%p166_p2), 138240   ;;  %p196_p3 = scmp.lt.s32.totalorder (!%p166_p2), %s1047_s16, 1 }
   0x6   : > { %169 = sbr.rel (%p166_p2) target bundleno = 690 (0x2b2), region = 32  ;;  %1145 = vset.pattern.permute.xlu1 (!%p166_p2), %v1163_v2  ;;  %1144 = vset.pattern.permute.xlu0 (!%p166_p2), %v1163_v2  ;;  %v222_v4 = vld [vmem:[%s1296_s1 + $0x8] sm:$0xff] (!%p166_p2)  ;;  %214 = vst.msk [vmem:[#allocation2 + $0x18] sm:$0xff] (!%p166_p2), %vm213_vm0, %v1163_v2  ;;  %s1164_s29 = smov (!%p166_p2), 17   ;;  %v1146_v36 = vld [vmem:[%s1297_s2] sm:$0xff] (!%p166_p2)   ;;  %vm316_vm1 = vcmask (!%p166_p2), 130048  }
   0x7   : > { %242 = vperm.xlu1 (!%p166_p2), %1145, %v1058_v0   ;;  %225 = vperm.xlu0 (!%p166_p2), %1144, %v221_v1   ;;  %s1165_s30 = smov (!%p166_p2), 1   ;;  %s1166_s5 = smov (!%p166_p2), 113   ;;  %vm311_vm2 = vcmask (!%p166_p2), 7168   ;;  %v1147_v41 = vld [vmem:[%s1297_s2 + $0x18] sm:$0xff] (!%p166_p2)   ;;  %vm445_vm3 = vcmask (!%p166_p2), 924672   ;;  %v1148_v48 = vld [vmem:[%s1297_s2 + $0x30] sm:$0xff] (!%p166_p2)  }
   0x8   : > { %414 = vmatprep.mubr.bf16.mxu0 (!%p166_p2), %v1163_v2  ;;  %352 = vmatprep.mubr.bf16.mxu1 (!%p166_p2), %v1163_v2  ;;  %s1167_s6 = smov (!%p166_p2), 127   ;;  %s1168_s7 = smov (!%p166_p2), 16   ;;  %vm723_vm4 = vcmask (!%p166_p2), 1039360   ;;  %v1149_v49 = vld [vmem:[%s1297_s2 + $0x20] sm:$0xff] (!%p166_p2)   ;;  %v1150_v56 = vld [vmem:[%s1297_s2 + $0x28] sm:$0xff] (!%p166_p2)   ;;  %vm785_vm5 = vcmask (!%p166_p2), 121856  }
   0x9   : > { %s1169_s8 = smov (!%p166_p2), 15   ;;  %s1170_s9 = smov (!%p166_p2), 112   ;;  %v1151_v61 = vld [vmem:[%s1297_s2 + $0x8] sm:$0xff] (!%p166_p2)   ;;  %vm647_vm6 = vcmask (!%p166_p2), 916480   ;;  %vm850_vm7 = vcmask (!%p166_p2), 908288   ;;  %vm956_vm12 = vcmask (!%p166_p2), 15360  }
   0xa   : > { %s1171_s10 = smov (!%p166_p2), 111  }
   0xb   : > { %247 = vperm.xlu1 (!%p166_p2), %1145, %v1059_v3   ;;  %230 = vperm.xlu0 (!%p166_p2), %1144, %v222_v4  }
   0xd   : > { %s1301_s16 = smov (!%p196_p3, %s1047_s16), 1  ;;  %v427_v29 = vld [vmem:[#allocation2 + $0x18] sm:$0xff] }
   0xe   : > { %s1223_s25 = sshll.u32 %s1301_s16, 4 }
   0xf   : > { %s200_s28 = scalar_lea.vmem %s1295_s0, %s1223_s25 }
  0x10   : > { %v215_v5 = vld [vmem:[%s200_s28] sm:$0xff]  ;;  %v216_v8 = vld [vmem:[%s200_s28 + $0x8] sm:$0xff] }
  0x11   : > { %v217_v6 = vunpack.c.l.bf16 %v215_v5  ;;  %v218_v7 = vunpack.c.h.bf16 %v215_v5  ;;  %v219_v13 = vunpack.c.l.bf16 %v216_v8  ;;  %v220_v14 = vunpack.c.h.bf16 %v216_v8 }
  0x86   : > { %v243_v9 = vpop.permute.xlu1 %242  ;;  %v226_v10 = vpop.permute.xlu0 %225 }
  0x87   : > { %v233_v11 = vmul.f32 %v226_v10, %v217_v6  ;;  %v234_v12 = vmul.f32 %v226_v10, %v218_v7  ;;  %v1152_v6 = vld [vmem:[%s1297_s2 + $0x10] sm:$0xff]   ;;  %v1153_v10 = vld [vmem:[%s1297_s2 + $0x38] sm:$0xff]  }
  0x89   : > { %v250_v16 = vadd.f32 %v243_v9, %v233_v11  ;;  %v251_v17 = vadd.f32 %v243_v9, %v234_v12 }
  0x8a   : > { %v231_v15 = vpop.permute.xlu0 %230  ;;  %v248_v20 = vpop.permute.xlu1 %247 }
  0x8b   : > { %v235_v18 = vmul.f32 %v231_v15, %v219_v13  ;;  %v236_v19 = vmul.f32 %v231_v15, %v220_v14  ;;  %v254_v23 = vmax.f32 %v250_v16, 0.0  ;;  %v255_v24 = vmax.f32 %v251_v17, 0.0  ;;  %v1154_v15 = vld [vmem:[%s1297_s2 + $0x40] sm:$0xff]  }
  0x8d   : > { %v252_v21 = vadd.f32 %v248_v20, %v235_v18  ;;  %v253_v22 = vadd.f32 %v248_v20, %v236_v19 }
  0x8f   : > { %v256_v25 = vmax.f32 %v252_v21, 0.0  ;;  %v257_v26 = vmax.f32 %v253_v22, 0.0 }
  0x91   : > { %v258_v27 = vpack.c.bf16 %v256_v25, %v254_v23  ;;  %v259_v28 = vpack.c.bf16 %v257_v26, %v255_v24 }
  0x93   : > { %372 = vrot.lane.b32.xlu1 %v259_v28, %s1164_s29  ;;  %370 = vrot.lane.b32.xlu0 %v258_v27, %s1164_s29 }
  0x97   : > { %305 = vrot.lane.b32.xlu1 %v1163_v2, %s1165_s30  ;;  %368 = vrot.lane.b32.xlu0 %v1163_v2, %s1164_s29 }
  0x9b   : > { %307 = vrot.lane.b32.xlu1 %v258_v27, %s1165_s30  ;;  %309 = vrot.lane.b32.xlu0 %v259_v28, %s1165_s30 }
  0x9f   : > { %443 = vrot.lane.b32.xlu1 %v427_v29, %s1166_s5  ;;  %441 = vrot.lane.b32.xlu0 %v259_v28, %s1166_s5 }
  0xa3   : > { %719 = vrot.lane.b32.xlu1 %v259_v28, %s1167_s6  ;;  %439 = vrot.lane.b32.xlu0 %v258_v27, %s1166_s5 }
  0xa7   : > { %717 = vrot.lane.b32.xlu1 %v258_v27, %s1167_s6  ;;  %721 = vrot.lane.b32.xlu0 %v427_v29, %s1167_s6 }
  0xab   : > { %580 = vrot.lane.b32.xlu1 %v259_v28, %s1168_s7  ;;  %576 = vrot.lane.b32.xlu0 %v1163_v2, %s1168_s7 }
  0xaf   : > { %781 = vrot.lane.b32.xlu1 %v258_v27, %s1169_s8  ;;  %578 = vrot.lane.b32.xlu0 %v258_v27, %s1168_s7  ;;  %s205_s7 = scalar_lea.vmem %s1298_s3, %s1223_s25 }
  0xb3   : > { %779 = vrot.lane.b32.xlu1 %v1163_v2, %s1169_s8  ;;  %783 = vrot.lane.b32.xlu0 %v259_v28, %s1169_s8 }
  0xb7   : > { %645 = vrot.lane.b32.xlu1 %v427_v29, %s1170_s9  ;;  %643 = vrot.lane.b32.xlu0 %v259_v28, %s1170_s9 }
  0xbb   : > { %846 = vrot.lane.b32.xlu1 %v259_v28, %s1171_s10  ;;  %641 = vrot.lane.b32.xlu0 %v258_v27, %s1170_s9 }
  0xbf   : > { %844 = vrot.lane.b32.xlu1 %v258_v27, %s1171_s10  ;;  %848 = vrot.lane.b32.xlu0 %v427_v29, %s1171_s10  ;;  %s210_s10 = scalar_lea.vmem %s1299_s4, %s1223_s25 }
 0x105   : > { %v373_v30 = vpop.permute.xlu1 %372  ;;  %v371_v31 = vpop.permute.xlu0 %370 }
 0x106   : > { %v376_v32 = vsel %vm213_vm0, %v371_v31, %v373_v30 }
 0x107   : > { %382 = vmatprep.subr.bf16.mxu0 %v376_v32 }
 0x109   : > { %v306_v33 = vpop.permute.xlu1 %305  ;;  %v369_v34 = vpop.permute.xlu0 %368 }
 0x10a   : > { %v375_v35 = vsel %vm213_vm0, %v369_v34, %v371_v31 }
 0x10b   : > { %383 = vmatpush1.bf16.msra.mxu0 %v375_v35 }
 0x10d   : > { %v308_v37 = vpop.permute.xlu1 %307  ;;  %v310_v38 = vpop.permute.xlu0 %309 }
 0x10e   : > { %1065 = vmatmul.mubr.msk.bf16.vlgmr.msra.gmra.mrb[0].mxu0 %vm316_vm1, %v1146_v36  ;;  %v313_v39 = vsel %vm311_vm2, %v308_v37, %v310_v38  ;;  %v312_v40 = vsel %vm311_vm2, %v306_v33, %v308_v37 }
 0x10f   : > { %320 = vmatprep.subr.bf16.mxu1 %v313_v39  ;;  %485 = vmatprep.mubr.bf16.mxu0 %v1163_v2 }
 0x110   : > { %321 = vmatpush1.bf16.msra.mxu1 %v312_v40 }
 0x111   : > { %v444_v42 = vpop.permute.xlu1 %443  ;;  %528 = vmatprep.subr.bf16.mxu1 %v259_v28  ;;  %v442_v43 = vpop.permute.xlu0 %441 }
 0x112   : > { %v447_v44 = vsel %vm445_vm3, %v442_v43, %v444_v42 }
 0x113   : > { %1063 = vmatmul.mubr.msk.bf16.vlgmr.msra.gmra.mrb[0].mxu1 %vm316_vm1, %v1147_v41  ;;  %453 = vmatprep.subr.bf16.mxu0 %v447_v44 }
 0x114   : > { %529 = vmatpush1.bf16.msra.mxu1 %v258_v27  ;;  %560 = vmatprep.mubr.bf16.mxu1 %v1163_v2  ;;  %v262_v27 = vlaneseq }
 0x115   : > { %v720_v45 = vpop.permute.xlu1 %719  ;;  %v440_v46 = vpop.permute.xlu0 %439 }
 0x116   : > { %v446_v47 = vsel %vm445_vm3, %v440_v46, %v442_v43  ;;  %v263_v28 = vand.u32 127, %v262_v27 }
 0x117   : > { %454 = vmatpush1.bf16.msra.mxu0 %v446_v47 }
 0x118   : > { %v264_v29 = vadd.s32 128, %v263_v28  ;;  %v269_v30 = vand.u32 15, %v263_v28 }
 0x119   : > { %v718_v50 = vpop.permute.xlu1 %717  ;;  %v722_v51 = vpop.permute.xlu0 %721 }
 0x11a   : > { %v724_v52 = vsel %vm723_vm4, %v718_v50, %v720_v45  ;;  %1069 = vmatmul.mubr.msk.bf16.vlgmr.msra.gmra.mrb[0].mxu0 %vm316_vm1, %v1148_v48  ;;  %v725_v53 = vsel %vm723_vm4, %v720_v45, %v722_v51  ;;  %v276_v31 = vand.u32 15, %v264_v29  ;;  %vm500_vm8 = vcmp.ge.s32.totalorder %v269_v30, 1 }
 0x11b   : > { %1075 = vmatmul.mubr.msk.bf16.vlgmr.msra.gmra.mrb[4].mxu1 %vm316_vm1, %v1149_v49  ;;  %731 = vmatprep.subr.bf16.mxu0 %v725_v53  ;;  %vm905_vm10 = vcmp.le.s32.totalorder %v269_v30, 14 }
 0x11c   : > { %732 = vmatpush1.bf16.msra.mxu0 %v724_v52  ;;  %763 = vmatprep.mubr.bf16.mxu0 %v1163_v2  ;;  %vm501_vm9 = vcmp.ge.s32.totalorder %v276_v31, 1  ;;  %vm906_vm11 = vcmp.le.s32.totalorder %v276_v31, 14 }
 0x11d   : > { %v581_v54 = vpop.permute.xlu1 %580  ;;  %v577_v55 = vpop.permute.xlu0 %576  ;;  %622 = vmatprep.mubr.bf16.mxu1 %v1163_v2 }
 0x121   : > { %v782_v57 = vpop.permute.xlu1 %781  ;;  %v579_v58 = vpop.permute.xlu0 %578 }
 0x122   : > { %v583_v59 = vsel %vm316_vm1, %v577_v55, %v579_v58  ;;  %1087 = vmatmul.mubr.msk.bf16.vlgmr.msra.gmra.mrb[4].mxu0 %vm316_vm1, %v1150_v56  ;;  %v584_v60 = vsel %vm316_vm1, %v579_v58, %v581_v54 }
 0x123   : > { %590 = vmatprep.subr.bf16.mxu1 %v584_v60  ;;  %825 = vmatprep.mubr.bf16.mxu0 %v1163_v2 }
 0x124   : > { %591 = vmatpush1.bf16.msra.mxu1 %v583_v59 }
 0x125   : > { %v780_v62 = vpop.permute.xlu1 %779  ;;  %v784_v63 = vpop.permute.xlu0 %783 }
 0x126   : > { %v786_v0 = vsel %vm785_vm5, %v780_v62, %v782_v57  ;;  %v787_v1 = vsel %vm785_vm5, %v782_v57, %v784_v63 }
 0x127   : > { %1077 = vmatmul.mubr.msk.bf16.vlgmr.msra.gmra.mrb[4].mxu1 %vm316_vm1, %v1151_v61  ;;  %793 = vmatprep.subr.bf16.mxu0 %v787_v1 }
 0x128   : > { %794 = vmatpush1.bf16.msra.mxu0 %v786_v0  ;;  %687 = vmatprep.mubr.bf16.mxu1 %v1163_v2 }
 0x129   : > { %v646_v3 = vpop.permute.xlu1 %645  ;;  %v644_v4 = vpop.permute.xlu0 %643 }
 0x12a   : > { %v649_v5 = vsel %vm647_vm6, %v644_v4, %v646_v3 }
 0x12b   : > { %655 = vmatprep.subr.bf16.mxu1 %v649_v5 }
 0x12d   : > { %v847_v7 = vpop.permute.xlu1 %846  ;;  %v642_v8 = vpop.permute.xlu0 %641 }
 0x12e   : > { %v648_v9 = vsel %vm647_vm6, %v642_v8, %v644_v4  ;;  %1089 = vmatmul.mubr.msk.bf16.vlgmr.msra.gmra.mrb[4].mxu0 %vm316_vm1, %v1152_v6 }
 0x12f   : > { %656 = vmatpush1.bf16.msra.mxu1 %v648_v9  ;;  %890 = vmatprep.mubr.bf16.mxu0 %v1163_v2 }
 0x131   : > { %v845_v11 = vpop.permute.xlu1 %844  ;;  %v849_v12 = vpop.permute.xlu0 %848 }
 0x132   : > { %v851_v13 = vsel %vm850_vm7, %v845_v11, %v847_v7  ;;  %v852_v14 = vsel %vm850_vm7, %v847_v7, %v849_v12 }
 0x133   : > { %1081 = vmatmul.mubr.msk.bf16.vlgmr.msra.gmra.mrb[4].mxu1 %vm316_vm1, %v1153_v10  ;;  %858 = vmatprep.subr.bf16.mxu0 %v852_v14 }
 0x134   : > { %859 = vmatpush1.bf16.msra.mxu0 %v851_v13 }
 0x13a   : > { %1093 = vmatmul.mubr.msk.bf16.vlgmr.msra.gmra.mrb[4].mxu0 %vm316_vm1, %v1154_v15 }
 0x1e6   : > { %v354_v16 = vpop.f32.mrb[0].mxu1 }
 0x1e7   : > { %v356_v17 = vpop.f32.mrb[1].mxu1 }
 0x1e8   : > { %v358_v18 = vpop.f32.mrb[2].mxu1 }
 0x1e9   : > { %v360_v19 = vpop.f32.mrb[3].mxu1 }
 0x1ed   : > { %v487_v20 = vpop.f32.mrb[0].mxu0 }
 0x1ee   : > { %v1103_v2 = vadd.f32 %v487_v20, %v354_v16  ;;  %v489_v21 = vpop.f32.mrb[1].mxu0 }
 0x1ef   : > { %v1104_v22 = vadd.f32 %v489_v21, %v356_v17  ;;  %v491_v23 = vpop.f32.mrb[2].mxu0 }
 0x1f0   : > { %v1105_v24 = vadd.f32 %v491_v23, %v358_v18  ;;  %v493_v25 = vpop.f32.mrb[3].mxu0  ;;  %v506_v32 = vsel %vm500_vm8, %v1103_v2, 0.0 }
 0x1f1   : > { %v1106_v26 = vadd.f32 %v493_v25, %v360_v19  ;;  %v507_v35 = vsel %vm501_vm9, %v1104_v22, 0.0 }
 0x1f2   : > { %v508_v38 = vsel %vm500_vm8, %v1105_v24, 0.0 }
 0x1f3   : > { %v509_v41 = vsel %vm501_vm9, %v1106_v26, 0.0 }
 0x206   : > { %v689_v33 = vpop.f32.mrb[4].mxu1 }
 0x207   : > { %v702_v34 = vadd.f32 %v689_v33, %v506_v32  ;;  %v691_v36 = vpop.f32.mrb[5].mxu1 }
 0x208   : > { %v703_v37 = vadd.f32 %v691_v36, %v507_v35  ;;  %v693_v39 = vpop.f32.mrb[6].mxu1 }
 0x209   : > { %v704_v40 = vadd.f32 %v693_v39, %v508_v38  ;;  %v695_v42 = vpop.f32.mrb[7].mxu1 }
 0x20a   : > { %v705_v43 = vadd.f32 %v695_v42, %v509_v41 }
 0x20d   : > { %v892_v44 = vpop.f32.mrb[4].mxu0 }
 0x20e   : > { %v911_v45 = vsel %vm905_vm10, %v892_v44, 0.0  ;;  %v894_v46 = vpop.f32.mrb[5].mxu0 }
 0x20f   : > { %v915_v47 = vadd.f32 %v911_v45, %v702_v34  ;;  %v912_v48 = vsel %vm906_vm11, %v894_v46, 0.0  ;;  %v896_v49 = vpop.f32.mrb[6].mxu0 }
 0x210   : > { %v916_v50 = vadd.f32 %v912_v48, %v703_v37  ;;  %v913_v51 = vsel %vm905_vm10, %v896_v49, 0.0  ;;  %v898_v52 = vpop.f32.mrb[7].mxu0 }
 0x211   : > { %v917_v53 = vadd.f32 %v913_v51, %v704_v40  ;;  %v914_v54 = vsel %vm906_vm11, %v898_v52, 0.0 }
 0x212   : > { %v1101_v55 = vpack.c.bf16 %v916_v50, %v915_v47  ;;  %v918_v56 = vadd.f32 %v914_v54, %v705_v43 }
 0x213   : > { %v919_v57 = vpack.c.bf16 %v917_v53, %v915_v47 }
 0x214   : > { %931 = vst [vmem:[%s205_s7] sm:$0xff] %v1101_v55  ;;  %v920_v58 = vpack.c.bf16 %v918_v56, %v916_v50  ;;  %v1102_v59 = vpack.c.bf16 %v918_v56, %v917_v53 }
 0x215   : > { %v935_v60 = vunpack.c.h.bf16 %v919_v57  ;;  %v933_v61 = vunpack.c.l.bf16 %v919_v57 }
 0x216   : > { %932 = vst [vmem:[%s205_s7 + $0x8] sm:$0xff] %v1102_v59  ;;  %v936_v62 = vunpack.c.h.bf16 %v920_v58  ;;  %v934_v63 = vunpack.c.l.bf16 %v920_v58 }
 0x217   : > { %v943_v0 = vmul.f32 %v933_v61, %v933_v61  ;;  %v945_v1 = vmul.f32 %v935_v60, %v935_v60 }
 0x218   : > { %v940_v3 = vadd.f32 %v936_v62, %v935_v60  ;;  %v937_v4 = vadd.f32 %v934_v63, %v933_v61  ;;  %v944_v5 = vmul.f32 %v934_v63, %v934_v63  ;;  %v946_v6 = vmul.f32 %v936_v62, %v936_v62 }
 0x21a   : > { %941 = vadd.xlane.f32.xlu1 %v940_v3  ;;  %938 = vadd.xlane.f32.xlu0 %v937_v4  ;;  %v947_v7 = vadd.f32 %v944_v5, %v943_v0  ;;  %v950_v8 = vadd.f32 %v946_v6, %v945_v1 }
 0x21e   : > { %948 = vadd.xlane.f32.xlu0 %v947_v7 }
 0x222   : > { %951 = vadd.xlane.f32.xlu0 %v950_v8 }
 0x2a7   : > { %v939_v9 = vpop.xlane.xlu0 %938  ;;  %v942_v12 = vpop.xlane.xlu1 %941 }
 0x2ab   : > { %v949_v10 = vpop.xlane.xlu0 %948 }
 0x2ac   : > { %v954_v11 = vsel %vm311_vm2, %v939_v9, %v949_v10 }
 0x2ad   : > { %957 = vst.msk [vmem:[%s210_s10] sm:$0xff] %vm956_vm12, %v954_v11 }
 0x2af   : > { %v952_v13 = vpop.xlane.xlu0 %951 }
 0x2b0   : > { %v955_v14 = vsel %vm311_vm2, %v942_v12, %v952_v13 }
 0x2b1   : > { %958 = vst.msk [vmem:[%s210_s10 + $0x8] sm:$0xff] %vm956_vm12, %v955_v14 }
 0x2b2 PF: > { %s15_s15 = sadd.s32 1, %s1161_s15  }
 0x2b3   : > { %p12_p4 = scmp.ge.s32.totalorder %s15_s15, 4  }
 0x2b5   :  { %14 = sbr.rel (!%p12_p4) target bundleno = 1 (0x1), region = 83 }

// kernel: expanding_path_forward.13
= control target key start
LH: loop header
LB: loop body
LE: loop exit
PB: predicated region body
PF: predicated region fallthrough
CT: control target
= control target key end

     0   :  { %s304_s9 = smov 0   ;;  %s331_s0 = inlined_call_operand.vmem [shape: bf16[2,8,1024], index: 0, kind: input, shape index: {}]   ;;  %s332_s1 = inlined_call_operand.vmem [shape: f32[2,8,1], index: 1, kind: input, shape index: {}]   ;;  %s333_s2 = inlined_call_operand.vmem [shape: f32[2,8,1024], index: 2, kind: output, shape index: {}]  }
   0x1 LB: > { %s256_s10 = sadd.s32 4294967295, %s286_s9   ;;  %p260_p0 = scmp.ge.s32.totalorder %s286_s9, 1  ;;  %s286_s9 = sphi %s304_s9, %s12_s9  }
   0x2   : > { %p112_p1 = scmp.lt.s32.totalorder %s286_s9, 3 }
   0x4   : > { %p113_p2 = pnand %p260_p0, %p112_p1 }
   0x5   : > { %v156_v0 = vld [vmem:[%s332_s1] sm:$0xff] (!%p113_p2)  ;;  %v288_v1 = vmov (!%p113_p2), 0   ;;  %v265_v2 = vld [vmem:[%s332_s1 + $0x8] sm:$0xff] (!%p113_p2)  ;;  %p134_p3 = scmp.lt.s32.totalorder (!%p113_p2), %s256_s10, 1 }
   0x6   : > { %116 = sbr.rel (%p113_p2) target bundleno = 147 (0x93), region = 28  ;;  %279 = vset.pattern.permute.xlu0 (!%p113_p2), %v288_v1 }
   0x7   : > { %159 = vperm.xlu0 (!%p113_p2), %279, %v156_v0  }
   0xb   : > { %174 = vperm.xlu0 (!%p113_p2), %279, %v265_v2  }
   0xd   : > { %s335_s10 = smov (!%p134_p3, %s256_s10), 1 }
   0xe   : > { %s268_s15 = sshll.u32 %s335_s10, 5  ;;  %s269_s19 = sshll.u32 %s335_s10, 6 }
   0xf   : > { %s138_s18 = scalar_lea.vmem %s331_s0, %s268_s15  ;;  %s143_s22 = scalar_lea.vmem %s333_s2, %s269_s19 }
  0x10   : > { %v144_v3 = vld [vmem:[%s138_s18] sm:$0xff]  ;;  %v145_v4 = vld [vmem:[%s138_s18 + $0x8] sm:$0xff]  ;;  %v146_v5 = vld [vmem:[%s138_s18 + $0x10] sm:$0xff] }
  0x11   : > { %v147_v6 = vld [vmem:[%s138_s18 + $0x18] sm:$0xff]  ;;  %v148_v7 = vunpack.c.l.bf16 %v144_v3  ;;  %v149_v8 = vunpack.c.h.bf16 %v144_v3  ;;  %v150_v9 = vunpack.c.l.bf16 %v145_v4  ;;  %v151_v10 = vunpack.c.h.bf16 %v145_v4 }
  0x12   : > { %v152_v12 = vunpack.c.l.bf16 %v146_v5  ;;  %v153_v13 = vunpack.c.h.bf16 %v146_v5  ;;  %v154_v14 = vunpack.c.l.bf16 %v147_v6  ;;  %v155_v15 = vunpack.c.h.bf16 %v147_v6 }
  0x86   : > { %v160_v11 = vpop.permute.xlu0 %159 }
  0x87   : > { %v162_v16 = vmul.f32 %v160_v11, %v148_v7  ;;  %v163_v17 = vmul.f32 %v160_v11, %v149_v8  ;;  %v164_v18 = vmul.f32 %v160_v11, %v150_v9  ;;  %v165_v19 = vmul.f32 %v160_v11, %v151_v10 }
  0x88   : > { %v166_v21 = vmul.f32 %v160_v11, %v152_v12  ;;  %v167_v22 = vmul.f32 %v160_v11, %v153_v13  ;;  %v168_v23 = vmul.f32 %v160_v11, %v154_v14  ;;  %v169_v24 = vmul.f32 %v160_v11, %v155_v15 }
  0x8a   : > { %v175_v20 = vpop.permute.xlu0 %174 }
  0x8b   : > { %v177_v25 = vadd.f32 %v175_v20, %v162_v16  ;;  %v178_v26 = vadd.f32 %v175_v20, %v163_v17  ;;  %v179_v27 = vadd.f32 %v175_v20, %v164_v18  ;;  %v180_v28 = vadd.f32 %v175_v20, %v165_v19 }
  0x8c   : > { %v181_v29 = vadd.f32 %v175_v20, %v166_v21  ;;  %v182_v30 = vadd.f32 %v175_v20, %v167_v22  ;;  %v183_v31 = vadd.f32 %v175_v20, %v168_v23  ;;  %v184_v32 = vadd.f32 %v175_v20, %v169_v24 }
  0x8d   : > { %v185_v33 = vmax.f32 %v177_v25, 0.0  ;;  %v186_v34 = vmax.f32 %v178_v26, 0.0  ;;  %v187_v35 = vmax.f32 %v179_v27, 0.0  ;;  %v188_v36 = vmax.f32 %v180_v28, 0.0 }
  0x8e   : > { %v189_v37 = vmax.f32 %v181_v29, 0.0  ;;  %v190_v38 = vmax.f32 %v182_v30, 0.0  ;;  %v191_v39 = vmax.f32 %v183_v31, 0.0  ;;  %v192_v40 = vmax.f32 %v184_v32, 0.0 }
  0x8f   : > { %193 = vst [vmem:[%s143_s22] sm:$0xff] %v185_v33  ;;  %194 = vst [vmem:[%s143_s22 + $0x8] sm:$0xff] %v186_v34 }
  0x90   : > { %195 = vst [vmem:[%s143_s22 + $0x10] sm:$0xff] %v187_v35  ;;  %196 = vst [vmem:[%s143_s22 + $0x18] sm:$0xff] %v188_v36 }
  0x91   : > { %197 = vst [vmem:[%s143_s22 + $0x20] sm:$0xff] %v189_v37  ;;  %198 = vst [vmem:[%s143_s22 + $0x28] sm:$0xff] %v190_v38 }
  0x92   : > { %199 = vst [vmem:[%s143_s22 + $0x30] sm:$0xff] %v191_v39  ;;  %200 = vst [vmem:[%s143_s22 + $0x38] sm:$0xff] %v192_v40 }
  0x93 PF: > { %s12_s9 = sadd.s32 1, %s286_s9  }
  0x94   : > { %p9_p4 = scmp.ge.s32.totalorder %s12_s9, 4  }
  0x96   :  { %11 = sbr.rel (!%p9_p4) target bundleno = 1 (0x1), region = 59 }

// kernel: expanding_path_forward.11
= control target key start
LH: loop header
LB: loop body
LE: loop exit
PB: predicated region body
PF: predicated region fallthrough
CT: control target
= control target key end

     0   :  { %s2763_s15 = smov 0   ;;  %s3220_s0 = inlined_call_operand.vmem [shape: bf16[2,8,1024], index: 0, kind: input, shape index: {}]   ;;  %s3221_s1 = inlined_call_operand.vmem [shape: bf16[2,8,1024], index: 1, kind: input, shape index: {}]   ;;  %s3222_s2 = inlined_call_operand.vmem [shape: bf16[3,3,8,16], index: 2, kind: input, shape index: {}]   ;;  %s3223_s3 = inlined_call_operand.vmem [shape: bf16[2,8,1024], index: 3, kind: output, shape index: {0}]   ;;  %s3224_s4 = inlined_call_operand.vmem [shape: f32[2,8,2], index: 4, kind: output, shape index: {1}]  }
   0x1 LB: > { %s2539_s16 = sadd.s32 4294967295, %s2727_s15   ;;  %p2543_p0 = scmp.ge.s32.totalorder %s2727_s15, 1  ;;  %s2727_s15 = sphi %s2763_s15, %s15_s15  }
   0x2   : > { %p175_p1 = scmp.lt.s32.totalorder %s2727_s15, 3 }
   0x4   : > { %p176_p2 = pnand %p2543_p0, %p175_p1 }
   0x5   : > { %p210_p3 = scmp.lt.s32.totalorder (!%p176_p2), %s2539_s16, 1  ;;  %vm231_vm0 = vcmask (!%p176_p2), 269312   ;;  %v2729_v0 = vmov (!%p176_p2), 0   ;;  %s2730_s17 = smov (!%p176_p2), 1   ;;  %vm457_vm1 = vcmask (!%p176_p2), 7168   ;;  %vm474_vm2 = vcmask (!%p176_p2), 130048  }
   0x6   : > { %179 = sbr.rel (%p176_p2) target bundleno = 666 (0x29a), region = 32  ;;  %439 = vrot.lane.b32.xlu1 (!%p176_p2), %v2729_v0, %s2730_s17  ;;  %232 = vst.msk [vmem:[#allocation2 + $0x48] sm:$0xff] (!%p176_p2), %vm231_vm0, %v2729_v0  ;;  %510 = vmatprep.mubr.bf16.mxu0 (!%p176_p2), %v2729_v0  ;;  %s2731_s25 = smov (!%p176_p2), 33   ;;  %v2567_v42 = vld [vmem:[%s3222_s2 + $0xc] sm:$0xf] (!%p176_p2)  ;;  %vm882_vm3 = vcmask (!%p176_p2), 793600  }
   0x7   : > { %551 = vmatprep.mubr.bf16.mxu1 (!%p176_p2), %v2729_v0  ;;  %s2732_s26 = smov (!%p176_p2), 97   ;;  %s2733_s27 = smov (!%p176_p2), 32   ;;  %v427_v59 = vld [vmem:[%s3222_s2] sm:$0xf] (!%p176_p2)  ;;  %vm1303_vm4 = vcmask (!%p176_p2), 261120   ;;  %vm1507_vm5 = vcmask (!%p176_p2), 785408  }
   0x8   : > { %s2734_s28 = smov (!%p176_p2), 96   ;;  %s2735_s29 = smov (!%p176_p2), 127   ;;  %vm1729_vm6 = vcmask (!%p176_p2), 1039360   ;;  %vm1931_vm7 = vcmask (!%p176_p2), 252928   ;;  %vm2135_vm8 = vcmask (!%p176_p2), 777216  }
   0x9   : > { %s2736_s30 = smov (!%p176_p2), 31   ;;  %s2737_s5 = smov (!%p176_p2), 95  }
   0xd   : > { %s3242_s16 = smov (!%p210_p3, %s2539_s16), 1  ;;  %v2839_v33 = vld [vmem:[#allocation2 + $0x48] sm:$0xff] }
   0xe   : > { %s2780_s18 = sshll.u32 %s3242_s16, 5 }
   0xf   : > { %s214_s21 = scalar_lea.vmem %s3220_s0, %s2780_s18  ;;  %s219_s24 = scalar_lea.vmem %s3221_s1, %s2780_s18 }
  0x10   : > { %v233_v1 = vld [vmem:[%s214_s21] sm:$0xff]  ;;  %v234_v3 = vld [vmem:[%s214_s21 + $0x8] sm:$0xff]  ;;  %v235_v9 = vld [vmem:[%s214_s21 + $0x10] sm:$0xff] }
  0x11   : > { %v273_v2 = vld [vmem:[%s219_s24] sm:$0xff]  ;;  %v2551_v4 = vcombine.low %v233_v1, %v233_v1  ;;  %v2553_v6 = vcombine.low %v234_v3, %v234_v3  ;;  %v274_v7 = vld [vmem:[%s219_s24 + $0x8] sm:$0xff]  ;;  %v2552_v8 = vcombine.high %v233_v1, %v233_v1  ;;  %v275_v10 = vld [vmem:[%s219_s24 + $0x10] sm:$0xff]  ;;  %v2555_v13 = vcombine.low %v235_v9, %v235_v9 }
  0x12   : > { %v2559_v5 = vcombine.low %v273_v2, %v273_v2  ;;  %v2561_v11 = vcombine.low %v274_v7, %v274_v7  ;;  %v2560_v12 = vcombine.high %v273_v2, %v273_v2  ;;  %v2563_v14 = vcombine.low %v275_v10, %v275_v10  ;;  %v236_v15 = vld [vmem:[%s214_s21 + $0x18] sm:$0xff] }
  0x13   : > { %v276_v16 = vld [vmem:[%s219_s24 + $0x18] sm:$0xff]  ;;  %265 = vst [vmem:[#allocation2 + $0x8] sm:$0xf] %v2551_v4  ;;  %267 = vst [vmem:[#allocation2 + $0x18] sm:$0xf] %v2553_v6  ;;  %v2554_v17 = vcombine.high %v234_v3, %v234_v3  ;;  %v2562_v18 = vcombine.high %v274_v7, %v274_v7  ;;  %v2557_v19 = vcombine.low %v236_v15, %v236_v15 }
  0x14   : > { %305 = vst [vmem:[#allocation2 + $0x8] sm:$0xf0] %v2559_v5  ;;  %266 = vst [vmem:[#allocation2 + $0x10] sm:$0xf] %v2552_v8  ;;  %v2565_v20 = vcombine.low %v276_v16, %v276_v16  ;;  %v2556_v21 = vcombine.high %v235_v9, %v235_v9  ;;  %v2564_v22 = vcombine.high %v275_v10, %v275_v10 }
  0x15   : > { %307 = vst [vmem:[#allocation2 + $0x18] sm:$0xf0] %v2561_v11  ;;  %306 = vst [vmem:[#allocation2 + $0x10] sm:$0xf0] %v2560_v12  ;;  %v2558_v23 = vcombine.high %v236_v15, %v236_v15  ;;  %v2566_v24 = vcombine.high %v276_v16, %v276_v16 }
  0x16   : > { %269 = vst [vmem:[#allocation2 + $0x28] sm:$0xf] %v2555_v13  ;;  %309 = vst [vmem:[#allocation2 + $0x28] sm:$0xf0] %v2563_v14  ;;  %v2576_v14 = vld [vmem:[%s3222_s2 + $0x18] sm:$0xf] }
  0x17   : > { %268 = vst [vmem:[#allocation2 + $0x20] sm:$0xf] %v2554_v17  ;;  %308 = vst [vmem:[#allocation2 + $0x20] sm:$0xf0] %v2562_v18 }
  0x18   : > { %271 = vst [vmem:[#allocation2 + $0x38] sm:$0xf] %v2557_v19  ;;  %311 = vst [vmem:[#allocation2 + $0x38] sm:$0xf0] %v2565_v20 }
  0x19   : > { %270 = vst [vmem:[#allocation2 + $0x30] sm:$0xf] %v2556_v21  ;;  %310 = vst [vmem:[#allocation2 + $0x30] sm:$0xf0] %v2564_v22 }
  0x1a   : > { %272 = vst [vmem:[#allocation2 + $0x40] sm:$0xf] %v2558_v23  ;;  %312 = vst [vmem:[#allocation2 + $0x40] sm:$0xf0] %v2566_v24 }
  0x1b   : > { %v2790_v25 = vld [vmem:[#allocation2 + $0x8] sm:$0xff] }
  0x1c   : > { %441 = vrot.lane.b32.xlu0 %v2790_v25, %s2730_s17  ;;  %v2794_v26 = vld [vmem:[#allocation2 + $0x18] sm:$0xff]  ;;  %v2798_v27 = vld [vmem:[#allocation2 + $0x10] sm:$0xff] }
  0x1d   : > { %445 = vrot.lane.b32.xlu1 %v2794_v26, %s2730_s17  ;;  %v2800_v28 = vld [vmem:[#allocation2 + $0x28] sm:$0xff] }
  0x1e   : > { %v2806_v29 = vld [vmem:[#allocation2 + $0x20] sm:$0xff] }
  0x1f   : > { %v2808_v30 = vld [vmem:[#allocation2 + $0x38] sm:$0xff] }
  0x20   : > { %443 = vrot.lane.b32.xlu0 %v2798_v27, %s2730_s17  ;;  %v2814_v31 = vld [vmem:[#allocation2 + $0x30] sm:$0xff] }
  0x21   : > { %449 = vrot.lane.b32.xlu1 %v2800_v28, %s2730_s17  ;;  %v2819_v32 = vld [vmem:[#allocation2 + $0x40] sm:$0xff] }
  0x24   : > { %447 = vrot.lane.b32.xlu0 %v2806_v29, %s2730_s17 }
  0x25   : > { %453 = vrot.lane.b32.xlu1 %v2808_v30, %s2730_s17 }
  0x28   : > { %451 = vrot.lane.b32.xlu0 %v2814_v31, %s2730_s17 }
  0x29   : > { %644 = vrot.lane.b32.xlu1 %v2790_v25, %s2731_s25 }
  0x2c   : > { %455 = vrot.lane.b32.xlu0 %v2819_v32, %s2730_s17 }
  0x2d   : > { %642 = vrot.lane.b32.xlu1 %v2729_v0, %s2731_s25 }
  0x30   : > { %646 = vrot.lane.b32.xlu0 %v2798_v27, %s2731_s25 }
  0x31   : > { %650 = vrot.lane.b32.xlu1 %v2806_v29, %s2731_s25 }
  0x34   : > { %648 = vrot.lane.b32.xlu0 %v2794_v26, %s2731_s25 }
  0x35   : > { %654 = vrot.lane.b32.xlu1 %v2814_v31, %s2731_s25 }
  0x38   : > { %652 = vrot.lane.b32.xlu0 %v2800_v28, %s2731_s25 }
  0x39   : > { %658 = vrot.lane.b32.xlu1 %v2819_v32, %s2731_s25 }
  0x3c   : > { %656 = vrot.lane.b32.xlu0 %v2808_v30, %s2731_s25 }
  0x3d   : > { %868 = vrot.lane.b32.xlu1 %v2794_v26, %s2732_s26 }
  0x40   : > { %866 = vrot.lane.b32.xlu0 %v2798_v27, %s2732_s26 }
  0x41   : > { %870 = vrot.lane.b32.xlu1 %v2806_v29, %s2732_s26 }
  0x44   : > { %864 = vrot.lane.b32.xlu0 %v2790_v25, %s2732_s26 }
  0x45   : > { %874 = vrot.lane.b32.xlu1 %v2814_v31, %s2732_s26 }
  0x48   : > { %872 = vrot.lane.b32.xlu0 %v2800_v28, %s2732_s26 }
  0x49   : > { %878 = vrot.lane.b32.xlu1 %v2819_v32, %s2732_s26 }
  0x4c   : > { %876 = vrot.lane.b32.xlu0 %v2808_v30, %s2732_s26 }
  0x4d   : > { %1287 = vrot.lane.b32.xlu1 %v2790_v25, %s2733_s27 }
  0x50   : > { %880 = vrot.lane.b32.xlu0 %v2839_v33, %s2732_s26 }
  0x51   : > { %1285 = vrot.lane.b32.xlu1 %v2729_v0, %s2733_s27 }
  0x54   : > { %1289 = vrot.lane.b32.xlu0 %v2798_v27, %s2733_s27 }
  0x55   : > { %1293 = vrot.lane.b32.xlu1 %v2806_v29, %s2733_s27 }
  0x58   : > { %1291 = vrot.lane.b32.xlu0 %v2794_v26, %s2733_s27 }
  0x59   : > { %1297 = vrot.lane.b32.xlu1 %v2814_v31, %s2733_s27 }
  0x5c   : > { %1295 = vrot.lane.b32.xlu0 %v2800_v28, %s2733_s27 }
  0x5d   : > { %1301 = vrot.lane.b32.xlu1 %v2819_v32, %s2733_s27 }
  0x60   : > { %1299 = vrot.lane.b32.xlu0 %v2808_v30, %s2733_s27 }
  0x61   : > { %1493 = vrot.lane.b32.xlu1 %v2794_v26, %s2734_s28 }
  0x64   : > { %1491 = vrot.lane.b32.xlu0 %v2798_v27, %s2734_s28 }
  0x65   : > { %1495 = vrot.lane.b32.xlu1 %v2806_v29, %s2734_s28 }
  0x68   : > { %1489 = vrot.lane.b32.xlu0 %v2790_v25, %s2734_s28 }
  0x69   : > { %1499 = vrot.lane.b32.xlu1 %v2814_v31, %s2734_s28 }
  0x6c   : > { %1497 = vrot.lane.b32.xlu0 %v2800_v28, %s2734_s28 }
  0x6d   : > { %1503 = vrot.lane.b32.xlu1 %v2819_v32, %s2734_s28 }
  0x70   : > { %1501 = vrot.lane.b32.xlu0 %v2808_v30, %s2734_s28 }
  0x71   : > { %1713 = vrot.lane.b32.xlu1 %v2798_v27, %s2735_s29 }
  0x74   : > { %1505 = vrot.lane.b32.xlu0 %v2839_v33, %s2734_s28 }
  0x75   : > { %1711 = vrot.lane.b32.xlu1 %v2790_v25, %s2735_s29 }
  0x78   : > { %1715 = vrot.lane.b32.xlu0 %v2794_v26, %s2735_s29  ;;  %v440_v34 = vpop.permute.xlu1 %439 }
  0x79   : > { %1719 = vrot.lane.b32.xlu1 %v2800_v28, %s2735_s29 }
  0x7c   : > { %1717 = vrot.lane.b32.xlu0 %v2806_v29, %s2735_s29 }
  0x7d   : > { %1723 = vrot.lane.b32.xlu1 %v2808_v30, %s2735_s29 }
  0x80   : > { %1721 = vrot.lane.b32.xlu0 %v2814_v31, %s2735_s29 }
  0x81   : > { %1727 = vrot.lane.b32.xlu1 %v2839_v33, %s2735_s29 }
  0x84   : > { %1725 = vrot.lane.b32.xlu0 %v2819_v32, %s2735_s29  ;;  %s3174_s29 = scalar_lea.vmem %s3223_s3, %s2780_s18  ;;  %s2550_s18 = sshll.u32 %s3242_s16, 3 }
  0x85   : > { %1917 = vrot.lane.b32.xlu1 %v2798_v27, %s2736_s30  ;;  %s228_s6 = scalar_lea.vmem %s3224_s4, %s2550_s18 }
  0x88   : > { %1915 = vrot.lane.b32.xlu0 %v2790_v25, %s2736_s30 }
  0x89   : > { %1919 = vrot.lane.b32.xlu1 %v2794_v26, %s2736_s30 }
  0x8c   : > { %1913 = vrot.lane.b32.xlu0 %v2729_v0, %s2736_s30 }
  0x8d   : > { %1923 = vrot.lane.b32.xlu1 %v2800_v28, %s2736_s30 }
  0x8e   : > { %v442_v35 = vpop.permute.xlu0 %441 }
  0x8f   : > { %v446_v36 = vpop.permute.xlu1 %445  ;;  %v458_v40 = vsel %vm457_vm1, %v440_v34, %v442_v35 }
  0x90   : > { %1921 = vrot.lane.b32.xlu0 %v2806_v29, %s2736_s30 }
  0x91   : > { %1927 = vrot.lane.b32.xlu1 %v2808_v30, %s2736_s30 }
  0x92   : > { %v444_v37 = vpop.permute.xlu0 %443 }
  0x93   : > { %v459_v38 = vsel %vm457_vm1, %v442_v35, %v444_v37  ;;  %v450_v39 = vpop.permute.xlu1 %449  ;;  %v460_v45 = vsel %vm457_vm1, %v444_v37, %v446_v36 }
  0x94   : > { %478 = vmatprep.subr.bf16.mxu0 %v459_v38  ;;  %1925 = vrot.lane.b32.xlu0 %v2814_v31, %s2736_s30 }
  0x95   : > { %479 = vmatpush1.bf16.msra.mxu0 %v458_v40  ;;  %2119 = vrot.lane.b32.xlu1 %v2798_v27, %s2737_s5 }
  0x96   : > { %v448_v41 = vpop.permute.xlu0 %447 }
  0x97   : > { %v461_v43 = vsel %vm457_vm1, %v446_v36, %v448_v41  ;;  %v454_v44 = vpop.permute.xlu1 %453  ;;  %v462_v49 = vsel %vm457_vm1, %v448_v41, %v450_v39 }
  0x98   : > { %519 = vmatprep.subr.bf16.mxu1 %v461_v43  ;;  %1929 = vrot.lane.b32.xlu0 %v2819_v32, %s2736_s30 }
  0x99   : > { %520 = vmatpush1.bf16.msra.mxu1 %v460_v45  ;;  %2568 = vmatmul.mubr.msk.bf16.vlgmr.msra.gmra.mrb[0].mxu0 %vm474_vm2, %v2567_v42 }
  0x9a   : > { %v452_v46 = vpop.permute.xlu0 %451  ;;  %2117 = vrot.lane.b32.xlu1 %v2790_v25, %s2737_s5  ;;  %592 = vmatprep.mubr.bf16.mxu0 %v2729_v0 }
  0x9b   : > { %v463_v47 = vsel %vm457_vm1, %v450_v39, %v452_v46  ;;  %v645_v48 = vpop.permute.xlu1 %644  ;;  %v464_v53 = vsel %vm457_vm1, %v452_v46, %v454_v44 }
  0x9c   : > { %560 = vmatprep.subr.bf16.mxu0 %v463_v47  ;;  %2121 = vrot.lane.b32.xlu0 %v2794_v26, %s2737_s5 }
  0x9d   : > { %561 = vmatpush1.bf16.msra.mxu0 %v462_v49  ;;  %2569 = vmatmul.mubr.msk.bf16.vlgmr.msra.gmra.mrb[0].mxu1 %vm474_vm2, %v2567_v42 }
  0x9e   : > { %v456_v50 = vpop.permute.xlu0 %455  ;;  %2125 = vrot.lane.b32.xlu1 %v2800_v28, %s2737_s5  ;;  %633 = vmatprep.mubr.bf16.mxu1 %v2729_v0 }
  0x9f   : > { %v465_v51 = vsel %vm457_vm1, %v454_v44, %v456_v50  ;;  %v643_v52 = vpop.permute.xlu1 %642  ;;  %v2581_v44 = vld [vmem:[%s3222_s2 + $0x4] sm:$0xf] }
  0xa0   : > { %601 = vmatprep.subr.bf16.mxu1 %v465_v51  ;;  %2123 = vrot.lane.b32.xlu0 %v2806_v29, %s2737_s5  ;;  %v661_v54 = vsel %vm231_vm0, %v643_v52, %v645_v48 }
  0xa1   : > { %602 = vmatpush1.bf16.msra.mxu1 %v464_v53  ;;  %2570 = vmatmul.mubr.msk.bf16.vlgmr.msra.gmra.mrb[4].mxu0 %vm474_vm2, %v2567_v42 }
  0xa2   : > { %v647_v55 = vpop.permute.xlu0 %646  ;;  %2129 = vrot.lane.b32.xlu1 %v2808_v30, %s2737_s5  ;;  %712 = vmatprep.mubr.bf16.mxu0 %v2729_v0 }
  0xa3   : > { %v662_v56 = vsel %vm231_vm0, %v645_v48, %v647_v55  ;;  %v651_v57 = vpop.permute.xlu1 %650 }
  0xa4   : > { %680 = vmatprep.subr.bf16.mxu0 %v662_v56  ;;  %2127 = vrot.lane.b32.xlu0 %v2814_v31, %s2737_s5 }
  0xa5   : > { %681 = vmatpush1.bf16.msra.mxu0 %v661_v54  ;;  %2571 = vmatmul.mubr.msk.bf16.vlgmr.msra.gmra.mrb[4].mxu1 %vm474_vm2, %v2567_v42 }
  0xa6   : > { %v649_v58 = vpop.permute.xlu0 %648  ;;  %2133 = vrot.lane.b32.xlu1 %v2839_v33, %s2737_s5  ;;  %753 = vmatprep.mubr.bf16.mxu1 %v2729_v0 }
  0xa7   : > { %v663_v60 = vsel %vm231_vm0, %v647_v55, %v649_v58  ;;  %v664_v61 = vsel %vm231_vm0, %v649_v58, %v651_v57  ;;  %v655_v62 = vpop.permute.xlu1 %654 }
  0xa8   : > { %721 = vmatprep.subr.bf16.mxu1 %v664_v61  ;;  %2131 = vrot.lane.b32.xlu0 %v2819_v32, %s2737_s5  ;;  %v2591_v61 = vld [vmem:[%s3222_s2 + $0x1c] sm:$0xf] }
  0xa9   : > { %722 = vmatpush1.bf16.msra.mxu1 %v663_v60  ;;  %2572 = vmatmul.mubr.msk.bf16.vlgmr.msra.gmra.mrb[0].mxu0 %vm474_vm2, %v427_v59 }
  0xaa   : > { %v653_v63 = vpop.permute.xlu0 %652  ;;  %794 = vmatprep.mubr.bf16.mxu0 %v2729_v0 }
  0xab   : > { %v665_v1 = vsel %vm231_vm0, %v651_v57, %v653_v63  ;;  %v666_v2 = vsel %vm231_vm0, %v653_v63, %v655_v62  ;;  %v659_v3 = vpop.permute.xlu1 %658 }
  0xac   : > { %762 = vmatprep.subr.bf16.mxu0 %v666_v2 }
  0xad   : > { %763 = vmatpush1.bf16.msra.mxu0 %v665_v1  ;;  %2573 = vmatmul.mubr.msk.bf16.vlgmr.msra.gmra.mrb[0].mxu1 %vm474_vm2, %v427_v59 }
  0xae   : > { %v657_v4 = vpop.permute.xlu0 %656  ;;  %835 = vmatprep.mubr.bf16.mxu1 %v2729_v0 }
  0xaf   : > { %v667_v5 = vsel %vm231_vm0, %v655_v62, %v657_v4  ;;  %v668_v6 = vsel %vm231_vm0, %v657_v4, %v659_v3  ;;  %v869_v7 = vpop.permute.xlu1 %868 }
  0xb0   : > { %803 = vmatprep.subr.bf16.mxu1 %v668_v6 }
  0xb1   : > { %804 = vmatpush1.bf16.msra.mxu1 %v667_v5  ;;  %2574 = vmatmul.mubr.msk.bf16.vlgmr.msra.gmra.mrb[4].mxu0 %vm474_vm2, %v427_v59 }
  0xb2   : > { %v867_v8 = vpop.permute.xlu0 %866  ;;  %934 = vmatprep.mubr.bf16.mxu0 %v2729_v0 }
  0xb3   : > { %v884_v9 = vsel %vm882_vm3, %v867_v8, %v869_v7  ;;  %v871_v10 = vpop.permute.xlu1 %870 }
  0xb4   : > { %902 = vmatprep.subr.bf16.mxu0 %v884_v9  ;;  %v885_v18 = vsel %vm882_vm3, %v869_v7, %v871_v10 }
  0xb5   : > { %2575 = vmatmul.mubr.msk.bf16.vlgmr.msra.gmra.mrb[4].mxu1 %vm474_vm2, %v427_v59 }
  0xb6   : > { %v865_v11 = vpop.permute.xlu0 %864  ;;  %975 = vmatprep.mubr.bf16.mxu1 %v2729_v0 }
  0xb7   : > { %v883_v12 = vsel %vm882_vm3, %v865_v11, %v867_v8  ;;  %v875_v13 = vpop.permute.xlu1 %874 }
  0xb8   : > { %903 = vmatpush1.bf16.msra.mxu0 %v883_v12 }
  0xba   : > { %v873_v15 = vpop.permute.xlu0 %872 }
  0xbb   : > { %2577 = vmatmul.mubr.msk.bf16.vlgmr.msra.gmra.mrb[0].mxu0 %vm474_vm2, %v2576_v14  ;;  %v886_v16 = vsel %vm882_vm3, %v871_v10, %v873_v15  ;;  %v879_v17 = vpop.permute.xlu1 %878  ;;  %v887_v22 = vsel %vm882_vm3, %v873_v15, %v875_v13  ;;  %v2597_v15 = vld [vmem:[%s3222_s2 + $0x14] sm:$0xf] }
  0xbc   : > { %943 = vmatprep.subr.bf16.mxu1 %v886_v16  ;;  %1016 = vmatprep.mubr.bf16.mxu0 %v2729_v0 }
  0xbd   : > { %944 = vmatpush1.bf16.msra.mxu1 %v885_v18 }
  0xbe   : > { %v877_v19 = vpop.permute.xlu0 %876 }
  0xbf   : > { %v888_v20 = vsel %vm882_vm3, %v875_v13, %v877_v19  ;;  %v1288_v21 = vpop.permute.xlu1 %1287  ;;  %v889_v34 = vsel %vm882_vm3, %v877_v19, %v879_v17 }
  0xc0   : > { %2578 = vmatmul.mubr.msk.bf16.vlgmr.msra.gmra.mrb[0].mxu1 %vm474_vm2, %v2576_v14  ;;  %984 = vmatprep.subr.bf16.mxu0 %v888_v20 }
  0xc1   : > { %985 = vmatpush1.bf16.msra.mxu0 %v887_v22  ;;  %1057 = vmatprep.mubr.bf16.mxu1 %v2729_v0 }
  0xc2   : > { %v881_v23 = vpop.permute.xlu0 %880  ;;  %1121 = vmatprep.subr.bf16.mxu0 %v2798_v27  ;;  %v2582_v27 = vld [vmem:[%s3222_s2 + $0x10] sm:$0xf] }
  0xc3   : > { %v890_v24 = vsel %vm882_vm3, %v879_v17, %v881_v23  ;;  %v1286_v33 = vpop.permute.xlu1 %1285 }
  0xc4   : > { %2579 = vmatmul.mubr.msk.bf16.vlgmr.msra.gmra.mrb[4].mxu0 %vm474_vm2, %v2576_v14  ;;  %1025 = vmatprep.subr.bf16.mxu1 %v890_v24 }
  0xc5   : > { %1026 = vmatpush1.bf16.msra.mxu1 %v889_v34  ;;  %1122 = vmatpush1.bf16.msra.mxu0 %v2790_v25 }
  0xc6   : > { %v1290_v35 = vpop.permute.xlu0 %1289  ;;  %1153 = vmatprep.mubr.bf16.mxu0 %v2729_v0  ;;  %1203 = vmatprep.subr.bf16.mxu0 %v2814_v31 }
  0xc7   : > { %1162 = vmatprep.subr.bf16.mxu1 %v2806_v29  ;;  %v1294_v36 = vpop.permute.xlu1 %1293  ;;  %v1305_v37 = vsel %vm1303_vm4, %v1288_v21, %v1290_v35 }
  0xc8   : > { %2580 = vmatmul.mubr.msk.bf16.vlgmr.msra.gmra.mrb[4].mxu1 %vm474_vm2, %v2576_v14 }
  0xc9   : > { %1163 = vmatpush1.bf16.msra.mxu1 %v2794_v26  ;;  %1194 = vmatprep.mubr.bf16.mxu1 %v2729_v0 }
  0xca   : > { %v1292_v25 = vpop.permute.xlu0 %1291  ;;  %1244 = vmatprep.subr.bf16.mxu1 %v2819_v32 }
  0xcb   : > { %v1298_v31 = vpop.permute.xlu1 %1297  ;;  %v1307_v38 = vsel %vm1303_vm4, %v1292_v25, %v1294_v36 }
  0xcc   : > { %2583 = vmatmul.mubr.msk.bf16.vlgmr.msra.gmra.mrb[8].mxu0 %vm474_vm2, %v2582_v27 }
  0xcd   : > { %1204 = vmatpush1.bf16.msra.mxu0 %v2800_v28  ;;  %1235 = vmatprep.mubr.bf16.mxu0 %v2729_v0  ;;  %v1304_v28 = vsel %vm1303_vm4, %v1286_v33, %v1288_v21 }
  0xce   : > { %1323 = vmatprep.subr.bf16.mxu0 %v1305_v37  ;;  %v1296_v29 = vpop.permute.xlu0 %1295  ;;  %v2596_v37 = vld [vmem:[%s3222_s2 + $0x8] sm:$0xf] }
  0xcf   : > { %v1302_v39 = vpop.permute.xlu1 %1301  ;;  %v1309_v32 = vsel %vm1303_vm4, %v1296_v29, %v1298_v31  ;;  %v1308_v48 = vsel %vm1303_vm4, %v1294_v36, %v1296_v29 }
  0xd0   : > { %2584 = vmatmul.mubr.msk.bf16.vlgmr.msra.gmra.mrb[8].mxu1 %vm474_vm2, %v2582_v27 }
  0xd1   : > { %1245 = vmatpush1.bf16.msra.mxu1 %v2808_v30  ;;  %1276 = vmatprep.mubr.bf16.mxu1 %v2729_v0  ;;  %v1306_v30 = vsel %vm1303_vm4, %v1290_v35, %v1292_v25 }
  0xd2   : > { %1364 = vmatprep.subr.bf16.mxu1 %v1307_v38  ;;  %v1300_v26 = vpop.permute.xlu0 %1299 }
  0xd3   : > { %v1494_v40 = vpop.permute.xlu1 %1493  ;;  %v1311_v42 = vsel %vm1303_vm4, %v1300_v26, %v1302_v39  ;;  %v1310_v52 = vsel %vm1303_vm4, %v1298_v31, %v1300_v26 }
  0xd4   : > { %2585 = vmatmul.mubr.msk.bf16.vlgmr.msra.gmra.mrb[12].mxu0 %vm474_vm2, %v2582_v27 }
  0xd5   : > { %1324 = vmatpush1.bf16.msra.mxu0 %v1304_v28  ;;  %1355 = vmatprep.mubr.bf16.mxu0 %v2729_v0 }
  0xd6   : > { %1405 = vmatprep.subr.bf16.mxu0 %v1309_v32  ;;  %v1492_v41 = vpop.permute.xlu0 %1491 }
  0xd7   : > { %v1496_v43 = vpop.permute.xlu1 %1495  ;;  %v1509_v46 = vsel %vm1507_vm5, %v1492_v41, %v1494_v40 }
  0xd8   : > { %2586 = vmatmul.mubr.msk.bf16.vlgmr.msra.gmra.mrb[12].mxu1 %vm474_vm2, %v2582_v27  ;;  %v1510_v60 = vsel %vm1507_vm5, %v1494_v40, %v1496_v43 }
  0xd9   : > { %1365 = vmatpush1.bf16.msra.mxu1 %v1306_v30  ;;  %1396 = vmatprep.mubr.bf16.mxu1 %v2729_v0 }
  0xda   : > { %1446 = vmatprep.subr.bf16.mxu1 %v1311_v42  ;;  %v1490_v45 = vpop.permute.xlu0 %1489 }
  0xdb   : > { %v1500_v47 = vpop.permute.xlu1 %1499  ;;  %v1508_v56 = vsel %vm1507_vm5, %v1490_v45, %v1492_v41 }
  0xdc   : > { %2587 = vmatmul.mubr.msk.bf16.vlgmr.msra.gmra.mrb[16].mxu0 %vm474_vm2, %v2581_v44 }
  0xdd   : > { %1406 = vmatpush1.bf16.msra.mxu0 %v1308_v48  ;;  %1437 = vmatprep.mubr.bf16.mxu0 %v2729_v0  ;;  %v2606_v48 = vld [vmem:[%s3222_s2 + $0x20] sm:$0xf] }
  0xde   : > { %1527 = vmatprep.subr.bf16.mxu0 %v1509_v46  ;;  %v1498_v49 = vpop.permute.xlu0 %1497 }
  0xdf   : > { %v1511_v50 = vsel %vm1507_vm5, %v1496_v43, %v1498_v49  ;;  %v1504_v51 = vpop.permute.xlu1 %1503  ;;  %v1512_v2 = vsel %vm1507_vm5, %v1498_v49, %v1500_v47 }
  0xe0   : > { %2588 = vmatmul.mubr.msk.bf16.vlgmr.msra.gmra.mrb[16].mxu1 %vm474_vm2, %v2581_v44 }
  0xe1   : > { %1447 = vmatpush1.bf16.msra.mxu1 %v1310_v52  ;;  %1478 = vmatprep.mubr.bf16.mxu1 %v2729_v0 }
  0xe2   : > { %1568 = vmatprep.subr.bf16.mxu1 %v1511_v50  ;;  %v1502_v53 = vpop.permute.xlu0 %1501 }
  0xe3   : > { %v1513_v54 = vsel %vm1507_vm5, %v1500_v47, %v1502_v53  ;;  %v1714_v55 = vpop.permute.xlu1 %1713  ;;  %v1514_v6 = vsel %vm1507_vm5, %v1502_v53, %v1504_v51 }
  0xe4   : > { %2589 = vmatmul.mubr.msk.bf16.vlgmr.msra.gmra.mrb[20].mxu0 %vm474_vm2, %v2581_v44 }
  0xe5   : > { %1528 = vmatpush1.bf16.msra.mxu0 %v1508_v56  ;;  %1559 = vmatprep.mubr.bf16.mxu0 %v2729_v0 }
  0xe6   : > { %1609 = vmatprep.subr.bf16.mxu0 %v1513_v54  ;;  %v1506_v57 = vpop.permute.xlu0 %1505 }
  0xe7   : > { %v1515_v58 = vsel %vm1507_vm5, %v1504_v51, %v1506_v57  ;;  %v1712_v59 = vpop.permute.xlu1 %1711 }
  0xe8   : > { %2590 = vmatmul.mubr.msk.bf16.vlgmr.msra.gmra.mrb[20].mxu1 %vm474_vm2, %v2581_v44  ;;  %v1730_v10 = vsel %vm1729_vm6, %v1712_v59, %v1714_v55 }
  0xe9   : > { %1569 = vmatpush1.bf16.msra.mxu1 %v1510_v60  ;;  %1600 = vmatprep.mubr.bf16.mxu1 %v2729_v0 }
  0xea   : > { %1650 = vmatprep.subr.bf16.mxu1 %v1515_v58  ;;  %v1716_v62 = vpop.permute.xlu0 %1715 }
  0xeb   : > { %v1731_v63 = vsel %vm1729_vm6, %v1714_v55, %v1716_v62  ;;  %v1720_v1 = vpop.permute.xlu1 %1719 }
  0xec   : > { %2592 = vmatmul.mubr.msk.bf16.vlgmr.msra.gmra.mrb[24].mxu0 %vm474_vm2, %v2591_v61 }
  0xed   : > { %1610 = vmatpush1.bf16.msra.mxu0 %v1512_v2  ;;  %1641 = vmatprep.mubr.bf16.mxu0 %v2729_v0 }
  0xee   : > { %1749 = vmatprep.subr.bf16.mxu0 %v1731_v63  ;;  %v1718_v3 = vpop.permute.xlu0 %1717 }
  0xef   : > { %v1724_v4 = vpop.permute.xlu1 %1723  ;;  %v1733_v5 = vsel %vm1729_vm6, %v1718_v3, %v1720_v1  ;;  %v1732_v14 = vsel %vm1729_vm6, %v1716_v62, %v1718_v3 }
  0xf0   : > { %2593 = vmatmul.mubr.msk.bf16.vlgmr.msra.gmra.mrb[24].mxu1 %vm474_vm2, %v2591_v61 }
  0xf1   : > { %1651 = vmatpush1.bf16.msra.mxu1 %v1514_v6  ;;  %1682 = vmatprep.mubr.bf16.mxu1 %v2729_v0 }
  0xf2   : > { %v1722_v7 = vpop.permute.xlu0 %1721  ;;  %1790 = vmatprep.subr.bf16.mxu1 %v1733_v5 }
  0xf3   : > { %v1728_v8 = vpop.permute.xlu1 %1727  ;;  %v1735_v9 = vsel %vm1729_vm6, %v1722_v7, %v1724_v4  ;;  %v1734_v19 = vsel %vm1729_vm6, %v1720_v1, %v1722_v7 }
  0xf4   : > { %2594 = vmatmul.mubr.msk.bf16.vlgmr.msra.gmra.mrb[28].mxu0 %vm474_vm2, %v2591_v61 }
  0xf5   : > { %1750 = vmatpush1.bf16.msra.mxu0 %v1730_v10  ;;  %1781 = vmatprep.mubr.bf16.mxu0 %v2729_v0 }
  0xf6   : > { %v1726_v11 = vpop.permute.xlu0 %1725  ;;  %1831 = vmatprep.subr.bf16.mxu0 %v1735_v9 }
  0xf7   : > { %v1918_v12 = vpop.permute.xlu1 %1917  ;;  %v1737_v13 = vsel %vm1729_vm6, %v1726_v11, %v1728_v8  ;;  %v1736_v22 = vsel %vm1729_vm6, %v1724_v4, %v1726_v11 }
  0xf8   : > { %2595 = vmatmul.mubr.msk.bf16.vlgmr.msra.gmra.mrb[28].mxu1 %vm474_vm2, %v2591_v61 }
  0xf9   : > { %1791 = vmatpush1.bf16.msra.mxu1 %v1732_v14  ;;  %1822 = vmatprep.mubr.bf16.mxu1 %v2729_v0 }
  0xfa   : > { %v1916_v16 = vpop.permute.xlu0 %1915  ;;  %1872 = vmatprep.subr.bf16.mxu1 %v1737_v13 }
  0xfb   : > { %v1920_v17 = vpop.permute.xlu1 %1919  ;;  %v1933_v18 = vsel %vm1931_vm7, %v1916_v16, %v1918_v12 }
  0xfc   : > { %2598 = vmatmul.mubr.msk.bf16.vlgmr.msra.gmra.mrb[32].mxu0 %vm474_vm2, %v2597_v15  ;;  %v1934_v25 = vsel %vm1931_vm7, %v1918_v12, %v1920_v17 }
  0xfd   : > { %1832 = vmatpush1.bf16.msra.mxu0 %v1734_v19  ;;  %1863 = vmatprep.mubr.bf16.mxu0 %v2729_v0 }
  0xfe   : > { %v1914_v20 = vpop.permute.xlu0 %1913  ;;  %1951 = vmatprep.subr.bf16.mxu0 %v1933_v18 }
  0xff   : > { %v1924_v21 = vpop.permute.xlu1 %1923  ;;  %v1932_v23 = vsel %vm1931_vm7, %v1914_v20, %v1916_v16 }
 0x100   : > { %2599 = vmatmul.mubr.msk.bf16.vlgmr.msra.gmra.mrb[32].mxu1 %vm474_vm2, %v2597_v15 }
 0x101   : > { %1873 = vmatpush1.bf16.msra.mxu1 %v1736_v22  ;;  %1904 = vmatprep.mubr.bf16.mxu1 %v2729_v0 }
 0x102   : > { %v1922_v24 = vpop.permute.xlu0 %1921 }
 0x103   : > { %v1935_v33 = vsel %vm1931_vm7, %v1920_v17, %v1922_v24  ;;  %v1928_v34 = vpop.permute.xlu1 %1927  ;;  %v1936_v31 = vsel %vm1931_vm7, %v1922_v24, %v1924_v21 }
 0x104   : > { %2600 = vmatmul.mubr.msk.bf16.vlgmr.msra.gmra.mrb[36].mxu0 %vm474_vm2, %v2597_v15  ;;  %1992 = vmatprep.subr.bf16.mxu1 %v1935_v33 }
 0x105   : > { %1952 = vmatpush1.bf16.msra.mxu0 %v1932_v23  ;;  %1983 = vmatprep.mubr.bf16.mxu0 %v2729_v0 }
 0x106   : > { %v1926_v35 = vpop.permute.xlu0 %1925 }
 0x107   : > { %v1937_v36 = vsel %vm1931_vm7, %v1924_v21, %v1926_v35  ;;  %v2120_v27 = vpop.permute.xlu1 %2119  ;;  %v1938_v26 = vsel %vm1931_vm7, %v1926_v35, %v1928_v34  ;;  %v313_v21 = vlaneseq }
 0x108   : > { %2601 = vmatmul.mubr.msk.bf16.vlgmr.msra.gmra.mrb[36].mxu1 %vm474_vm2, %v2597_v15  ;;  %2033 = vmatprep.subr.bf16.mxu0 %v1937_v36 }
 0x109   : > { %1993 = vmatpush1.bf16.msra.mxu1 %v1934_v25  ;;  %2024 = vmatprep.mubr.bf16.mxu1 %v2729_v0  ;;  %v3081_v36 = vand.u32 127, %v313_v21 }
 0x10a   : > { %v1930_v29 = vpop.permute.xlu0 %1929 }
 0x10b   : > { %v1939_v38 = vsel %vm1931_vm7, %v1928_v34, %v1930_v29 }
 0x10c   : > { %2602 = vmatmul.mubr.msk.bf16.vlgmr.msra.gmra.mrb[32].mxu0 %vm474_vm2, %v2596_v37  ;;  %2074 = vmatprep.subr.bf16.mxu1 %v1939_v38  ;;  %v2118_v39 = vpop.permute.xlu1 %2117 }
 0x10d   : > { %2034 = vmatpush1.bf16.msra.mxu0 %v1936_v31  ;;  %2065 = vmatprep.mubr.bf16.mxu0 %v2729_v0  ;;  %v2136_v41 = vsel %vm2135_vm8, %v2118_v39, %v2120_v27  ;;  %v3084_v39 = vadd.s32 128, %v3081_v36 }
 0x10e   : > { %v2122_v32 = vpop.permute.xlu0 %2121 }
 0x10f   : > { %v2137_v40 = vsel %vm2135_vm8, %v2120_v27, %v2122_v32 }
 0x110   : > { %2603 = vmatmul.mubr.msk.bf16.vlgmr.msra.gmra.mrb[32].mxu1 %vm474_vm2, %v2596_v37  ;;  %2155 = vmatprep.subr.bf16.mxu0 %v2137_v40  ;;  %v2126_v28 = vpop.permute.xlu1 %2125 }
 0x111   : > { %2075 = vmatpush1.bf16.msra.mxu1 %v1938_v26  ;;  %2106 = vmatprep.mubr.bf16.mxu1 %v2729_v0 }
 0x112   : > { %v2124_v42 = vpop.permute.xlu0 %2123 }
 0x113   : > { %v2139_v43 = vsel %vm2135_vm8, %v2124_v42, %v2126_v28  ;;  %v2138_v44 = vsel %vm2135_vm8, %v2122_v32, %v2124_v42 }
 0x114   : > { %2604 = vmatmul.mubr.msk.bf16.vlgmr.msra.gmra.mrb[36].mxu0 %vm474_vm2, %v2596_v37  ;;  %2196 = vmatprep.subr.bf16.mxu1 %v2139_v43  ;;  %v2130_v30 = vpop.permute.xlu1 %2129  ;;  %v326_v43 = vand.u32 31, %v3081_v36 }
 0x115   : > { %2156 = vmatpush1.bf16.msra.mxu0 %v2136_v41  ;;  %2187 = vmatprep.mubr.bf16.mxu0 %v2729_v0 }
 0x116   : > { %v2128_v45 = vpop.permute.xlu0 %2127  ;;  %vm3097_vm9 = vcmp.ge.s32.totalorder %v326_v43, 1 }
 0x117   : > { %v2141_v46 = vsel %vm2135_vm8, %v2128_v45, %v2130_v30  ;;  %v2140_v49 = vsel %vm2135_vm8, %v2126_v28, %v2128_v45  ;;  %v3087_v28 = vadd.s32 256, %v3081_v36  ;;  %v3092_v45 = vadd.s32 384, %v3081_v36 }
 0x118   : > { %2605 = vmatmul.mubr.msk.bf16.vlgmr.msra.gmra.mrb[36].mxu1 %vm474_vm2, %v2596_v37  ;;  %2237 = vmatprep.subr.bf16.mxu0 %v2141_v46  ;;  %v2134_v47 = vpop.permute.xlu1 %2133 }
 0x119   : > { %2197 = vmatpush1.bf16.msra.mxu1 %v2138_v44  ;;  %2228 = vmatprep.mubr.bf16.mxu1 %v2729_v0  ;;  %v333_v44 = vand.u32 31, %v3084_v39 }
 0x11a   : > { %v2132_v50 = vpop.permute.xlu0 %2131 }
 0x11b   : > { %v2143_v51 = vsel %vm2135_vm8, %v2132_v50, %v2134_v47  ;;  %v2142_v52 = vsel %vm2135_vm8, %v2130_v30, %v2132_v50  ;;  %vm3106_vm10 = vcmp.ge.s32.totalorder %v333_v44, 1  ;;  %vm2328_vm3 = vcmp.le.s32.totalorder %v333_v44, 30 }
 0x11c   : > { %2607 = vmatmul.mubr.msk.bf16.vlgmr.msra.gmra.mrb[32].mxu0 %vm474_vm2, %v2606_v48  ;;  %2278 = vmatprep.subr.bf16.mxu1 %v2143_v51 }
 0x11d   : > { %2238 = vmatpush1.bf16.msra.mxu0 %v2140_v49  ;;  %2269 = vmatprep.mubr.bf16.mxu0 %v2729_v0  ;;  %v340_v49 = vand.u32 31, %v3087_v28 }
 0x11f   : > { %vm3119_vm11 = vcmp.ge.s32.totalorder %v340_v49, 1  ;;  %vm2329_vm4 = vcmp.le.s32.totalorder %v340_v49, 30 }
 0x120   : > { %2608 = vmatmul.mubr.msk.bf16.vlgmr.msra.gmra.mrb[32].mxu1 %vm474_vm2, %v2606_v48 }
 0x121   : > { %2279 = vmatpush1.bf16.msra.mxu1 %v2142_v52  ;;  %2310 = vmatprep.mubr.bf16.mxu1 %v2729_v0 }
 0x124   : > { %2609 = vmatmul.mubr.msk.bf16.vlgmr.msra.gmra.mrb[36].mxu0 %vm474_vm2, %v2606_v48 }
 0x128   : > { %2610 = vmatmul.mubr.msk.bf16.vlgmr.msra.gmra.mrb[36].mxu1 %vm474_vm2, %v2606_v48  ;;  %vm2327_vm2 = vcmp.le.s32.totalorder %v326_v43, 30 }
 0x18e   : > { %v3065_v53 = vpop.f32.mrb[0].mxu0 }
 0x18f   : > { %v3067_v54 = vpop.f32.mrb[1].mxu0 }
 0x190   : > { %v940_v55 = vpop.f32.mrb[2].mxu0 }
 0x191   : > { %v941_v56 = vpop.f32.mrb[3].mxu0  ;;  %v3102_v55 = vadd.s32 512, %v3081_v36 }
 0x193   : > { %v3069_v57 = vpop.f32.mrb[0].mxu1 }
 0x194   : > { %v3071_v58 = vpop.f32.mrb[1].mxu1 }
 0x195   : > { %v981_v59 = vpop.f32.mrb[2].mxu1 }
 0x196   : > { %v982_v60 = vpop.f32.mrb[3].mxu1 }
 0x197   : > { %v3073_v61 = vpop.f32.mrb[4].mxu0  ;;  %v347_v60 = vand.u32 31, %v3092_v45 }
 0x198   : > { %v3075_v62 = vpop.f32.mrb[5].mxu0 }
 0x199   : > { %v1022_v0 = vpop.f32.mrb[6].mxu0  ;;  %vm3132_vm12 = vcmp.ge.s32.totalorder %v347_v60, 1  ;;  %vm2330_vm5 = vcmp.le.s32.totalorder %v347_v60, 30 }
 0x19a   : > { %v1023_v63 = vpop.f32.mrb[7].mxu0  ;;  %v3112_v0 = vadd.s32 640, %v3081_v36 }
 0x19b   : > { %v3077_v1 = vpop.f32.mrb[4].mxu1 }
 0x19c   : > { %v3079_v2 = vpop.f32.mrb[5].mxu1 }
 0x19d   : > { %v1063_v3 = vpop.f32.mrb[6].mxu1 }
 0x19e   : > { %v1064_v4 = vpop.f32.mrb[7].mxu1 }
 0x19f   : > { %v1155_v5 = vpop.f32.mrb[8].mxu0 }
 0x1a0   : > { %v1157_v6 = vpop.f32.mrb[9].mxu0 }
 0x1a1   : > { %v1159_v7 = vpop.f32.mrb[10].mxu0 }
 0x1a2   : > { %v1160_v8 = vpop.f32.mrb[11].mxu0 }
 0x1a3   : > { %v1196_v9 = vpop.f32.mrb[8].mxu1 }
 0x1a4   : > { %v1198_v10 = vpop.f32.mrb[9].mxu1 }
 0x1a5   : > { %v1200_v11 = vpop.f32.mrb[10].mxu1 }
 0x1a6   : > { %v1201_v12 = vpop.f32.mrb[11].mxu1  ;;  %v3128_v11 = vadd.s32 768, %v3081_v36 }
 0x1a7   : > { %v1237_v13 = vpop.f32.mrb[12].mxu0 }
 0x1a8   : > { %v1239_v14 = vpop.f32.mrb[13].mxu0 }
 0x1a9   : > { %v1241_v15 = vpop.f32.mrb[14].mxu0 }
 0x1aa   : > { %v1242_v16 = vpop.f32.mrb[15].mxu0  ;;  %v3138_v15 = vadd.s32 896, %v3081_v36 }
 0x1ab   : > { %v1278_v17 = vpop.f32.mrb[12].mxu1 }
 0x1ac   : > { %v1280_v18 = vpop.f32.mrb[13].mxu1 }
 0x1ad   : > { %v1282_v19 = vpop.f32.mrb[14].mxu1 }
 0x1ae   : > { %v1283_v20 = vpop.f32.mrb[15].mxu1  ;;  %v1100_v19 = vsel %vm3119_vm11, %v3069_v57, 0.0 }
 0x1af   : > { %v1357_v22 = vpop.f32.mrb[16].mxu0 }
 0x1b0   : > { %v1358_v23 = vadd.f32 %v1357_v22, %v1155_v5  ;;  %v1359_v24 = vpop.f32.mrb[17].mxu0  ;;  %v1098_v5 = vsel %vm3097_vm9, %v3065_v53, 0.0  ;;  %v1101_v22 = vsel %vm3132_vm12, %v3071_v58, 0.0 }
 0x1b1   : > { %v1360_v33 = vadd.f32 %v1359_v24, %v1157_v6  ;;  %v1361_v34 = vpop.f32.mrb[18].mxu0 }
 0x1b2   : > { %v1362_v35 = vpop.f32.mrb[19].mxu0  ;;  %v375_v34 = vand.u32 31, %v3138_v15 }
 0x1b3   : > { %v1398_v27 = vpop.f32.mrb[16].mxu1 }
 0x1b4   : > { %v1399_v25 = vadd.f32 %v1398_v27, %v1196_v9  ;;  %v1400_v37 = vpop.f32.mrb[17].mxu1  ;;  %v1099_v9 = vsel %vm3106_vm10, %v3067_v54, 0.0  ;;  %vm1081_vm0 = vcmp.ge.s32.totalorder %v375_v34, 1  ;;  %vm3199_vm9 = vcmp.le.s32.totalorder %v375_v34, 30 }
 0x1b5   : > { %v1401_v31 = vadd.f32 %v1400_v37, %v1198_v10  ;;  %v1402_v29 = vpop.f32.mrb[18].mxu1  ;;  %v354_v10 = vand.u32 31, %v3102_v55  ;;  %vm2439_vm10 = vcmask 15360  }
 0x1b6   : > { %v1403_v38 = vpop.f32.mrb[19].mxu1 }
 0x1b7   : > { %v1439_v26 = vpop.f32.mrb[20].mxu0  ;;  %vm1078_vm13 = vcmp.ge.s32.totalorder %v354_v10, 1  ;;  %vm3179_vm6 = vcmp.le.s32.totalorder %v354_v10, 30 }
 0x1b8   : > { %v1440_v32 = vadd.f32 %v1439_v26, %v1237_v13  ;;  %v1441_v40 = vpop.f32.mrb[21].mxu0  ;;  %v1102_v37 = vsel %vm1078_vm13, %v3073_v61, 0.0  ;;  %v1105_v61 = vsel %vm1081_vm0, %v3079_v2, 0.0 }
 0x1b9   : > { %v1442_v41 = vadd.f32 %v1441_v40, %v1239_v14  ;;  %v1443_v42 = vpop.f32.mrb[22].mxu0  ;;  %v361_v14 = vand.u32 31, %v3112_v0 }
 0x1ba   : > { %v1444_v30 = vpop.f32.mrb[23].mxu0 }
 0x1bb   : > { %v1480_v46 = vpop.f32.mrb[20].mxu1  ;;  %vm1079_vm14 = vcmp.ge.s32.totalorder %v361_v14, 1  ;;  %vm3185_vm7 = vcmp.le.s32.totalorder %v361_v14, 30 }
 0x1bc   : > { %v1481_v47 = vadd.f32 %v1480_v46, %v1278_v17  ;;  %v1482_v48 = vpop.f32.mrb[21].mxu1  ;;  %v1103_v29 = vsel %vm1079_vm14, %v3075_v62, 0.0 }
 0x1bd   : > { %v1483_v50 = vadd.f32 %v1482_v48, %v1280_v18  ;;  %v1484_v51 = vpop.f32.mrb[22].mxu1 }
 0x1be   : > { %v1485_v56 = vpop.f32.mrb[23].mxu1 }
 0x1bf   : > { %v1561_v63 = vpop.f32.mrb[24].mxu0 }
 0x1c0   : > { %v1691_v3 = vadd.f32 %v1561_v63, %v1358_v23  ;;  %v1563_v4 = vpop.f32.mrb[25].mxu0  ;;  %v368_v23 = vand.u32 31, %v3128_v11 }
 0x1c1   : > { %v1692_v7 = vadd.f32 %v1563_v4, %v1360_v33  ;;  %v1565_v8 = vpop.f32.mrb[26].mxu0 }
 0x1c2   : > { %v1699_v12 = vadd.f32 %v1691_v3, %v1098_v5  ;;  %v1566_v13 = vpop.f32.mrb[27].mxu0  ;;  %vm1080_vm15 = vcmp.ge.s32.totalorder %v368_v23, 1  ;;  %vm3189_vm8 = vcmp.le.s32.totalorder %v368_v23, 30 }
 0x1c3   : > { %v1700_v16 = vadd.f32 %v1692_v7, %v1099_v9  ;;  %v1602_v54 = vpop.f32.mrb[24].mxu1  ;;  %v1104_v48 = vsel %vm1080_vm15, %v3077_v1, 0.0 }
 0x1c4   : > { %v1693_v17 = vadd.f32 %v1602_v54, %v1399_v25  ;;  %v1604_v18 = vpop.f32.mrb[25].mxu1 }
 0x1c5   : > { %v1694_v20 = vadd.f32 %v1604_v18, %v1401_v31  ;;  %v1606_v21 = vpop.f32.mrb[26].mxu1 }
 0x1c6   : > { %v1701_v24 = vadd.f32 %v1693_v17, %v1100_v19  ;;  %v1607_v33 = vpop.f32.mrb[27].mxu1 }
 0x1c7   : > { %v1702_v35 = vadd.f32 %v1694_v20, %v1101_v22  ;;  %v1643_v57 = vpop.f32.mrb[28].mxu0 }
 0x1c8   : > { %v1695_v27 = vadd.f32 %v1643_v57, %v1440_v32  ;;  %v1645_v25 = vpop.f32.mrb[29].mxu0 }
 0x1c9   : > { %v1696_v31 = vadd.f32 %v1645_v25, %v1442_v41  ;;  %v1647_v58 = vpop.f32.mrb[30].mxu0 }
 0x1ca   : > { %v1703_v38 = vadd.f32 %v1695_v27, %v1102_v37  ;;  %v1648_v26 = vpop.f32.mrb[31].mxu0 }
 0x1cb   : > { %v1704_v40 = vadd.f32 %v1696_v31, %v1103_v29  ;;  %v1684_v42 = vpop.f32.mrb[28].mxu1 }
 0x1cc   : > { %v1697_v30 = vadd.f32 %v1684_v42, %v1481_v47  ;;  %v1686_v46 = vpop.f32.mrb[29].mxu1 }
 0x1cd   : > { %v1698_v32 = vadd.f32 %v1686_v46, %v1483_v50  ;;  %v1688_v51 = vpop.f32.mrb[30].mxu1 }
 0x1ce   : > { %v3158_v41 = vadd.f32 %v1697_v30, %v1104_v48  ;;  %v1689_v62 = vpop.f32.mrb[31].mxu1 }
 0x1cf   : > { %v3160_v52 = vadd.f32 %v1698_v32, %v1105_v61 }
 0x1ef   : > { %v2189_v47 = vpop.f32.mrb[32].mxu0 }
 0x1f0   : > { %v2351_v56 = vsel %vm2327_vm2, %v2189_v47, 0.0  ;;  %v2191_v59 = vpop.f32.mrb[33].mxu0 }
 0x1f1   : > { %v2359_v1 = vadd.f32 %v2351_v56, %v1699_v12  ;;  %v2352_v50 = vsel %vm2328_vm3, %v2191_v59, 0.0  ;;  %v2193_v63 = vpop.f32.mrb[34].mxu0 }
 0x1f2   : > { %v2360_v2 = vadd.f32 %v2352_v50, %v1700_v16  ;;  %v2194_v3 = vpop.f32.mrb[35].mxu0 }
 0x1f3   : > { %v2367_v4 = vpack.c.bf16 %v2359_v1, %v2359_v1  ;;  %v2230_v36 = vpop.f32.mrb[32].mxu1 }
 0x1f4   : > { %v2368_v39 = vpack.c.bf16 %v2360_v2, %v2360_v2  ;;  %v2620_v43 = vpack.c.bf16 %v2360_v2, %v2359_v1  ;;  %v2353_v44 = vsel %vm2329_vm4, %v2230_v36, 0.0  ;;  %v2232_v5 = vpop.f32.mrb[33].mxu1 }
 0x1f5   : > { %v2403_v6 = vunpack.c.l.bf16 %v2367_v4  ;;  %v2361_v28 = vadd.f32 %v2353_v44, %v1701_v24  ;;  %v2354_v49 = vsel %vm2330_vm5, %v2232_v5, 0.0  ;;  %v2234_v7 = vpop.f32.mrb[34].mxu1 }
 0x1f6   : > { %2399 = vst [vmem:[%s3174_s29] sm:$0xff] %v2620_v43  ;;  %v2404_v8 = vunpack.c.l.bf16 %v2368_v39  ;;  %v2362_v45 = vadd.f32 %v2354_v49, %v1702_v35  ;;  %v2235_v60 = vpop.f32.mrb[35].mxu1 }
 0x1f7   : > { %v2420_v12 = vmul.f32 %v2403_v6, %v2403_v6  ;;  %v2369_v13 = vpack.c.bf16 %v2361_v28, %v2361_v28  ;;  %v2271_v53 = vpop.f32.mrb[36].mxu0 }
 0x1f8   : > { %v2411_v54 = vadd.f32 %v2404_v8, %v2403_v6  ;;  %v2421_v55 = vmul.f32 %v2404_v8, %v2404_v8  ;;  %v2370_v10 = vpack.c.bf16 %v2362_v45, %v2362_v45  ;;  %v2621_v17 = vpack.c.bf16 %v2362_v45, %v2361_v28  ;;  %v2273_v18 = vpop.f32.mrb[37].mxu0 }
 0x1f9   : > { %v2405_v19 = vunpack.c.l.bf16 %v2369_v13  ;;  %v2355_v0 = vsel %vm3179_vm6, %v2271_v53, 0.0  ;;  %v2356_v14 = vsel %vm3185_vm7, %v2273_v18, 0.0  ;;  %v2275_v20 = vpop.f32.mrb[38].mxu0 }
 0x1fa   : > { %v2428_v22 = vadd.f32 %v2421_v55, %v2420_v12  ;;  %2400 = vst [vmem:[%s3174_s29 + $0x8] sm:$0xff] %v2621_v17  ;;  %v2406_v23 = vunpack.c.l.bf16 %v2370_v10  ;;  %v2363_v24 = vadd.f32 %v2355_v0, %v1703_v38  ;;  %v2364_v33 = vadd.f32 %v2356_v14, %v1704_v40  ;;  %v2276_v35 = vpop.f32.mrb[39].mxu0 }
 0x1fb   : > { %v2412_v57 = vadd.f32 %v2411_v54, %v2405_v19  ;;  %v2422_v27 = vmul.f32 %v2405_v19, %v2405_v19  ;;  %v2312_v25 = vpop.f32.mrb[36].mxu1 }
 0x1fc   : > { %v2423_v37 = vmul.f32 %v2406_v23, %v2406_v23  ;;  %v2371_v31 = vpack.c.bf16 %v2363_v24, %v2363_v24  ;;  %v2372_v58 = vpack.c.bf16 %v2364_v33, %v2364_v33  ;;  %v2622_v29 = vpack.c.bf16 %v2364_v33, %v2363_v24  ;;  %v2314_v26 = vpop.f32.mrb[37].mxu1 }
 0x1fd   : > { %v2429_v15 = vadd.f32 %v2428_v22, %v2422_v27  ;;  %v2413_v34 = vadd.f32 %v2412_v57, %v2406_v23  ;;  %v2357_v42 = vsel %vm3189_vm8, %v2312_v25, 0.0  ;;  %v2358_v30 = vsel %vm3199_vm9, %v2314_v26, 0.0  ;;  %v2316_v38 = vpop.f32.mrb[38].mxu1 }
 0x1fe   : > { %v2407_v40 = vunpack.c.l.bf16 %v2371_v31  ;;  %2401 = vst [vmem:[%s3174_s29 + $0x10] sm:$0xff] %v2622_v29  ;;  %v2408_v46 = vunpack.c.l.bf16 %v2372_v58  ;;  %v2365_v48 = vadd.f32 %v2357_v42, %v3158_v41  ;;  %v2366_v32 = vadd.f32 %v2358_v30, %v3160_v52  ;;  %v2317_v51 = vpop.f32.mrb[39].mxu1 }
 0x1ff   : > { %v2430_v61 = vadd.f32 %v2429_v15, %v2423_v37 }
 0x200   : > { %v2414_v62 = vadd.f32 %v2413_v34, %v2407_v40  ;;  %v2424_v47 = vmul.f32 %v2407_v40, %v2407_v40  ;;  %v2425_v56 = vmul.f32 %v2408_v46, %v2408_v46  ;;  %v2373_v59 = vpack.c.bf16 %v2365_v48, %v2365_v48 }
 0x201   : > { %v2374_v1 = vpack.c.bf16 %v2366_v32, %v2366_v32  ;;  %v2623_v50 = vpack.c.bf16 %v2366_v32, %v2365_v48 }
 0x202   : > { %v2409_v63 = vunpack.c.l.bf16 %v2373_v59  ;;  %v2415_v2 = vadd.f32 %v2414_v62, %v2408_v46  ;;  %v2431_v3 = vadd.f32 %v2430_v61, %v2424_v47 }
 0x203   : > { %2402 = vst [vmem:[%s3174_s29 + $0x18] sm:$0xff] %v2623_v50  ;;  %v2410_v4 = vunpack.c.l.bf16 %v2374_v1 }
 0x204   : > { %v2416_v36 = vadd.f32 %v2415_v2, %v2409_v63  ;;  %v2426_v39 = vmul.f32 %v2409_v63, %v2409_v63  ;;  %v2432_v43 = vadd.f32 %v2431_v3, %v2425_v56 }
 0x205   : > { %v2427_v41 = vmul.f32 %v2410_v4, %v2410_v4 }
 0x206   : > { %v2417_v44 = vadd.f32 %v2416_v36, %v2410_v4  ;;  %v2433_v52 = vadd.f32 %v2432_v43, %v2426_v39 }
 0x208   : > { %2418 = vadd.xlane.f32.xlu0 %v2417_v44  ;;  %v2434_v5 = vadd.f32 %v2433_v52, %v2427_v41 }
 0x20a   : > { %2435 = vadd.xlane.f32.xlu1 %v2434_v5 }
 0x295   : > { %v2419_v6 = vpop.xlane.xlu0 %2418 }
 0x297   : > { %v2436_v28 = vpop.xlane.xlu1 %2435 }
 0x298   : > { %v2438_v49 = vsel %vm457_vm1, %v2419_v6, %v2436_v28 }
 0x299   : > { %2440 = vst.msk [vmem:[%s228_s6] sm:$0xff] %vm2439_vm10, %v2438_v49 }
 0x29a PF: > { %s15_s15 = sadd.s32 1, %s2727_s15  }
 0x29b   : > { %p12_p4 = scmp.ge.s32.totalorder %s15_s15, 4  }
 0x29d   :  { %14 = sbr.rel (!%p12_p4) target bundleno = 1 (0x1), region = 85 }

// kernel: expanding_path_forward.12
= control target key start
LH: loop header
LB: loop body
LE: loop exit
PB: predicated region body
PF: predicated region fallthrough
CT: control target
= control target key end

     0   :  { %s2988_s15 = smov 0   ;;  %s3560_s0 = inlined_call_operand.vmem [shape: bf16[2,8,1024], index: 0, kind: input, shape index: {}]   ;;  %s3561_s1 = inlined_call_operand.vmem [shape: f32[2,8,1], index: 1, kind: input, shape index: {}]   ;;  %s3562_s2 = inlined_call_operand.vmem [shape: bf16[3,3,8,8], index: 2, kind: input, shape index: {}]   ;;  %s3563_s3 = inlined_call_operand.vmem [shape: bf16[2,8,1024], index: 3, kind: output, shape index: {0}]   ;;  %s3564_s4 = inlined_call_operand.vmem [shape: f32[2,8,2], index: 4, kind: output, shape index: {1}]  }
   0x1 LB: > { %s2709_s16 = sadd.s32 4294967295, %s2952_s15   ;;  %p2713_p0 = scmp.ge.s32.totalorder %s2952_s15, 1  ;;  %s2952_s15 = sphi %s2988_s15, %s15_s15  }
   0x2   : > { %p165_p1 = scmp.lt.s32.totalorder %s2952_s15, 3 }
   0x4   : > { %p166_p2 = pnand %p2713_p0, %p165_p1 }
   0x5   : > { %v225_v0 = vld [vmem:[%s3561_s1] sm:$0xff] (!%p166_p2)  ;;  %v2954_v1 = vmov (!%p166_p2), 0   ;;  %v2719_v2 = vld [vmem:[%s3561_s1 + $0x8] sm:$0xff] (!%p166_p2)  ;;  %vm211_vm0 = vcmask (!%p166_p2), 265216   ;;  %p195_p3 = scmp.lt.s32.totalorder (!%p166_p2), %s2709_s16, 1  ;;  %s2955_s25 = smov (!%p166_p2), 1  }
   0x6   : > { %169 = sbr.rel (%p166_p2) target bundleno = 794 (0x31a), region = 32  ;;  %2927 = vset.pattern.permute.xlu0 (!%p166_p2), %v2954_v1  ;;  %210 = vst [vmem:[#allocation2] sm:$0xf] (!%p166_p2), %v2954_v1  ;;  %522 = vmatprep.mubr.bf16.mxu0 (!%p166_p2), %v2954_v1  ;;  %212 = vst.msk [vmem:[#allocation2 + $0x24] sm:$0xf] (!%p166_p2), %vm211_vm0, %v2954_v1  ;;  %s2956_s26 = smov (!%p166_p2), 33  }
   0x7   : > { %228 = vperm.xlu0 (!%p166_p2), %2927, %v225_v0   ;;  %563 = vmatprep.mubr.bf16.mxu1 (!%p166_p2), %v2954_v1  ;;  %s2957_s27 = smov (!%p166_p2), 97   ;;  %s2958_s28 = smov (!%p166_p2), 96   ;;  %vm452_vm1 = vcmask (!%p166_p2), 7168   ;;  %vm465_vm2 = vcmask (!%p166_p2), 1043456   ;;  %vm461_vm3 = vcmask (!%p166_p2), 64512   ;;  %vm672_vm4 = vcmask (!%p166_p2), 269312  }
   0x8   : > { %s2959_s29 = smov (!%p166_p2), 32   ;;  %s2960_s30 = smov (!%p166_p2), 127   ;;  %vm920_vm5 = vcmask (!%p166_p2), 793600   ;;  %vm1405_vm6 = vcmask (!%p166_p2), 261120   ;;  %vm1625_vm7 = vcmask (!%p166_p2), 785408   ;;  %vm1863_vm8 = vcmask (!%p166_p2), 1039360  }
   0x9   : > { %s2961_s5 = smov (!%p166_p2), 31   ;;  %s2962_s8 = smov (!%p166_p2), 95   ;;  %vm2081_vm9 = vcmask (!%p166_p2), 252928   ;;  %vm2301_vm10 = vcmask (!%p166_p2), 777216  }
   0xb   : > { %243 = vperm.xlu0 (!%p166_p2), %2927, %v2719_v2  }
   0xd   : > { %s3586_s16 = smov (!%p195_p3, %s2709_s16), 1  ;;  %v3069_v0 = vld [vmem:[#allocation2 + $0x24] ss:$0 sps:$4 sm:$0xff]  }
   0xe   : > { %s2836_s21 = sshll.u32 %s3586_s16, 5 }
   0xf   : > { %s199_s24 = scalar_lea.vmem %s3560_s0, %s2836_s21 }
  0x10   : > { %v213_v3 = vld [vmem:[%s199_s24] sm:$0xff]  ;;  %v214_v4 = vld [vmem:[%s199_s24 + $0x8] sm:$0xff]  ;;  %v215_v5 = vld [vmem:[%s199_s24 + $0x10] sm:$0xff] }
  0x11   : > { %v216_v6 = vld [vmem:[%s199_s24 + $0x18] sm:$0xff]  ;;  %v217_v7 = vunpack.c.l.bf16 %v213_v3  ;;  %v218_v8 = vunpack.c.h.bf16 %v213_v3  ;;  %v219_v9 = vunpack.c.l.bf16 %v214_v4  ;;  %v220_v10 = vunpack.c.h.bf16 %v214_v4 }
  0x12   : > { %v221_v12 = vunpack.c.l.bf16 %v215_v5  ;;  %v222_v13 = vunpack.c.h.bf16 %v215_v5  ;;  %v223_v14 = vunpack.c.l.bf16 %v216_v6  ;;  %v224_v15 = vunpack.c.h.bf16 %v216_v6 }
  0x86   : > { %v229_v11 = vpop.permute.xlu0 %228 }
  0x87   : > { %v231_v16 = vmul.f32 %v229_v11, %v217_v7  ;;  %v232_v17 = vmul.f32 %v229_v11, %v218_v8  ;;  %v233_v18 = vmul.f32 %v229_v11, %v219_v9  ;;  %v234_v19 = vmul.f32 %v229_v11, %v220_v10 }
  0x88   : > { %v235_v20 = vmul.f32 %v229_v11, %v221_v12  ;;  %v236_v21 = vmul.f32 %v229_v11, %v222_v13  ;;  %v237_v22 = vmul.f32 %v229_v11, %v223_v14  ;;  %v238_v23 = vmul.f32 %v229_v11, %v224_v15  ;;  %v2724_v13 = vld [vmem:[%s3562_s2 + $0xc] sm:$0xf] }
  0x8a   : > { %v244_v24 = vpop.permute.xlu0 %243 }
  0x8b   : > { %v246_v25 = vadd.f32 %v244_v24, %v231_v16  ;;  %v247_v26 = vadd.f32 %v244_v24, %v232_v17  ;;  %v248_v27 = vadd.f32 %v244_v24, %v233_v18  ;;  %v249_v28 = vadd.f32 %v244_v24, %v234_v19 }
  0x8c   : > { %v250_v29 = vadd.f32 %v244_v24, %v235_v20  ;;  %v251_v30 = vadd.f32 %v244_v24, %v236_v21  ;;  %v252_v31 = vadd.f32 %v244_v24, %v237_v22  ;;  %v253_v32 = vadd.f32 %v244_v24, %v238_v23 }
  0x8d   : > { %v254_v33 = vmax.f32 %v246_v25, 0.0  ;;  %v255_v34 = vmax.f32 %v247_v26, 0.0  ;;  %v256_v35 = vmax.f32 %v248_v27, 0.0  ;;  %v257_v36 = vmax.f32 %v249_v28, 0.0 }
  0x8e   : > { %v258_v37 = vmax.f32 %v250_v29, 0.0  ;;  %v259_v38 = vmax.f32 %v251_v30, 0.0  ;;  %v260_v39 = vmax.f32 %v252_v31, 0.0  ;;  %v261_v40 = vmax.f32 %v253_v32, 0.0 }
  0x8f   : > { %v2838_v41 = vpack.c.bf16 %v255_v34, %v254_v33  ;;  %v2839_v42 = vpack.c.bf16 %v257_v36, %v256_v35  ;;  %v3049_v58 = vpack.c.bf16 %v254_v33, %v254_v33  ;;  %v3053_v59 = vpack.c.bf16 %v256_v35, %v256_v35 }
  0x90   : > { %v2840_v43 = vpack.c.bf16 %v259_v38, %v258_v37  ;;  %v2841_v44 = vpack.c.bf16 %v261_v40, %v260_v39  ;;  %v3057_v60 = vpack.c.bf16 %v258_v37, %v258_v37  ;;  %v3059_v61 = vpack.c.bf16 %v255_v34, %v255_v34  ;;  %v408_v34 = vld [vmem:[%s3562_s2] sm:$0xf] }
  0x91   : > { %294 = vst [vmem:[#allocation2 + $0x4] sm:$0xff] %v2838_v41  ;;  %295 = vst [vmem:[#allocation2 + $0xc] sm:$0xff] %v2839_v42  ;;  %v3063_v62 = vpack.c.bf16 %v260_v39, %v260_v39  ;;  %v3065_v63 = vpack.c.bf16 %v257_v36, %v257_v36  ;;  %v3071_v2 = vpack.c.bf16 %v259_v38, %v259_v38 }
  0x92   : > { %296 = vst [vmem:[#allocation2 + $0x14] sm:$0xff] %v2840_v43  ;;  %297 = vst [vmem:[#allocation2 + $0x1c] sm:$0xff] %v2841_v44  ;;  %v3075_v3 = vpack.c.bf16 %v261_v40, %v261_v40 }
  0x98   : > { %v404_v45 = vld [vmem:[#allocation2 + $0x8] sm:$0xff]  ;;  %v403_v46 = vld [vmem:[#allocation2] sm:$0xff] }
  0x99   : > { %v3015_v47 = vcombine.low %v404_v45, %v404_v45  ;;  %v3017_v48 = vcombine.low %v403_v46, %v403_v46  ;;  %v405_v49 = vld [vmem:[#allocation2 + $0x10] sm:$0xff]  ;;  %v3023_v51 = vcombine.high %v403_v46, %v403_v46  ;;  %v406_v52 = vld [vmem:[#allocation2 + $0x18] sm:$0xff]  ;;  %v3029_v54 = vcombine.high %v404_v45, %v404_v45  ;;  %v3033_v55 = vld [vmem:[#allocation2 + $0x20] ss:$0 sps:$4 sm:$0xff]  }
  0x9a   : > { %v3021_v50 = vcombine.low %v405_v49, %v405_v49  ;;  %v3027_v53 = vcombine.low %v406_v52, %v406_v52  ;;  %v3035_v56 = vcombine.high %v405_v49, %v405_v49  ;;  %v3039_v57 = vcombine.high %v406_v52, %v406_v52 }
  0x9b   : > { %438 = vrot.lane.b32.xlu0 %v3015_v47, %s2955_s25  ;;  %434 = vrot.lane.b32.xlu1 %v3017_v48, %s2955_s25 }
  0x9f   : > { %442 = vrot.lane.b32.xlu0 %v3021_v50, %s2955_s25  ;;  %436 = vrot.lane.b32.xlu1 %v3023_v51, %s2955_s25 }
  0xa3   : > { %446 = vrot.lane.b32.xlu0 %v3027_v53, %s2955_s25  ;;  %440 = vrot.lane.b32.xlu1 %v3029_v54, %s2955_s25 }
  0xa7   : > { %450 = vrot.lane.b32.xlu0 %v3033_v55, %s2955_s25  ;;  %444 = vrot.lane.b32.xlu1 %v3035_v56, %s2955_s25 }
  0xab   : > { %656 = vrot.lane.b32.xlu0 %v3023_v51, %s2956_s26  ;;  %448 = vrot.lane.b32.xlu1 %v3039_v57, %s2955_s25 }
  0xaf   : > { %660 = vrot.lane.b32.xlu0 %v3029_v54, %s2956_s26  ;;  %654 = vrot.lane.b32.xlu1 %v3017_v48, %s2956_s26 }
  0xb3   : > { %664 = vrot.lane.b32.xlu0 %v3035_v56, %s2956_s26  ;;  %658 = vrot.lane.b32.xlu1 %v3015_v47, %s2956_s26 }
  0xb7   : > { %668 = vrot.lane.b32.xlu0 %v3039_v57, %s2956_s26  ;;  %662 = vrot.lane.b32.xlu1 %v3021_v50, %s2956_s26 }
  0xbb   : > { %902 = vrot.lane.b32.xlu0 %v3049_v58, %s2957_s27  ;;  %666 = vrot.lane.b32.xlu1 %v3027_v53, %s2956_s26 }
  0xbf   : > { %906 = vrot.lane.b32.xlu0 %v3053_v59, %s2957_s27  ;;  %670 = vrot.lane.b32.xlu1 %v3033_v55, %s2956_s26 }
  0xc3   : > { %910 = vrot.lane.b32.xlu0 %v3057_v60, %s2957_s27  ;;  %904 = vrot.lane.b32.xlu1 %v3059_v61, %s2957_s27 }
  0xc7   : > { %914 = vrot.lane.b32.xlu0 %v3063_v62, %s2957_s27  ;;  %908 = vrot.lane.b32.xlu1 %v3065_v63, %s2957_s27 }
  0xcb   : > { %918 = vrot.lane.b32.xlu0 %v3069_v0, %s2957_s27  ;;  %912 = vrot.lane.b32.xlu1 %v3071_v2, %s2957_s27 }
  0xcf   : > { %1623 = vrot.lane.b32.xlu0 %v3069_v0, %s2958_s28  ;;  %916 = vrot.lane.b32.xlu1 %v3075_v3, %s2957_s27 }
  0xd3   : > { %1389 = vrot.lane.b32.xlu0 %v3023_v51, %s2959_s29  ;;  %1861 = vrot.lane.b32.xlu1 %v3069_v0, %s2960_s30 }
  0xd7   : > { %1393 = vrot.lane.b32.xlu0 %v3029_v54, %s2959_s29  ;;  %1387 = vrot.lane.b32.xlu1 %v3017_v48, %s2959_s29 }
  0xdb   : > { %1397 = vrot.lane.b32.xlu0 %v3035_v56, %s2959_s29  ;;  %1391 = vrot.lane.b32.xlu1 %v3015_v47, %s2959_s29 }
  0xdf   : > { %1401 = vrot.lane.b32.xlu0 %v3039_v57, %s2959_s29  ;;  %1395 = vrot.lane.b32.xlu1 %v3021_v50, %s2959_s29 }
  0xe3   : > { %1607 = vrot.lane.b32.xlu0 %v3049_v58, %s2958_s28  ;;  %1399 = vrot.lane.b32.xlu1 %v3027_v53, %s2959_s29 }
  0xe7   : > { %1611 = vrot.lane.b32.xlu0 %v3053_v59, %s2958_s28  ;;  %1403 = vrot.lane.b32.xlu1 %v3033_v55, %s2959_s29 }
  0xeb   : > { %1615 = vrot.lane.b32.xlu0 %v3057_v60, %s2958_s28  ;;  %1609 = vrot.lane.b32.xlu1 %v3059_v61, %s2958_s28 }
  0xef   : > { %1619 = vrot.lane.b32.xlu0 %v3063_v62, %s2958_s28  ;;  %1613 = vrot.lane.b32.xlu1 %v3065_v63, %s2958_s28 }
  0xf3   : > { %1847 = vrot.lane.b32.xlu0 %v3059_v61, %s2960_s30  ;;  %1617 = vrot.lane.b32.xlu1 %v3071_v2, %s2958_s28 }
  0xf7   : > { %1851 = vrot.lane.b32.xlu0 %v3065_v63, %s2960_s30  ;;  %1621 = vrot.lane.b32.xlu1 %v3075_v3, %s2958_s28 }
  0xfb   : > { %1855 = vrot.lane.b32.xlu0 %v3071_v2, %s2960_s30  ;;  %1845 = vrot.lane.b32.xlu1 %v3049_v58, %s2960_s30 }
  0xff   : > { %1859 = vrot.lane.b32.xlu0 %v3075_v3, %s2960_s30  ;;  %1849 = vrot.lane.b32.xlu1 %v3053_v59, %s2960_s30 }
 0x103   : > { %2063 = vrot.lane.b32.xlu0 %v3017_v48, %s2961_s5  ;;  %1853 = vrot.lane.b32.xlu1 %v3057_v60, %s2960_s30 }
 0x107   : > { %2067 = vrot.lane.b32.xlu0 %v3015_v47, %s2961_s5  ;;  %1857 = vrot.lane.b32.xlu1 %v3063_v62, %s2960_s30  ;;  %s3510_s30 = scalar_lea.vmem %s3563_s3, %s2836_s21  ;;  %s2718_s21 = sshll.u32 %s3586_s16, 3 }
 0x108   : > { %s208_s7 = scalar_lea.vmem %s3564_s4, %s2718_s21 }
 0x10b   : > { %2071 = vrot.lane.b32.xlu0 %v3021_v50, %s2961_s5  ;;  %2065 = vrot.lane.b32.xlu1 %v3023_v51, %s2961_s5 }
 0x10d   : > { %v439_v4 = vpop.permute.xlu0 %438  ;;  %v435_v5 = vpop.permute.xlu1 %434 }
 0x10f   : > { %2075 = vrot.lane.b32.xlu0 %v3027_v53, %s2961_s5  ;;  %2069 = vrot.lane.b32.xlu1 %v3029_v54, %s2961_s5 }
 0x111   : > { %v443_v6 = vpop.permute.xlu0 %442  ;;  %v437_v7 = vpop.permute.xlu1 %436 }
 0x112   : > { %v454_v8 = vsel %vm452_vm1, %v437_v7, %v439_v4  ;;  %v453_v9 = vsel %vm452_vm1, %v435_v5, %v437_v7 }
 0x113   : > { %2079 = vrot.lane.b32.xlu0 %v3033_v55, %s2961_s5  ;;  %2073 = vrot.lane.b32.xlu1 %v3035_v56, %s2961_s5  ;;  %v467_v10 = vsel %vm465_vm2, %v453_v9, 0  ;;  %v2750_v55 = vld [vmem:[%s3562_s2 + $0x18] sm:$0xf] }
 0x114   : > { %2734 = vmatprep.subr.msk.bf16.mxu0 %vm465_vm2, %v454_v8 }
 0x115   : > { %491 = vmatpush1.bf16.msra.mxu0 %v467_v10  ;;  %v447_v11 = vpop.permute.xlu0 %446  ;;  %v441_v12 = vpop.permute.xlu1 %440 }
 0x116   : > { %v456_v14 = vsel %vm452_vm1, %v441_v12, %v443_v6  ;;  %v455_v15 = vsel %vm452_vm1, %v439_v4, %v441_v12 }
 0x117   : > { %2285 = vrot.lane.b32.xlu0 %v3059_v61, %s2962_s8  ;;  %2077 = vrot.lane.b32.xlu1 %v3039_v57, %s2961_s5  ;;  %v473_v16 = vsel %vm465_vm2, %v455_v15, 0 }
 0x118   : > { %2736 = vmatprep.subr.msk.bf16.mxu1 %vm465_vm2, %v456_v14  ;;  %2735 = vmatmul.mubr.msk.bf16.vlgmr.msra.gmra.mrb[0].mxu0 %vm461_vm3, %v2724_v13 }
 0x119   : > { %532 = vmatpush1.bf16.msra.mxu1 %v473_v16  ;;  %v451_v17 = vpop.permute.xlu0 %450  ;;  %v445_v18 = vpop.permute.xlu1 %444  ;;  %604 = vmatprep.mubr.bf16.mxu0 %v2954_v1  ;;  %v1200_v16 = vsel %vm465_vm2, %v3049_v58, 0 }
 0x11a   : > { %v457_v19 = vsel %vm452_vm1, %v443_v6, %v445_v18  ;;  %v458_v20 = vsel %vm452_vm1, %v445_v18, %v447_v11  ;;  %v1206_v18 = vsel %vm465_vm2, %v3053_v59, 0 }
 0x11b   : > { %v479_v21 = vsel %vm465_vm2, %v457_v19, 0  ;;  %2289 = vrot.lane.b32.xlu0 %v3065_v63, %s2962_s8  ;;  %2283 = vrot.lane.b32.xlu1 %v3049_v58, %s2962_s8  ;;  %v2769_v58 = vld [vmem:[%s3562_s2 + $0x10] sm:$0xf] }
 0x11c   : > { %2738 = vmatprep.subr.msk.bf16.mxu0 %vm465_vm2, %v458_v20  ;;  %2737 = vmatmul.mubr.msk.bf16.vlgmr.msra.gmra.mrb[0].mxu1 %vm461_vm3, %v2724_v13 }
 0x11d   : > { %573 = vmatpush1.bf16.msra.mxu0 %v479_v21  ;;  %v657_v22 = vpop.permute.xlu0 %656  ;;  %v449_v23 = vpop.permute.xlu1 %448  ;;  %645 = vmatprep.mubr.bf16.mxu1 %v2954_v1 }
 0x11e   : > { %v459_v24 = vsel %vm452_vm1, %v447_v11, %v449_v23  ;;  %v460_v25 = vsel %vm452_vm1, %v449_v23, %v451_v17 }
 0x11f   : > { %v485_v26 = vsel %vm465_vm2, %v459_v24, 0  ;;  %2293 = vrot.lane.b32.xlu0 %v3071_v2, %s2962_s8  ;;  %2287 = vrot.lane.b32.xlu1 %v3053_v59, %s2962_s8 }
 0x120   : > { %2740 = vmatprep.subr.msk.bf16.mxu1 %vm465_vm2, %v460_v25  ;;  %2739 = vmatmul.mubr.msk.bf16.vlgmr.msra.gmra.mrb[4].mxu0 %vm461_vm3, %v2724_v13 }
 0x121   : > { %614 = vmatpush1.bf16.msra.mxu1 %v485_v26  ;;  %v661_v27 = vpop.permute.xlu0 %660  ;;  %v655_v28 = vpop.permute.xlu1 %654  ;;  %740 = vmatprep.mubr.bf16.mxu0 %v2954_v1 }
 0x122   : > { %v673_v29 = vsel %vm672_vm4, %v655_v28, %v657_v22 }
 0x123   : > { %2297 = vrot.lane.b32.xlu0 %v3075_v3, %s2962_s8  ;;  %2291 = vrot.lane.b32.xlu1 %v3057_v60, %s2962_s8  ;;  %v685_v33 = vsel %vm465_vm2, %v673_v29, 0 }
 0x124   : > { %2741 = vmatmul.mubr.msk.bf16.vlgmr.msra.gmra.mrb[4].mxu1 %vm461_vm3, %v2724_v13 }
 0x125   : > { %v665_v30 = vpop.permute.xlu0 %664  ;;  %v659_v31 = vpop.permute.xlu1 %658  ;;  %781 = vmatprep.mubr.bf16.mxu1 %v2954_v1 }
 0x126   : > { %v674_v32 = vsel %vm672_vm4, %v657_v22, %v659_v31  ;;  %v675_v35 = vsel %vm672_vm4, %v659_v31, %v661_v27  ;;  %v2768_v31 = vld [vmem:[%s3562_s2 + $0x4] sm:$0xf] }
 0x127   : > { %2295 = vrot.lane.b32.xlu1 %v3063_v62, %s2962_s8  ;;  %2742 = vmatprep.subr.msk.bf16.mxu0 %vm465_vm2, %v674_v32  ;;  %v691_v39 = vsel %vm465_vm2, %v675_v35, 0 }
 0x128   : > { %709 = vmatpush1.bf16.msra.mxu0 %v685_v33 }
 0x129   : > { %v669_v36 = vpop.permute.xlu0 %668  ;;  %v663_v37 = vpop.permute.xlu1 %662 }
 0x12a   : > { %v676_v38 = vsel %vm672_vm4, %v661_v27, %v663_v37  ;;  %v677_v40 = vsel %vm672_vm4, %v663_v37, %v665_v30 }
 0x12b   : > { %2299 = vrot.lane.b32.xlu1 %v3069_v0, %s2962_s8  ;;  %2743 = vmatmul.mubr.msk.bf16.vlgmr.msra.gmra.mrb[0].mxu0 %vm461_vm3, %v408_v34  ;;  %v697_v44 = vsel %vm465_vm2, %v677_v40, 0 }
 0x12c   : > { %2744 = vmatprep.subr.msk.bf16.mxu1 %vm465_vm2, %v676_v38  ;;  %822 = vmatprep.mubr.bf16.mxu0 %v2954_v1 }
 0x12d   : > { %750 = vmatpush1.bf16.msra.mxu1 %v691_v39  ;;  %v903_v41 = vpop.permute.xlu0 %902  ;;  %v667_v42 = vpop.permute.xlu1 %666 }
 0x12e   : > { %v678_v43 = vsel %vm672_vm4, %v665_v30, %v667_v42  ;;  %v679_v45 = vsel %vm672_vm4, %v667_v42, %v669_v36 }
 0x12f   : > { %2746 = vmatprep.subr.msk.bf16.mxu0 %vm465_vm2, %v678_v43  ;;  %v703_v49 = vsel %vm465_vm2, %v679_v45, 0 }
 0x130   : > { %2745 = vmatmul.mubr.msk.bf16.vlgmr.msra.gmra.mrb[0].mxu1 %vm461_vm3, %v408_v34  ;;  %791 = vmatpush1.bf16.msra.mxu0 %v697_v44 }
 0x131   : > { %v907_v46 = vpop.permute.xlu0 %906  ;;  %v671_v47 = vpop.permute.xlu1 %670  ;;  %863 = vmatprep.mubr.bf16.mxu1 %v2954_v1 }
 0x132   : > { %v680_v48 = vsel %vm672_vm4, %v669_v36, %v671_v47 }
 0x133   : > { %2747 = vmatmul.mubr.msk.bf16.vlgmr.msra.gmra.mrb[4].mxu0 %vm461_vm3, %v408_v34  ;;  %2748 = vmatprep.subr.msk.bf16.mxu1 %vm465_vm2, %v680_v48 }
 0x134   : > { %832 = vmatpush1.bf16.msra.mxu1 %v703_v49  ;;  %988 = vmatprep.mubr.bf16.mxu0 %v2954_v1 }
 0x135   : > { %v911_v50 = vpop.permute.xlu0 %910  ;;  %v905_v51 = vpop.permute.xlu1 %904 }
 0x136   : > { %v921_v52 = vsel %vm920_vm5, %v903_v41, %v905_v51  ;;  %v922_v53 = vsel %vm920_vm5, %v905_v51, %v907_v46 }
 0x137   : > { %v933_v54 = vsel %vm465_vm2, %v921_v52, 0  ;;  %2760 = vmatprep.subr.msk.bf16.mxu0 %vm465_vm2, %v922_v53  ;;  %v2794_v52 = vld [vmem:[%s3562_s2 + $0x1c] sm:$0xf] }
 0x138   : > { %2749 = vmatmul.mubr.msk.bf16.vlgmr.msra.gmra.mrb[4].mxu1 %vm461_vm3, %v408_v34  ;;  %957 = vmatpush1.bf16.msra.mxu0 %v933_v54 }
 0x139   : > { %v915_v56 = vpop.permute.xlu0 %914  ;;  %v909_v57 = vpop.permute.xlu1 %908  ;;  %1029 = vmatprep.mubr.bf16.mxu1 %v2954_v1 }
 0x13a   : > { %v923_v0 = vsel %vm920_vm5, %v907_v46, %v909_v57  ;;  %v924_v4 = vsel %vm920_vm5, %v909_v57, %v911_v50 }
 0x13b   : > { %v939_v5 = vsel %vm465_vm2, %v923_v0, 0  ;;  %2761 = vmatmul.mubr.msk.bf16.vlgmr.msra.gmra.mrb[0].mxu0 %vm461_vm3, %v2750_v55  ;;  %2762 = vmatprep.subr.msk.bf16.mxu1 %vm465_vm2, %v924_v4 }
 0x13c   : > { %998 = vmatpush1.bf16.msra.mxu1 %v939_v5  ;;  %1070 = vmatprep.mubr.bf16.mxu0 %v2954_v1 }
 0x13d   : > { %v919_v6 = vpop.permute.xlu0 %918  ;;  %v913_v7 = vpop.permute.xlu1 %912 }
 0x13e   : > { %v925_v8 = vsel %vm920_vm5, %v911_v50, %v913_v7  ;;  %v926_v9 = vsel %vm920_vm5, %v913_v7, %v915_v56 }
 0x13f   : > { %v945_v10 = vsel %vm465_vm2, %v925_v8, 0  ;;  %2764 = vmatprep.subr.msk.bf16.mxu0 %vm465_vm2, %v926_v9 }
 0x140   : > { %2763 = vmatmul.mubr.msk.bf16.vlgmr.msra.gmra.mrb[0].mxu1 %vm461_vm3, %v2750_v55  ;;  %1039 = vmatpush1.bf16.msra.mxu0 %v945_v10 }
 0x141   : > { %v3213_v11 = vpop.permute.xlu0 %1623  ;;  %2778 = vmatprep.subr.msk.bf16.mxu0 %vm465_vm2, %v3059_v61  ;;  %v917_v12 = vpop.permute.xlu1 %916  ;;  %1111 = vmatprep.mubr.bf16.mxu1 %v2954_v1 }
 0x142   : > { %v927_v13 = vsel %vm920_vm5, %v915_v56, %v917_v12  ;;  %v928_v14 = vsel %vm920_vm5, %v917_v12, %v919_v6 }
 0x143   : > { %v951_v15 = vsel %vm465_vm2, %v927_v13, 0  ;;  %2765 = vmatmul.mubr.msk.bf16.vlgmr.msra.gmra.mrb[4].mxu0 %vm461_vm3, %v2750_v55  ;;  %2766 = vmatprep.subr.msk.bf16.mxu1 %vm465_vm2, %v928_v14 }
 0x144   : > { %1080 = vmatpush1.bf16.msra.mxu1 %v951_v15  ;;  %1224 = vmatpush1.bf16.msra.mxu0 %v1200_v16 }
 0x145   : > { %v1390_v17 = vpop.permute.xlu0 %1389  ;;  %2780 = vmatprep.subr.msk.bf16.mxu1 %vm465_vm2, %v3065_v63  ;;  %2782 = vmatprep.subr.msk.bf16.mxu0 %vm465_vm2, %v3071_v2  ;;  %v3229_v61 = vpop.permute.xlu1 %1861  ;;  %v1212_v63 = vsel %vm465_vm2, %v3057_v60, 0 }
 0x146   : > { %1255 = vmatprep.mubr.bf16.mxu0 %v2954_v1 }
 0x148   : > { %2767 = vmatmul.mubr.msk.bf16.vlgmr.msra.gmra.mrb[4].mxu1 %vm461_vm3, %v2750_v55 }
 0x149   : > { %1265 = vmatpush1.bf16.msra.mxu1 %v1206_v18  ;;  %v1394_v19 = vpop.permute.xlu0 %1393  ;;  %v1388_v20 = vpop.permute.xlu1 %1387  ;;  %1296 = vmatprep.mubr.bf16.mxu1 %v2954_v1 }
 0x14a   : > { %2784 = vmatprep.subr.msk.bf16.mxu1 %vm465_vm2, %v3075_v3  ;;  %v1406_v22 = vsel %vm1405_vm6, %v1388_v20, %v1390_v17  ;;  %v1218_v3 = vsel %vm465_vm2, %v3063_v62, 0 }
 0x14b   : > { %2779 = vmatmul.mubr.msk.bf16.vlgmr.msra.gmra.mrb[8].mxu0 %vm461_vm3, %v2769_v58  ;;  %v1418_v25 = vsel %vm465_vm2, %v1406_v22, 0 }
 0x14c   : > { %1306 = vmatpush1.bf16.msra.mxu0 %v1212_v63  ;;  %1337 = vmatprep.mubr.bf16.mxu0 %v2954_v1 }
 0x14d   : > { %v1398_v59 = vpop.permute.xlu0 %1397  ;;  %v1392_v2 = vpop.permute.xlu1 %1391 }
 0x14e   : > { %v1407_v21 = vsel %vm1405_vm6, %v1390_v17, %v1392_v2  ;;  %v1408_v26 = vsel %vm1405_vm6, %v1392_v2, %v1394_v19  ;;  %v2804_v17 = vld [vmem:[%s3562_s2 + $0x14] sm:$0xf] }
 0x14f   : > { %2786 = vmatprep.subr.msk.bf16.mxu0 %vm465_vm2, %v1407_v21  ;;  %v1424_v29 = vsel %vm465_vm2, %v1408_v26, 0 }
 0x150   : > { %2781 = vmatmul.mubr.msk.bf16.vlgmr.msra.gmra.mrb[8].mxu1 %vm461_vm3, %v2769_v58 }
 0x151   : > { %1347 = vmatpush1.bf16.msra.mxu1 %v1218_v3  ;;  %v1402_v23 = vpop.permute.xlu0 %1401  ;;  %v1396_v60 = vpop.permute.xlu1 %1395  ;;  %1378 = vmatprep.mubr.bf16.mxu1 %v2954_v1 }
 0x152   : > { %v1409_v24 = vsel %vm1405_vm6, %v1394_v19, %v1396_v60  ;;  %v1410_v30 = vsel %vm1405_vm6, %v1396_v60, %v1398_v59 }
 0x153   : > { %2783 = vmatmul.mubr.msk.bf16.vlgmr.msra.gmra.mrb[12].mxu0 %vm461_vm3, %v2769_v58  ;;  %2788 = vmatprep.subr.msk.bf16.mxu1 %vm465_vm2, %v1409_v24  ;;  %v1430_v35 = vsel %vm465_vm2, %v1410_v30, 0 }
 0x154   : > { %1442 = vmatpush1.bf16.msra.mxu0 %v1418_v25  ;;  %1473 = vmatprep.mubr.bf16.mxu0 %v2954_v1 }
 0x155   : > { %v1608_v27 = vpop.permute.xlu0 %1607  ;;  %v1400_v62 = vpop.permute.xlu1 %1399 }
 0x156   : > { %v1411_v28 = vsel %vm1405_vm6, %v1398_v59, %v1400_v62  ;;  %v1412_v36 = vsel %vm1405_vm6, %v1400_v62, %v1402_v23 }
 0x157   : > { %2790 = vmatprep.subr.msk.bf16.mxu0 %vm465_vm2, %v1411_v28  ;;  %v1436_v40 = vsel %vm465_vm2, %v1412_v36, 0 }
 0x158   : > { %2785 = vmatmul.mubr.msk.bf16.vlgmr.msra.gmra.mrb[12].mxu1 %vm461_vm3, %v2769_v58 }
 0x159   : > { %1483 = vmatpush1.bf16.msra.mxu1 %v1424_v29  ;;  %v1612_v32 = vpop.permute.xlu0 %1611  ;;  %v1404_v33 = vpop.permute.xlu1 %1403  ;;  %1514 = vmatprep.mubr.bf16.mxu1 %v2954_v1 }
 0x15a   : > { %v1413_v34 = vsel %vm1405_vm6, %v1402_v23, %v1404_v33 }
 0x15b   : > { %2787 = vmatmul.mubr.msk.bf16.vlgmr.msra.gmra.mrb[16].mxu0 %vm461_vm3, %v2768_v31  ;;  %2792 = vmatprep.subr.msk.bf16.mxu1 %vm465_vm2, %v1413_v34 }
 0x15c   : > { %1524 = vmatpush1.bf16.msra.mxu0 %v1430_v35  ;;  %1555 = vmatprep.mubr.bf16.mxu0 %v2954_v1 }
 0x15d   : > { %v1616_v37 = vpop.permute.xlu0 %1615  ;;  %v1610_v38 = vpop.permute.xlu1 %1609 }
 0x15e   : > { %v1627_v39 = vsel %vm1625_vm7, %v1610_v38, %v1612_v32  ;;  %v1626_v41 = vsel %vm1625_vm7, %v1608_v27, %v1610_v38 }
 0x15f   : > { %2795 = vmatprep.subr.msk.bf16.mxu0 %vm465_vm2, %v1627_v39  ;;  %v1638_v45 = vsel %vm465_vm2, %v1626_v41, 0 }
 0x160   : > { %2789 = vmatmul.mubr.msk.bf16.vlgmr.msra.gmra.mrb[16].mxu1 %vm461_vm3, %v2768_v31 }
 0x161   : > { %1565 = vmatpush1.bf16.msra.mxu1 %v1436_v40  ;;  %v1620_v42 = vpop.permute.xlu0 %1619  ;;  %v1614_v43 = vpop.permute.xlu1 %1613  ;;  %1596 = vmatprep.mubr.bf16.mxu1 %v2954_v1 }
 0x162   : > { %v1629_v44 = vsel %vm1625_vm7, %v1614_v43, %v1616_v37  ;;  %v1628_v46 = vsel %vm1625_vm7, %v1612_v32, %v1614_v43 }
 0x163   : > { %2791 = vmatmul.mubr.msk.bf16.vlgmr.msra.gmra.mrb[20].mxu0 %vm461_vm3, %v2768_v31  ;;  %2797 = vmatprep.subr.msk.bf16.mxu1 %vm465_vm2, %v1629_v44  ;;  %v1644_v50 = vsel %vm465_vm2, %v1628_v46, 0 }
 0x164   : > { %1662 = vmatpush1.bf16.msra.mxu0 %v1638_v45  ;;  %1693 = vmatprep.mubr.bf16.mxu0 %v2954_v1 }
 0x165   : > { %v1848_v47 = vpop.permute.xlu0 %1847  ;;  %v1618_v48 = vpop.permute.xlu1 %1617 }
 0x166   : > { %v1631_v49 = vsel %vm1625_vm7, %v1618_v48, %v1620_v42  ;;  %v1630_v51 = vsel %vm1625_vm7, %v1616_v37, %v1618_v48 }
 0x167   : > { %2799 = vmatprep.subr.msk.bf16.mxu0 %vm465_vm2, %v1631_v49  ;;  %v1650_v56 = vsel %vm465_vm2, %v1630_v51, 0 }
 0x168   : > { %2793 = vmatmul.mubr.msk.bf16.vlgmr.msra.gmra.mrb[20].mxu1 %vm461_vm3, %v2768_v31  ;;  %v2803_v31 = vld [vmem:[%s3562_s2 + $0x8] sm:$0xf] }
 0x169   : > { %1703 = vmatpush1.bf16.msra.mxu1 %v1644_v50  ;;  %v1852_v53 = vpop.permute.xlu0 %1851  ;;  %v1622_v54 = vpop.permute.xlu1 %1621  ;;  %1734 = vmatprep.mubr.bf16.mxu1 %v2954_v1  ;;  %v2821_v50 = vld [vmem:[%s3562_s2 + $0x20] sm:$0xf] }
 0x16a   : > { %v1633_v55 = vsel %vm1625_vm7, %v1622_v54, %v3213_v11  ;;  %v1632_v57 = vsel %vm1625_vm7, %v1620_v42, %v1622_v54 }
 0x16b   : > { %2796 = vmatmul.mubr.msk.bf16.vlgmr.msra.gmra.mrb[24].mxu0 %vm461_vm3, %v2794_v52  ;;  %2801 = vmatprep.subr.msk.bf16.mxu1 %vm465_vm2, %v1633_v55  ;;  %v1656_v5 = vsel %vm465_vm2, %v1632_v57, 0 }
 0x16c   : > { %1744 = vmatpush1.bf16.msra.mxu0 %v1650_v56  ;;  %1775 = vmatprep.mubr.bf16.mxu0 %v2954_v1 }
 0x16d   : > { %v1856_v0 = vpop.permute.xlu0 %1855  ;;  %v1846_v4 = vpop.permute.xlu1 %1845 }
 0x16e   : > { %v1864_v6 = vsel %vm1863_vm8, %v1846_v4, %v1848_v47 }
 0x16f   : > { %v1876_v10 = vsel %vm465_vm2, %v1864_v6, 0 }
 0x170   : > { %2798 = vmatmul.mubr.msk.bf16.vlgmr.msra.gmra.mrb[24].mxu1 %vm461_vm3, %v2794_v52 }
 0x171   : > { %1785 = vmatpush1.bf16.msra.mxu1 %v1656_v5  ;;  %v1860_v7 = vpop.permute.xlu0 %1859  ;;  %v1850_v8 = vpop.permute.xlu1 %1849  ;;  %1816 = vmatprep.mubr.bf16.mxu1 %v2954_v1 }
 0x172   : > { %v1865_v9 = vsel %vm1863_vm8, %v1848_v47, %v1850_v8  ;;  %v1866_v11 = vsel %vm1863_vm8, %v1850_v8, %v1852_v53  ;;  %v1871_v18 = vsel %vm1863_vm8, %v1860_v7, %v3229_v61 }
 0x173   : > { %2800 = vmatmul.mubr.msk.bf16.vlgmr.msra.gmra.mrb[28].mxu0 %vm461_vm3, %v2794_v52  ;;  %2805 = vmatprep.subr.msk.bf16.mxu0 %vm465_vm2, %v1865_v9  ;;  %v1882_v15 = vsel %vm465_vm2, %v1866_v11, 0 }
 0x174   : > { %1900 = vmatpush1.bf16.msra.mxu0 %v1876_v10  ;;  %1931 = vmatprep.mubr.bf16.mxu0 %v2954_v1 }
 0x175   : > { %v2064_v12 = vpop.permute.xlu0 %2063  ;;  %v1854_v13 = vpop.permute.xlu1 %1853 }
 0x176   : > { %v1867_v14 = vsel %vm1863_vm8, %v1852_v53, %v1854_v13  ;;  %v1868_v16 = vsel %vm1863_vm8, %v1854_v13, %v1856_v0 }
 0x177   : > { %2807 = vmatprep.subr.msk.bf16.mxu1 %vm465_vm2, %v1867_v14  ;;  %v1888_v63 = vsel %vm465_vm2, %v1868_v16, 0 }
 0x178   : > { %2802 = vmatmul.mubr.msk.bf16.vlgmr.msra.gmra.mrb[28].mxu1 %vm461_vm3, %v2794_v52 }
 0x179   : > { %1941 = vmatpush1.bf16.msra.mxu1 %v1882_v15  ;;  %v2068_v58 = vpop.permute.xlu0 %2067  ;;  %v1858_v19 = vpop.permute.xlu1 %1857  ;;  %1972 = vmatprep.mubr.bf16.mxu1 %v2954_v1 }
 0x17a   : > { %2811 = vmatprep.subr.msk.bf16.mxu1 %vm465_vm2, %v1871_v18  ;;  %v1869_v20 = vsel %vm1863_vm8, %v1856_v0, %v1858_v19  ;;  %v1870_v61 = vsel %vm1863_vm8, %v1858_v19, %v1860_v7 }
 0x17b   : > { %2806 = vmatmul.mubr.msk.bf16.vlgmr.msra.gmra.mrb[32].mxu0 %vm461_vm3, %v2804_v17  ;;  %2809 = vmatprep.subr.msk.bf16.mxu0 %vm465_vm2, %v1869_v20  ;;  %v1894_v22 = vsel %vm465_vm2, %v1870_v61, 0 }
 0x17c   : > { %1982 = vmatpush1.bf16.msra.mxu0 %v1888_v63  ;;  %2013 = vmatprep.mubr.bf16.mxu0 %v2954_v1 }
 0x17d   : > { %v2072_v59 = vpop.permute.xlu0 %2071  ;;  %v2066_v2 = vpop.permute.xlu1 %2065 }
 0x17e   : > { %v2083_v21 = vsel %vm2081_vm9, %v2066_v2, %v2068_v58  ;;  %v2082_v3 = vsel %vm2081_vm9, %v2064_v12, %v2066_v2 }
 0x17f   : > { %2813 = vmatprep.subr.msk.bf16.mxu0 %vm465_vm2, %v2083_v21  ;;  %v2094_v25 = vsel %vm465_vm2, %v2082_v3, 0 }
 0x180   : > { %2808 = vmatmul.mubr.msk.bf16.vlgmr.msra.gmra.mrb[32].mxu1 %vm461_vm3, %v2804_v17 }
 0x181   : > { %2023 = vmatpush1.bf16.msra.mxu1 %v1894_v22  ;;  %v2076_v23 = vpop.permute.xlu0 %2075  ;;  %v2070_v60 = vpop.permute.xlu1 %2069  ;;  %2054 = vmatprep.mubr.bf16.mxu1 %v2954_v1 }
 0x182   : > { %v2085_v24 = vsel %vm2081_vm9, %v2070_v60, %v2072_v59  ;;  %v2084_v26 = vsel %vm2081_vm9, %v2068_v58, %v2070_v60 }
 0x183   : > { %2810 = vmatmul.mubr.msk.bf16.vlgmr.msra.gmra.mrb[36].mxu0 %vm461_vm3, %v2804_v17  ;;  %2815 = vmatprep.subr.msk.bf16.mxu1 %vm465_vm2, %v2085_v24  ;;  %v2100_v29 = vsel %vm465_vm2, %v2084_v26, 0 }
 0x184   : > { %2118 = vmatpush1.bf16.msra.mxu0 %v2094_v25  ;;  %2149 = vmatprep.mubr.bf16.mxu0 %v2954_v1 }
 0x185   : > { %v2080_v27 = vpop.permute.xlu0 %2079  ;;  %v2074_v62 = vpop.permute.xlu1 %2073 }
 0x186   : > { %v2087_v28 = vsel %vm2081_vm9, %v2074_v62, %v2076_v23  ;;  %v2086_v30 = vsel %vm2081_vm9, %v2072_v59, %v2074_v62 }
 0x187   : > { %2817 = vmatprep.subr.msk.bf16.mxu0 %vm465_vm2, %v2087_v28  ;;  %v2106_v35 = vsel %vm465_vm2, %v2086_v30, 0 }
 0x188   : > { %2812 = vmatmul.mubr.msk.bf16.vlgmr.msra.gmra.mrb[36].mxu1 %vm461_vm3, %v2804_v17 }
 0x189   : > { %2159 = vmatpush1.bf16.msra.mxu1 %v2100_v29  ;;  %v2078_v32 = vpop.permute.xlu1 %2077  ;;  %2190 = vmatprep.mubr.bf16.mxu1 %v2954_v1  ;;  %v2286_v33 = vpop.permute.xlu0 %2285 }
 0x18a   : > { %v2089_v34 = vsel %vm2081_vm9, %v2078_v32, %v2080_v27  ;;  %v2088_v36 = vsel %vm2081_vm9, %v2076_v23, %v2078_v32  ;;  %v298_v27 = vlaneseq }
 0x18b   : > { %2814 = vmatmul.mubr.msk.bf16.vlgmr.msra.gmra.mrb[32].mxu0 %vm461_vm3, %v2803_v31  ;;  %2819 = vmatprep.subr.msk.bf16.mxu1 %vm465_vm2, %v2089_v34  ;;  %v2112_v38 = vsel %vm465_vm2, %v2088_v36, 0 }
 0x18c   : > { %2200 = vmatpush1.bf16.msra.mxu0 %v2106_v35  ;;  %2231 = vmatprep.mubr.bf16.mxu0 %v2954_v1  ;;  %v3404_v34 = vand.u32 127, %v298_v27 }
 0x18d   : > { %v2284_v37 = vpop.permute.xlu1 %2283  ;;  %v2290_v39 = vpop.permute.xlu0 %2289 }
 0x18e   : > { %v2302_v40 = vsel %vm2301_vm10, %v2284_v37, %v2286_v33 }
 0x18f   : > { %v2314_v43 = vsel %vm465_vm2, %v2302_v40, 0  ;;  %v3407_v40 = vadd.s32 128, %v3404_v34 }
 0x190   : > { %2816 = vmatmul.mubr.msk.bf16.vlgmr.msra.gmra.mrb[32].mxu1 %vm461_vm3, %v2803_v31 }
 0x191   : > { %2241 = vmatpush1.bf16.msra.mxu1 %v2112_v38  ;;  %v2288_v41 = vpop.permute.xlu1 %2287  ;;  %2272 = vmatprep.mubr.bf16.mxu1 %v2954_v1  ;;  %v2294_v46 = vpop.permute.xlu0 %2293 }
 0x192   : > { %v2303_v42 = vsel %vm2301_vm10, %v2286_v33, %v2288_v41  ;;  %v2304_v44 = vsel %vm2301_vm10, %v2288_v41, %v2290_v39 }
 0x193   : > { %2818 = vmatmul.mubr.msk.bf16.vlgmr.msra.gmra.mrb[36].mxu0 %vm461_vm3, %v2803_v31  ;;  %2822 = vmatprep.subr.msk.bf16.mxu0 %vm465_vm2, %v2303_v42  ;;  %v2320_v48 = vsel %vm465_vm2, %v2304_v44, 0 }
 0x194   : > { %2338 = vmatpush1.bf16.msra.mxu0 %v2314_v43  ;;  %2369 = vmatprep.mubr.bf16.mxu0 %v2954_v1 }
 0x195   : > { %v2292_v45 = vpop.permute.xlu1 %2291  ;;  %v2298_v54 = vpop.permute.xlu0 %2297 }
 0x196   : > { %v2305_v47 = vsel %vm2301_vm10, %v2290_v39, %v2292_v45  ;;  %v2306_v49 = vsel %vm2301_vm10, %v2292_v45, %v2294_v46 }
 0x197   : > { %2824 = vmatprep.subr.msk.bf16.mxu1 %vm465_vm2, %v2305_v47  ;;  %v2326_v53 = vsel %vm465_vm2, %v2306_v49, 0  ;;  %v311_v47 = vand.u32 31, %v3404_v34  ;;  %v318_v49 = vand.u32 31, %v3407_v40 }
 0x198   : > { %2820 = vmatmul.mubr.msk.bf16.vlgmr.msra.gmra.mrb[36].mxu1 %vm461_vm3, %v2803_v31 }
 0x199   : > { %2379 = vmatpush1.bf16.msra.mxu1 %v2320_v48  ;;  %v2296_v51 = vpop.permute.xlu1 %2295  ;;  %2410 = vmatprep.mubr.bf16.mxu1 %v2954_v1  ;;  %vm3419_vm11 = vcmp.ge.s32.totalorder %v311_v47, 1  ;;  %vm3428_vm12 = vcmp.ge.s32.totalorder %v318_v49, 1  ;;  %vm2509_vm4 = vcmp.le.s32.totalorder %v311_v47, 30  ;;  %vm2510_vm5 = vcmp.le.s32.totalorder %v318_v49, 30 }
 0x19a   : > { %v2307_v52 = vsel %vm2301_vm10, %v2294_v46, %v2296_v51  ;;  %v2308_v55 = vsel %vm2301_vm10, %v2296_v51, %v2298_v54  ;;  %v3415_v51 = vadd.s32 384, %v3404_v34 }
 0x19b   : > { %2823 = vmatmul.mubr.msk.bf16.vlgmr.msra.gmra.mrb[32].mxu0 %vm461_vm3, %v2821_v50  ;;  %2826 = vmatprep.subr.msk.bf16.mxu0 %vm465_vm2, %v2307_v52  ;;  %v2332_v0 = vsel %vm465_vm2, %v2308_v55, 0 }
 0x19c   : > { %2420 = vmatpush1.bf16.msra.mxu0 %v2326_v53  ;;  %2451 = vmatprep.mubr.bf16.mxu0 %v2954_v1 }
 0x19d   : > { %v2300_v56 = vpop.permute.xlu1 %2299 }
 0x19e   : > { %v2309_v57 = vsel %vm2301_vm10, %v2298_v54, %v2300_v56  ;;  %v3424_v56 = vadd.s32 512, %v3404_v34 }
 0x19f   : > { %2828 = vmatprep.subr.msk.bf16.mxu1 %vm465_vm2, %v2309_v57 }
 0x1a0   : > { %2825 = vmatmul.mubr.msk.bf16.vlgmr.msra.gmra.mrb[32].mxu1 %vm461_vm3, %v2821_v50 }
 0x1a1   : > { %2461 = vmatpush1.bf16.msra.mxu1 %v2332_v0  ;;  %2492 = vmatprep.mubr.bf16.mxu1 %v2954_v1 }
 0x1a3   : > { %2827 = vmatmul.mubr.msk.bf16.vlgmr.msra.gmra.mrb[36].mxu0 %vm461_vm3, %v2821_v50 }
 0x1a8   : > { %2829 = vmatmul.mubr.msk.bf16.vlgmr.msra.gmra.mrb[36].mxu1 %vm461_vm3, %v2821_v50  ;;  %v3412_v50 = vadd.s32 256, %v3404_v34 }
 0x20e   : > { %v3388_v4 = vpop.f32.mrb[0].mxu0 }
 0x20f   : > { %v3390_v5 = vpop.f32.mrb[1].mxu0 }
 0x210   : > { %v994_v6 = vpop.f32.mrb[2].mxu0 }
 0x211   : > { %v995_v7 = vpop.f32.mrb[3].mxu0 }
 0x212   : > { %v325_v7 = vand.u32 31, %v3412_v50 }
 0x213   : > { %v3392_v8 = vpop.f32.mrb[0].mxu1 }
 0x214   : > { %v3394_v9 = vpop.f32.mrb[1].mxu1  ;;  %vm3446_vm13 = vcmp.ge.s32.totalorder %v325_v7, 1  ;;  %vm2511_vm6 = vcmp.le.s32.totalorder %v325_v7, 30 }
 0x215   : > { %v1035_v10 = vpop.f32.mrb[2].mxu1 }
 0x216   : > { %v1036_v11 = vpop.f32.mrb[3].mxu1  ;;  %v3396_v12 = vpop.f32.mrb[4].mxu0  ;;  %v3434_v10 = vadd.s32 640, %v3404_v34 }
 0x217   : > { %v3398_v13 = vpop.f32.mrb[5].mxu0 }
 0x218   : > { %v1076_v1 = vpop.f32.mrb[6].mxu0 }
 0x219   : > { %v1077_v14 = vpop.f32.mrb[7].mxu0 }
 0x21a   : > { %v332_v14 = vand.u32 31, %v3415_v51 }
 0x21b   : > { %v3400_v15 = vpop.f32.mrb[4].mxu1 }
 0x21c   : > { %v3402_v16 = vpop.f32.mrb[5].mxu1  ;;  %vm3456_vm14 = vcmp.ge.s32.totalorder %v332_v14, 1  ;;  %vm2512_vm7 = vcmp.le.s32.totalorder %v332_v14, 30 }
 0x21d   : > { %v1117_v17 = vpop.f32.mrb[6].mxu1 }
 0x21e   : > { %v1118_v18 = vpop.f32.mrb[7].mxu1  ;;  %v1257_v58 = vpop.f32.mrb[8].mxu0 }
 0x21f   : > { %v1259_v19 = vpop.f32.mrb[9].mxu0 }
 0x220   : > { %v1261_v20 = vpop.f32.mrb[10].mxu0 }
 0x221   : > { %v1262_v63 = vpop.f32.mrb[11].mxu0 }
 0x222   : > { %v1153_v63 = vsel %vm3428_vm12, %v3390_v5, 0.0  ;;  %vm2621_vm12 = vcmask 15360  }
 0x223   : > { %v1298_v61 = vpop.f32.mrb[8].mxu1 }
 0x224   : > { %v1300_v59 = vpop.f32.mrb[9].mxu1 }
 0x225   : > { %v1302_v2 = vpop.f32.mrb[10].mxu1 }
 0x226   : > { %v1303_v21 = vpop.f32.mrb[11].mxu1  ;;  %v1339_v22 = vpop.f32.mrb[12].mxu0 }
 0x227   : > { %v1341_v3 = vpop.f32.mrb[13].mxu0 }
 0x228   : > { %v1343_v23 = vpop.f32.mrb[14].mxu0 }
 0x229   : > { %v1344_v60 = vpop.f32.mrb[15].mxu0  ;;  %v3461_v23 = vadd.s32 896, %v3404_v34 }
 0x22b   : > { %v1380_v24 = vpop.f32.mrb[12].mxu1 }
 0x22c   : > { %v1382_v25 = vpop.f32.mrb[13].mxu1 }
 0x22d   : > { %v1384_v26 = vpop.f32.mrb[14].mxu1 }
 0x22e   : > { %v1475_v62 = vpop.f32.mrb[16].mxu0  ;;  %v1385_v28 = vpop.f32.mrb[15].mxu1  ;;  %v1154_v26 = vsel %vm3446_vm13, %v3392_v8, 0.0 }
 0x22f   : > { %v1476_v29 = vadd.f32 %v1475_v62, %v1257_v58  ;;  %v1477_v30 = vpop.f32.mrb[17].mxu0  ;;  %v1152_v58 = vsel %vm3419_vm11, %v3388_v4, 0.0  ;;  %v3452_v4 = vadd.s32 768, %v3404_v34 }
 0x230   : > { %v1478_v31 = vadd.f32 %v1477_v30, %v1259_v19  ;;  %v1479_v32 = vpop.f32.mrb[18].mxu0 }
 0x231   : > { %v1480_v33 = vpop.f32.mrb[19].mxu0  ;;  %v353_v8 = vand.u32 31, %v3452_v4 }
 0x233   : > { %v1516_v35 = vpop.f32.mrb[16].mxu1  ;;  %vm1134_vm2 = vcmp.ge.s32.totalorder %v353_v8, 1  ;;  %vm3533_vm10 = vcmp.le.s32.totalorder %v353_v8, 30 }
 0x234   : > { %v1517_v36 = vadd.f32 %v1516_v35, %v1298_v61  ;;  %v1518_v37 = vpop.f32.mrb[17].mxu1  ;;  %v339_v61 = vand.u32 31, %v3424_v56  ;;  %v360_v35 = vand.u32 31, %v3461_v23 }
 0x235   : > { %v1519_v38 = vadd.f32 %v1518_v37, %v1300_v59  ;;  %v1520_v39 = vpop.f32.mrb[18].mxu1 }
 0x236   : > { %v1557_v41 = vpop.f32.mrb[20].mxu0  ;;  %v1521_v42 = vpop.f32.mrb[19].mxu1  ;;  %vm3468_vm15 = vcmp.ge.s32.totalorder %v339_v61, 1  ;;  %vm1135_vm3 = vcmp.ge.s32.totalorder %v360_v35, 1  ;;  %vm3516_vm8 = vcmp.le.s32.totalorder %v339_v61, 30  ;;  %vm3540_vm11 = vcmp.le.s32.totalorder %v360_v35, 30 }
 0x237   : > { %v1558_v43 = vadd.f32 %v1557_v41, %v1339_v22  ;;  %v1559_v44 = vpop.f32.mrb[21].mxu0  ;;  %v346_v22 = vand.u32 31, %v3434_v10 }
 0x238   : > { %v1560_v45 = vadd.f32 %v1559_v44, %v1341_v3  ;;  %v1561_v46 = vpop.f32.mrb[22].mxu0 }
 0x239   : > { %v1562_v48 = vpop.f32.mrb[23].mxu0  ;;  %vm3477_vm0 = vcmp.ge.s32.totalorder %v346_v22, 1  ;;  %vm3523_vm9 = vcmp.le.s32.totalorder %v346_v22, 30 }
 0x23a   : > { %v1157_v42 = vsel %vm3477_vm0, %v3398_v13, 0.0 }
 0x23b   : > { %v1598_v52 = vpop.f32.mrb[20].mxu1 }
 0x23c   : > { %v1599_v53 = vadd.f32 %v1598_v52, %v1380_v24  ;;  %v1600_v54 = vpop.f32.mrb[21].mxu1 }
 0x23d   : > { %v1601_v57 = vadd.f32 %v1600_v54, %v1382_v25  ;;  %v1602_v0 = vpop.f32.mrb[22].mxu1 }
 0x23e   : > { %v1695_v11 = vpop.f32.mrb[24].mxu0  ;;  %v1603_v1 = vpop.f32.mrb[23].mxu1  ;;  %v1159_v0 = vsel %vm1135_vm3, %v3402_v16, 0.0 }
 0x23f   : > { %v1825_v17 = vadd.f32 %v1695_v11, %v1476_v29  ;;  %v1697_v18 = vpop.f32.mrb[25].mxu0  ;;  %v1155_v29 = vsel %vm3456_vm14, %v3394_v9, 0.0  ;;  %v1156_v9 = vsel %vm3468_vm15, %v3396_v12, 0.0  ;;  %v1158_v12 = vsel %vm1134_vm2, %v3400_v15, 0.0 }
 0x240   : > { %v1826_v19 = vadd.f32 %v1697_v18, %v1478_v31  ;;  %v1699_v20 = vpop.f32.mrb[26].mxu0 }
 0x241   : > { %v1833_v59 = vadd.f32 %v1825_v17, %v1152_v58  ;;  %v1700_v2 = vpop.f32.mrb[27].mxu0 }
 0x242   : > { %v1834_v3 = vadd.f32 %v1826_v19, %v1153_v63 }
 0x243   : > { %v1736_v60 = vpop.f32.mrb[24].mxu1 }
 0x244   : > { %v1827_v24 = vadd.f32 %v1736_v60, %v1517_v36  ;;  %v1738_v25 = vpop.f32.mrb[25].mxu1 }
 0x245   : > { %v1828_v62 = vadd.f32 %v1738_v25, %v1519_v38  ;;  %v1740_v28 = vpop.f32.mrb[26].mxu1 }
 0x246   : > { %v1835_v31 = vadd.f32 %v1827_v24, %v1154_v26  ;;  %v1777_v32 = vpop.f32.mrb[28].mxu0  ;;  %v1741_v33 = vpop.f32.mrb[27].mxu1 }
 0x247   : > { %v1836_v36 = vadd.f32 %v1828_v62, %v1155_v29  ;;  %v1829_v37 = vadd.f32 %v1777_v32, %v1558_v43  ;;  %v1779_v38 = vpop.f32.mrb[29].mxu0 }
 0x248   : > { %v1830_v39 = vadd.f32 %v1779_v38, %v1560_v45  ;;  %v1781_v41 = vpop.f32.mrb[30].mxu0 }
 0x249   : > { %v1837_v44 = vadd.f32 %v1829_v37, %v1156_v9  ;;  %v1782_v46 = vpop.f32.mrb[31].mxu0 }
 0x24a   : > { %v1838_v48 = vadd.f32 %v1830_v39, %v1157_v42 }
 0x24b   : > { %v1818_v43 = vpop.f32.mrb[28].mxu1 }
 0x24c   : > { %v1831_v52 = vadd.f32 %v1818_v43, %v1599_v53  ;;  %v1820_v54 = vpop.f32.mrb[29].mxu1 }
 0x24d   : > { %v1832_v45 = vadd.f32 %v1820_v54, %v1601_v57  ;;  %v1822_v55 = vpop.f32.mrb[30].mxu1 }
 0x24e   : > { %v3495_v13 = vadd.f32 %v1831_v52, %v1158_v12  ;;  %v1823_v6 = vpop.f32.mrb[31].mxu1 }
 0x24f   : > { %v3497_v11 = vadd.f32 %v1832_v45, %v1159_v0 }
 0x26e   : > { %v2371_v53 = vpop.f32.mrb[32].mxu0 }
 0x26f   : > { %v2533_v1 = vsel %vm2509_vm4, %v2371_v53, 0.0  ;;  %v2373_v17 = vpop.f32.mrb[33].mxu0 }
 0x270   : > { %v2541_v15 = vadd.f32 %v2533_v1, %v1833_v59  ;;  %v2534_v57 = vsel %vm2510_vm5, %v2373_v17, 0.0  ;;  %v2375_v18 = vpop.f32.mrb[34].mxu0 }
 0x271   : > { %v2542_v58 = vadd.f32 %v2534_v57, %v1834_v3  ;;  %v2376_v16 = vpop.f32.mrb[35].mxu0 }
 0x272   : > { %v2549_v19 = vpack.c.bf16 %v2541_v15, %v2541_v15 }
 0x273   : > { %v2550_v34 = vpack.c.bf16 %v2542_v58, %v2542_v58  ;;  %v2842_v40 = vpack.c.bf16 %v2542_v58, %v2541_v15  ;;  %v2412_v47 = vpop.f32.mrb[32].mxu1 }
 0x274   : > { %v2585_v49 = vunpack.c.l.bf16 %v2549_v19  ;;  %v2535_v20 = vsel %vm2511_vm6, %v2412_v47, 0.0  ;;  %v2414_v63 = vpop.f32.mrb[33].mxu1 }
 0x275   : > { %2581 = vst [vmem:[%s3510_s30] sm:$0xff] %v2842_v40  ;;  %v2586_v7 = vunpack.c.l.bf16 %v2550_v34  ;;  %v2543_v59 = vadd.f32 %v2535_v20, %v1835_v31  ;;  %v2536_v2 = vsel %vm2512_vm7, %v2414_v63, 0.0  ;;  %v2416_v21 = vpop.f32.mrb[34].mxu1 }
 0x276   : > { %v2602_v14 = vmul.f32 %v2585_v49, %v2585_v49  ;;  %v2544_v3 = vadd.f32 %v2536_v2, %v1836_v36  ;;  %v2417_v5 = vpop.f32.mrb[35].mxu1  ;;  %v2453_v60 = vpop.f32.mrb[36].mxu0 }
 0x277   : > { %v2593_v56 = vadd.f32 %v2586_v7, %v2585_v49  ;;  %v2603_v61 = vmul.f32 %v2586_v7, %v2586_v7  ;;  %v2551_v24 = vpack.c.bf16 %v2543_v59, %v2543_v59  ;;  %v2537_v25 = vsel %vm3516_vm8, %v2453_v60, 0.0  ;;  %v2455_v26 = vpop.f32.mrb[37].mxu0 }
 0x278   : > { %v2552_v27 = vpack.c.bf16 %v2544_v3, %v2544_v3  ;;  %v2843_v62 = vpack.c.bf16 %v2544_v3, %v2543_v59  ;;  %v2545_v28 = vadd.f32 %v2537_v25, %v1837_v44  ;;  %v2538_v10 = vsel %vm3523_vm9, %v2455_v26, 0.0  ;;  %v2457_v22 = vpop.f32.mrb[38].mxu0 }
 0x279   : > { %v2610_v29 = vadd.f32 %v2603_v61, %v2602_v14  ;;  %v2587_v30 = vunpack.c.l.bf16 %v2551_v24  ;;  %v2546_v31 = vadd.f32 %v2538_v10, %v1838_v48  ;;  %v2458_v32 = vpop.f32.mrb[39].mxu0 }
 0x27a   : > { %2582 = vst [vmem:[%s3510_s30 + $0x8] sm:$0xff] %v2843_v62  ;;  %v2588_v36 = vunpack.c.l.bf16 %v2552_v27  ;;  %v2553_v37 = vpack.c.bf16 %v2545_v28, %v2545_v28 }
 0x27b   : > { %v2594_v9 = vadd.f32 %v2593_v56, %v2587_v30  ;;  %v2604_v39 = vmul.f32 %v2587_v30, %v2587_v30  ;;  %v2554_v41 = vpack.c.bf16 %v2546_v31, %v2546_v31  ;;  %v2844_v42 = vpack.c.bf16 %v2546_v31, %v2545_v28  ;;  %v2494_v44 = vpop.f32.mrb[36].mxu1 }
 0x27c   : > { %v2605_v4 = vmul.f32 %v2588_v36, %v2588_v36  ;;  %v2589_v8 = vunpack.c.l.bf16 %v2553_v37  ;;  %v2539_v46 = vsel %vm3533_vm10, %v2494_v44, 0.0  ;;  %v2496_v48 = vpop.f32.mrb[37].mxu1 }
 0x27d   : > { %v2611_v43 = vadd.f32 %v2610_v29, %v2604_v39  ;;  %v2595_v52 = vadd.f32 %v2594_v9, %v2588_v36  ;;  %2583 = vst [vmem:[%s3510_s30 + $0x10] sm:$0xff] %v2844_v42  ;;  %v2590_v54 = vunpack.c.l.bf16 %v2554_v41  ;;  %v2547_v23 = vadd.f32 %v2539_v46, %v3495_v13  ;;  %v2498_v35 = vpop.f32.mrb[38].mxu1 }
 0x27e   : > { %v2606_v12 = vmul.f32 %v2589_v8, %v2589_v8  ;;  %v2540_v45 = vsel %vm3540_vm11, %v2496_v48, 0.0  ;;  %v2499_v55 = vpop.f32.mrb[39].mxu1 }
 0x27f   : > { %v2612_v0 = vadd.f32 %v2611_v43, %v2605_v4  ;;  %v2596_v6 = vadd.f32 %v2595_v52, %v2589_v8  ;;  %v2607_v53 = vmul.f32 %v2590_v54, %v2590_v54  ;;  %v2555_v1 = vpack.c.bf16 %v2547_v23, %v2547_v23 }
 0x280   : > { %v2548_v17 = vadd.f32 %v2540_v45, %v3497_v11 }
 0x281   : > { %v2591_v15 = vunpack.c.l.bf16 %v2555_v1  ;;  %v2597_v57 = vadd.f32 %v2596_v6, %v2590_v54  ;;  %v2613_v18 = vadd.f32 %v2612_v0, %v2606_v12 }
 0x282   : > { %v2556_v58 = vpack.c.bf16 %v2548_v17, %v2548_v17  ;;  %v2845_v16 = vpack.c.bf16 %v2548_v17, %v2547_v23 }
 0x283   : > { %v2598_v13 = vadd.f32 %v2597_v57, %v2591_v15  ;;  %v2608_v19 = vmul.f32 %v2591_v15, %v2591_v15  ;;  %v2614_v34 = vadd.f32 %v2613_v18, %v2607_v53 }
 0x284   : > { %2584 = vst [vmem:[%s3510_s30 + $0x18] sm:$0xff] %v2845_v16  ;;  %v2592_v40 = vunpack.c.l.bf16 %v2556_v58 }
 0x285   : > { %v2615_v47 = vadd.f32 %v2614_v34, %v2608_v19 }
 0x286   : > { %v2599_v49 = vadd.f32 %v2598_v13, %v2592_v40  ;;  %v2609_v20 = vmul.f32 %v2592_v40, %v2592_v40 }
 0x288   : > { %2600 = vadd.xlane.f32.xlu0 %v2599_v49  ;;  %v2616_v63 = vadd.f32 %v2615_v47, %v2609_v20 }
 0x28a   : > { %2617 = vadd.xlane.f32.xlu1 %v2616_v63 }
 0x315   : > { %v2601_v11 = vpop.xlane.xlu0 %2600 }
 0x317   : > { %v2618_v50 = vpop.xlane.xlu1 %2617 }
 0x318   : > { %v2620_v7 = vsel %vm452_vm1, %v2601_v11, %v2618_v50 }
 0x319   : > { %2622 = vst.msk [vmem:[%s208_s7] sm:$0xff] %vm2621_vm12, %v2620_v7 }
 0x31a PF: > { %s15_s15 = sadd.s32 1, %s2952_s15  }
 0x31b   : > { %p12_p4 = scmp.ge.s32.totalorder %s15_s15, 4  }
 0x31d   :  { %14 = sbr.rel (!%p12_p4) target bundleno = 1 (0x1), region = 83 }

</bundles_post_ra>
